<compile_context>
chip_gen: v6e
topology: v6e:2x2x1
jax: 0.10.0
libtpu: 0.0.40
codegen_flags: <defaults>
</compile_context>

<pallas_src>
import functools
import math

import jax
import jax.numpy as jnp
from jax.experimental import pallas as pl
from jax.experimental.pallas import tpu as pltpu

_LN_EPS = 1e-5


def _layer_norm(z, g, b, eps):
    mu = jnp.mean(z, axis=-1, keepdims=True)
    var = jnp.mean(jnp.square(z - mu), axis=-1, keepdims=True)
    return (z - mu) * jax.lax.rsqrt(var + eps) * g + b


# ------------------------------ fused kernel --------------------------------

def _dtn_fused_kernel(*refs, n_layers, n_mlp, n_heads, dh, scale, eps):
    """One batch element (one full sequence) per grid step.

    refs = (x, mask, pe, emb_w, emb_b,
            [wqkv, bqkv, wo, bo, ln1_g, ln1_b,
             ff_w1, ff_b1, ff_w2, ff_b2, ln2_g, ln2_b] * n_layers,
            [w, b] * n_mlp,
            out_ref, attn_scratch)
    """
    o_ref = refs[-2]
    attn_buf = refs[-1]                                   # (S, D) f32 VMEM scratch
    it = iter(refs[:-2])

    x_ref, mask_ref, pe_ref = next(it), next(it), next(it)
    emb_w, emb_b = next(it), next(it)
    layers = [tuple(next(it) for _ in range(12)) for _ in range(n_layers)]
    mlps = [tuple(next(it) for _ in range(2)) for _ in range(n_mlp)]

    D = n_heads * dh
    bf16 = jnp.bfloat16

    # ---- fw_embedding + positional encoding (dropout = identity at eval) ----
    h = (jnp.dot(x_ref[...].astype(bf16), emb_w[...],
                 preferred_element_type=jnp.float32)
         + emb_b[...] + pe_ref[...])                       # (S, D) f32

    mask = mask_ref[0]                                     # (1, S) additive 0/-inf

    # ---- TransformerEncoder: post-norm layers, ReLU feed-forward ----
    for (wqkv, bqkv, wo, bo, ln1_g, ln1_b,
         ff_w1, ff_b1, ff_w2, ff_b2, ln2_g, ln2_b) in layers:
        # Fused QKV projection: one (D, 3D) MXU matmul, f32 accumulation.
        qkv = jnp.dot(h.astype(bf16), wqkv[...],
                      preferred_element_type=jnp.float32) + bqkv[...]  # (S, 3D)
        q = qkv[:, 0 * D:1 * D] * scale      # scale once, not per (S,S) scores
        k = qkv[:, 1 * D:2 * D]
        v = qkv[:, 2 * D:3 * D]

        # Per-head attention; head outputs land in the (S, D) VMEM scratch so
        # the output projection is a single (S,D)@(D,D) matmul.
        # TODO(synk): at large S, add a KV-block grid axis with online softmax
        # (flash pattern) so the (S,S) scores never materialise in full VMEM.
        for hd in range(n_heads):
            lo = hd * dh
            qh = q[:, lo:lo + dh]
            kh = k[:, lo:lo + dh]
            vh = v[:, lo:lo + dh]
            # scores[q, k] = sum_d qh[q, d] * kh[k, d]   (Q @ K^T, no transpose op)
            s = jax.lax.dot_general(qh, kh, (((1,), (1,)), ((), ())),
                                    preferred_element_type=jnp.float32)
            s = s + mask                                   # mask padded keys
            m = jnp.max(s, axis=-1, keepdims=True)
            p = jnp.exp(s - m)
            l = jnp.sum(p, axis=-1, keepdims=True)
            oh = jnp.dot(p, vh, preferred_element_type=jnp.float32)
            attn_buf[:, lo:lo + dh] = oh * pl.reciprocal(l, approx=True)

        proj = jnp.dot(attn_buf[...].astype(bf16), wo[...],
                       preferred_element_type=jnp.float32) + bo[...]

        # Residual + post-norm LayerNorm1 (f32).
        h = _layer_norm(h + proj, ln1_g[...], ln1_b[...], eps)

        # FFN (W1 + ReLU + W2); the (S, dff) intermediate stays on-chip.
        h1 = jnp.dot(h.astype(bf16), ff_w1[...],
                     preferred_element_type=jnp.float32) + ff_b1[...]
        h1 = jnp.maximum(h1, 0.0)
        h2 = jnp.dot(h1.astype(bf16), ff_w2[...],
                     preferred_element_type=jnp.float32) + ff_b2[...]
        h = _layer_norm(h + h2, ln2_g[...], ln2_b[...], eps)

    # ---- MLP head (Linear + ReLU stack) ----
    for (w, b) in mlps:
        h = jnp.dot(h.astype(bf16), w[...],
                    preferred_element_type=jnp.float32) + b[...]
        h = jnp.maximum(h, 0.0)

    # ---- log_softmax over the SEQUENCE axis (axis 0 of this per-batch block) ----
    m = jnp.max(h, axis=0, keepdims=True)
    e = jnp.exp(h - m)
    o_ref[...] = h - m - jnp.log(jnp.sum(e, axis=0, keepdims=True))


# ------------------------------ kernel wrapper -------------------------------

def dtn_forward(params, x, src_mask, n_heads):
    B, S, V = x.shape
    D = params["fw_emb_w"].shape[1]
    F_out = params["mlp"][-1]["w"].shape[1]
    n_layers = len(params["layers"])
    n_mlp = len(params["mlp"])
    dh = D // n_heads

    x2d = x.reshape(B * S, V)                     # free, contiguous reshape
    pe = params["pe_table"][:S]                   # (S, D), broadcast in-kernel
    mask3d = src_mask.reshape(B, 1, S)            # (B, 1, S), broadcast in-kernel

    const2d = lambda b: (0, 0)                    # weight blocks never move
    args = [x2d, mask3d, pe, params["fw_emb_w"], params["fw_emb_b"]]
    in_specs = [
        pl.BlockSpec((S, V), lambda b: (b, 0)),
        pl.BlockSpec((1, 1, S), lambda b: (b, 0, 0)),
        pl.BlockSpec((S, D), const2d),
        pl.BlockSpec(params["fw_emb_w"].shape, const2d),
        pl.BlockSpec(params["fw_emb_b"].shape, const2d),
    ]
    # TODO(synk): at realistic D/dff, single-buffer these constant-index weight
    # blocks (pipeline_mode=pl.Buffered(1)) to halve their VMEM footprint on v7x.
    for lyr in params["layers"]:
        for name in ("wqkv", "bqkv", "wo", "bo", "ln1_g", "ln1_b",
                     "ff_w1", "ff_b1", "ff_w2", "ff_b2", "ln2_g", "ln2_b"):
            w = lyr[name]
            args.append(w)
            in_specs.append(pl.BlockSpec(w.shape, const2d))
    for mp in params["mlp"]:
        args += [mp["w"], mp["b"]]
        in_specs += [pl.BlockSpec(mp["w"].shape, const2d),
                     pl.BlockSpec(mp["b"].shape, const2d)]

    kernel = functools.partial(
        _dtn_fused_kernel, n_layers=n_layers, n_mlp=n_mlp, n_heads=n_heads,
        dh=dh, scale=1.0 / math.sqrt(dh), eps=_LN_EPS)

    out = pl.pallas_call(
        kernel,
        out_shape=jax.ShapeDtypeStruct((B * S, F_out), jnp.float32),
        grid=(B,),
        in_specs=in_specs,
        out_specs=pl.BlockSpec((S, F_out), lambda b: (b, 0)),
        scratch_shapes=[pltpu.VMEM((S, D), jnp.float32)],
        compiler_params=pltpu.CompilerParams(
            dimension_semantics=("parallel",)),
    )(*args)
    return out.reshape(B, S, F_out)


# --------------------------- parameter construction --------------------------

def xavier_uniform(key, shape, dtype=jnp.float32):
    fan_in, fan_out = shape[0], shape[1]
    bound = math.sqrt(6.0 / (fan_in + fan_out))
    return jax.random.uniform(key, shape, jnp.float32, -bound, bound).astype(dtype)


def positional_encoding_table(max_len, d):
    pos = jnp.arange(max_len, dtype=jnp.float32)[:, None]
    freqs = jnp.power(10000.0, -jnp.arange(0, d, 2, dtype=jnp.float32) / d)
    args = pos * freqs
    pe = jnp.zeros((max_len, d), jnp.float32)
    pe = pe.at[:, 0::2].set(jnp.sin(args))
    pe = pe.at[:, 1::2].set(jnp.cos(args)[:, :d // 2])    # robust for odd d
    return pe


def init_params(key, model_dim, n_heads, n_layers, n_var, hidden_list,
                dim_feedforward=2048, max_seq=5000):
    n_keys = 1 + 4 * n_layers + len(hidden_list)
    keys = iter(jax.random.split(key, n_keys))
    D, dff = model_dim, dim_feedforward
    bf16 = jnp.bfloat16   # matmul weights bf16 (MXU-native), everything else f32
    params = {
        "fw_emb_w": xavier_uniform(next(keys), (n_var, D), bf16),
        "fw_emb_b": jnp.zeros((1, D), jnp.float32),
        "pe_table": positional_encoding_table(max_seq, D),
        "layers": [],
        "mlp": [],
    }
    for _ in range(n_layers):
        params["layers"].append({
            "wqkv": xavier_uniform(next(keys), (D, 3 * D), bf16),
            "bqkv": jnp.zeros((1, 3 * D), jnp.float32),
            "wo": xavier_uniform(next(keys), (D, D), bf16),
            "bo": jnp.zeros((1, D), jnp.float32),
            "ln1_g": jnp.ones((1, D), jnp.float32),
            "ln1_b": jnp.zeros((1, D), jnp.float32),
            "ln2_g": jnp.ones((1, D), jnp.float32),
            "ln2_b": jnp.zeros((1, D), jnp.float32),
            "ff_w1": xavier_uniform(next(keys), (D, dff), bf16),
            "ff_b1": jnp.zeros((1, dff), jnp.float32),
            "ff_w2": xavier_uniform(next(keys), (dff, D), bf16),
            "ff_b2": jnp.zeros((1, D), jnp.float32),
        })
    prev = D
    for h in hidden_list:
        params["mlp"].append({
            "w": xavier_uniform(next(keys), (prev, h), bf16),
            "b": jnp.zeros((1, h), jnp.float32),
        })
        prev = h
    return params


def get_key_padding_mask(tokens):
    # mirrors DTN_model.get_key_padding_mask: 0 where feature-0 != 0, -inf where == 0
    tmp = tokens[:, :, 0]
    return jnp.where(tmp == 0, -jnp.inf, 0.0).astype(jnp.float32)


# ----------------------------------- main ------------------------------------

if __name__ == "__main__":
    # small, module-consistent shapes
    B, S = 2, 8
    number_of_var = 4
    model_dimension = 32
    number_of_heads = 4
    number_of_layers = 2
    hidden_dimension_list = [32, 16]

    key = jax.random.PRNGKey(0)
    pkey, xkey = jax.random.split(key)

    params = init_params(pkey, model_dimension, number_of_heads,
                         number_of_layers, number_of_var, hidden_dimension_list)

    x = jax.random.normal(xkey, (B, S, number_of_var), jnp.float32)
    # make one token a "padding" token (feature 0 == 0) to exercise the mask
    x = x.at[1, S - 1, :].set(0.0)
    src_mask = get_key_padding_mask(x)            # (B, S) with 0 / -inf

    fwd = jax.jit(functools.partial(dtn_forward, n_heads=number_of_heads))
    pred = jax.block_until_ready(fwd(params, x, src_mask))

    assert pred.shape == (B, S, hidden_dimension_list[-1])
    assert bool(jnp.all(jnp.isfinite(pred)))
    print("KERNEL_OK")
</pallas_src>

<mosaic_0001>
module attributes {stable_mosaic.version = 11 : i64} {
  func.func @_dtn_fused_kernel(%arg0: i32, %arg1: memref<8x4xf32, #tpu.memory_space<vmem>>, %arg2: memref<1x1x8xf32, #tpu.memory_space<vmem>>, %arg3: memref<8x32xf32, #tpu.memory_space<vmem>>, %arg4: memref<4x32xbf16, #tpu.memory_space<vmem>>, %arg5: memref<1x32xf32, #tpu.memory_space<vmem>>, %arg6: memref<32x96xbf16, #tpu.memory_space<vmem>>, %arg7: memref<1x96xf32, #tpu.memory_space<vmem>>, %arg8: memref<32x32xbf16, #tpu.memory_space<vmem>>, %arg9: memref<1x32xf32, #tpu.memory_space<vmem>>, %arg10: memref<1x32xf32, #tpu.memory_space<vmem>>, %arg11: memref<1x32xf32, #tpu.memory_space<vmem>>, %arg12: memref<32x2048xbf16, #tpu.memory_space<vmem>>, %arg13: memref<1x2048xf32, #tpu.memory_space<vmem>>, %arg14: memref<2048x32xbf16, #tpu.memory_space<vmem>>, %arg15: memref<1x32xf32, #tpu.memory_space<vmem>>, %arg16: memref<1x32xf32, #tpu.memory_space<vmem>>, %arg17: memref<1x32xf32, #tpu.memory_space<vmem>>, %arg18: memref<32x96xbf16, #tpu.memory_space<vmem>>, %arg19: memref<1x96xf32, #tpu.memory_space<vmem>>, %arg20: memref<32x32xbf16, #tpu.memory_space<vmem>>, %arg21: memref<1x32xf32, #tpu.memory_space<vmem>>, %arg22: memref<1x32xf32, #tpu.memory_space<vmem>>, %arg23: memref<1x32xf32, #tpu.memory_space<vmem>>, %arg24: memref<32x2048xbf16, #tpu.memory_space<vmem>>, %arg25: memref<1x2048xf32, #tpu.memory_space<vmem>>, %arg26: memref<2048x32xbf16, #tpu.memory_space<vmem>>, %arg27: memref<1x32xf32, #tpu.memory_space<vmem>>, %arg28: memref<1x32xf32, #tpu.memory_space<vmem>>, %arg29: memref<1x32xf32, #tpu.memory_space<vmem>>, %arg30: memref<32x32xbf16, #tpu.memory_space<vmem>>, %arg31: memref<1x32xf32, #tpu.memory_space<vmem>>, %arg32: memref<32x16xbf16, #tpu.memory_space<vmem>>, %arg33: memref<1x16xf32, #tpu.memory_space<vmem>>, %arg34: memref<8x16xf32, #tpu.memory_space<vmem>>, %arg35: memref<8x32xf32, #tpu.memory_space<vmem>>) attributes {dimension_semantics = [#tpu.dimension_semantics<parallel>], iteration_bounds = array<i64: 2>, scalar_prefetch = 0 : i64, scratch_operands = 1 : i64, tpu.core_type = #tpu.core_type<tc>, window_params = [{transform_indices = @transform_0, window_bounds = array<i64: 8, 4>}, {transform_indices = @transform_1, window_bounds = array<i64: 1, 1, 8>}, {pipeline_mode = #tpu.pipeline_mode<synchronous>, transform_indices = @transform_2, window_bounds = array<i64: 8, 32>}, {pipeline_mode = #tpu.pipeline_mode<synchronous>, transform_indices = @transform_3, window_bounds = array<i64: 4, 32>}, {pipeline_mode = #tpu.pipeline_mode<synchronous>, transform_indices = @transform_4, window_bounds = array<i64: 1, 32>}, {pipeline_mode = #tpu.pipeline_mode<synchronous>, transform_indices = @transform_5, window_bounds = array<i64: 32, 96>}, {pipeline_mode = #tpu.pipeline_mode<synchronous>, transform_indices = @transform_6, window_bounds = array<i64: 1, 96>}, {pipeline_mode = #tpu.pipeline_mode<synchronous>, transform_indices = @transform_7, window_bounds = array<i64: 32, 32>}, {pipeline_mode = #tpu.pipeline_mode<synchronous>, transform_indices = @transform_8, window_bounds = array<i64: 1, 32>}, {pipeline_mode = #tpu.pipeline_mode<synchronous>, transform_indices = @transform_9, window_bounds = array<i64: 1, 32>}, {pipeline_mode = #tpu.pipeline_mode<synchronous>, transform_indices = @transform_10, window_bounds = array<i64: 1, 32>}, {pipeline_mode = #tpu.pipeline_mode<synchronous>, transform_indices = @transform_11, window_bounds = array<i64: 32, 2048>}, {pipeline_mode = #tpu.pipeline_mode<synchronous>, transform_indices = @transform_12, window_bounds = array<i64: 1, 2048>}, {pipeline_mode = #tpu.pipeline_mode<synchronous>, transform_indices = @transform_13, window_bounds = array<i64: 2048, 32>}, {pipeline_mode = #tpu.pipeline_mode<synchronous>, transform_indices = @transform_14, window_bounds = array<i64: 1, 32>}, {pipeline_mode = #tpu.pipeline_mode<synchronous>, transform_indices = @transform_15, window_bounds = array<i64: 1, 32>}, {pipeline_mode = #tpu.pipeline_mode<synchronous>, transform_indices = @transform_16, window_bounds = array<i64: 1, 32>}, {pipeline_mode = #tpu.pipeline_mode<synchronous>, transform_indices = @transform_17, window_bounds = array<i64: 32, 96>}, {pipeline_mode = #tpu.pipeline_mode<synchronous>, transform_indices = @transform_18, window_bounds = array<i64: 1, 96>}, {pipeline_mode = #tpu.pipeline_mode<synchronous>, transform_indices = @transform_19, window_bounds = array<i64: 32, 32>}, {pipeline_mode = #tpu.pipeline_mode<synchronous>, transform_indices = @transform_20, window_bounds = array<i64: 1, 32>}, {pipeline_mode = #tpu.pipeline_mode<synchronous>, transform_indices = @transform_21, window_bounds = array<i64: 1, 32>}, {pipeline_mode = #tpu.pipeline_mode<synchronous>, transform_indices = @transform_22, window_bounds = array<i64: 1, 32>}, {pipeline_mode = #tpu.pipeline_mode<synchronous>, transform_indices = @transform_23, window_bounds = array<i64: 32, 2048>}, {pipeline_mode = #tpu.pipeline_mode<synchronous>, transform_indices = @transform_24, window_bounds = array<i64: 1, 2048>}, {pipeline_mode = #tpu.pipeline_mode<synchronous>, transform_indices = @transform_25, window_bounds = array<i64: 2048, 32>}, {pipeline_mode = #tpu.pipeline_mode<synchronous>, transform_indices = @transform_26, window_bounds = array<i64: 1, 32>}, {pipeline_mode = #tpu.pipeline_mode<synchronous>, transform_indices = @transform_27, window_bounds = array<i64: 1, 32>}, {pipeline_mode = #tpu.pipeline_mode<synchronous>, transform_indices = @transform_28, window_bounds = array<i64: 1, 32>}, {pipeline_mode = #tpu.pipeline_mode<synchronous>, transform_indices = @transform_29, window_bounds = array<i64: 32, 32>}, {pipeline_mode = #tpu.pipeline_mode<synchronous>, transform_indices = @transform_30, window_bounds = array<i64: 1, 32>}, {pipeline_mode = #tpu.pipeline_mode<synchronous>, transform_indices = @transform_31, window_bounds = array<i64: 32, 16>}, {pipeline_mode = #tpu.pipeline_mode<synchronous>, transform_indices = @transform_32, window_bounds = array<i64: 1, 16>}, {transform_indices = @transform_33, window_bounds = array<i64: 8, 16>}]} {
    %c0 = arith.constant 0 : index
    %c0_0 = arith.constant 0 : index
    %0 = vector.load %arg1[%c0, %c0_0] : memref<8x4xf32, #tpu.memory_space<vmem>>, vector<8x4xf32>
    %1 = arith.truncf %0 : vector<8x4xf32> to vector<8x4xbf16>
    %c0_1 = arith.constant 0 : index
    %c0_2 = arith.constant 0 : index
    %2 = vector.load %arg4[%c0_1, %c0_2] : memref<4x32xbf16, #tpu.memory_space<vmem>>, vector<4x32xbf16>
    %cst = arith.constant dense<0.000000e+00> : vector<8x32xf32>
    %3 = tpu.matmul %1, %2, %cst {dimension_numbers = #tpu.dot_dimension_numbers<[1], [0], [0], [1], [0, 0, 1, 1], [], []>} : vector<8x4xbf16>, vector<4x32xbf16>, vector<8x32xf32> -> vector<8x32xf32>
    %c0_3 = arith.constant 0 : index
    %c0_4 = arith.constant 0 : index
    %4 = vector.load %arg5[%c0_3, %c0_4] : memref<1x32xf32, #tpu.memory_space<vmem>>, vector<1x32xf32>
    %5 = vector.broadcast %4 : vector<1x32xf32> to vector<8x32xf32>
    %6 = arith.addf %3, %5 : vector<8x32xf32>
    %c0_5 = arith.constant 0 : index
    %c0_6 = arith.constant 0 : index
    %7 = vector.load %arg3[%c0_5, %c0_6] : memref<8x32xf32, #tpu.memory_space<vmem>>, vector<8x32xf32>
    %8 = arith.addf %6, %7 : vector<8x32xf32>
    %c0_7 = arith.constant 0 : index
    %c0_8 = arith.constant 0 : index
    %c0_9 = arith.constant 0 : index
    %9 = vector.load %arg2[%c0_7, %c0_8, %c0_9] : memref<1x1x8xf32, #tpu.memory_space<vmem>>, vector<1x1x8xf32>
    %10 = vector.shape_cast %9 : vector<1x1x8xf32> to vector<1x8xf32>
    %11 = arith.truncf %8 : vector<8x32xf32> to vector<8x32xbf16>
    %c0_10 = arith.constant 0 : index
    %c0_11 = arith.constant 0 : index
    %12 = vector.load %arg6[%c0_10, %c0_11] : memref<32x96xbf16, #tpu.memory_space<vmem>>, vector<32x96xbf16>
    %cst_12 = arith.constant dense<0.000000e+00> : vector<8x96xf32>
    %13 = tpu.matmul %11, %12, %cst_12 {dimension_numbers = #tpu.dot_dimension_numbers<[1], [0], [0], [1], [0, 0, 1, 1], [], []>} : vector<8x32xbf16>, vector<32x96xbf16>, vector<8x96xf32> -> vector<8x96xf32>
    %c0_13 = arith.constant 0 : index
    %c0_14 = arith.constant 0 : index
    %14 = vector.load %arg7[%c0_13, %c0_14] : memref<1x96xf32, #tpu.memory_space<vmem>>, vector<1x96xf32>
    %15 = vector.broadcast %14 : vector<1x96xf32> to vector<8x96xf32>
    %16 = arith.addf %13, %15 : vector<8x96xf32>
    %17 = vector.extract_strided_slice %16 {offsets = [0, 0], sizes = [8, 32], strides = [1, 1]} : vector<8x96xf32> to vector<8x32xf32>
    %cst_15 = arith.constant 0.353553385 : f32
    %18 = vector.broadcast %cst_15 : f32 to vector<8x32xf32>
    %19 = arith.mulf %17, %18 : vector<8x32xf32>
    %20 = vector.extract_strided_slice %16 {offsets = [0, 32], sizes = [8, 32], strides = [1, 1]} : vector<8x96xf32> to vector<8x32xf32>
    %21 = vector.extract_strided_slice %16 {offsets = [0, 64], sizes = [8, 32], strides = [1, 1]} : vector<8x96xf32> to vector<8x32xf32>
    %22 = vector.extract_strided_slice %19 {offsets = [0, 0], sizes = [8, 8], strides = [1, 1]} : vector<8x32xf32> to vector<8x8xf32>
    %23 = vector.extract_strided_slice %20 {offsets = [0, 0], sizes = [8, 8], strides = [1, 1]} : vector<8x32xf32> to vector<8x8xf32>
    %24 = vector.extract_strided_slice %21 {offsets = [0, 0], sizes = [8, 8], strides = [1, 1]} : vector<8x32xf32> to vector<8x8xf32>
    %cst_16 = arith.constant dense<0.000000e+00> : vector<8x8xf32>
    %25 = tpu.matmul %22, %23, %cst_16 {dimension_numbers = #tpu.dot_dimension_numbers<[1], [1], [0], [0], [0, 0, 1, 0], [], []>} : vector<8x8xf32>, vector<8x8xf32>, vector<8x8xf32> -> vector<8x8xf32>
    %26 = vector.broadcast %10 : vector<1x8xf32> to vector<8x8xf32>
    %27 = arith.addf %25, %26 : vector<8x8xf32>
    %cst_17 = arith.constant dense<0xFF800000> : vector<8xf32>
    %28 = vector.multi_reduction <maximumf>, %27, %cst_17 [1] : vector<8x8xf32> to vector<8xf32>
    %29 = vector.shape_cast %28 : vector<8xf32> to vector<8x1xf32>
    %30 = vector.broadcast %29 : vector<8x1xf32> to vector<8x8xf32>
    %31 = arith.subf %27, %30 : vector<8x8xf32>
    %32 = math.exp %31 : vector<8x8xf32>
    %cst_18 = arith.constant dense<0.000000e+00> : vector<8xf32>
    %33 = vector.multi_reduction <add>, %32, %cst_18 [1] : vector<8x8xf32> to vector<8xf32>
    %34 = vector.shape_cast %33 : vector<8xf32> to vector<8x1xf32>
    %cst_19 = arith.constant dense<0.000000e+00> : vector<8x8xf32>
    %35 = tpu.matmul %32, %24, %cst_19 {dimension_numbers = #tpu.dot_dimension_numbers<[1], [0], [0], [1], [0, 0, 1, 1], [], []>} : vector<8x8xf32>, vector<8x8xf32>, vector<8x8xf32> -> vector<8x8xf32>
    %36 = tpu.reciprocal %34 {approx = true} : vector<8x1xf32> -> vector<8x1xf32>
    %37 = vector.broadcast %36 : vector<8x1xf32> to vector<8x8xf32>
    %38 = arith.mulf %35, %37 : vector<8x8xf32>
    %c0_20 = arith.constant 0 : index
    %c0_21 = arith.constant 0 : index
    %39 = vector.load %arg35[%c0_20, %c0_21] : memref<8x32xf32, #tpu.memory_space<vmem>>, vector<8x8xf32>
    tpu.vector_store %arg35[%c0_20, %c0_21], %38 {strides = array<i32>} : memref<8x32xf32, #tpu.memory_space<vmem>>, vector<8x8xf32>,
    %40 = vector.extract_strided_slice %19 {offsets = [0, 8], sizes = [8, 8], strides = [1, 1]} : vector<8x32xf32> to vector<8x8xf32>
    %41 = vector.extract_strided_slice %20 {offsets = [0, 8], sizes = [8, 8], strides = [1, 1]} : vector<8x32xf32> to vector<8x8xf32>
    %42 = vector.extract_strided_slice %21 {offsets = [0, 8], sizes = [8, 8], strides = [1, 1]} : vector<8x32xf32> to vector<8x8xf32>
    %cst_22 = arith.constant dense<0.000000e+00> : vector<8x8xf32>
    %43 = tpu.matmul %40, %41, %cst_22 {dimension_numbers = #tpu.dot_dimension_numbers<[1], [1], [0], [0], [0, 0, 1, 0], [], []>} : vector<8x8xf32>, vector<8x8xf32>, vector<8x8xf32> -> vector<8x8xf32>
    %44 = vector.broadcast %10 : vector<1x8xf32> to vector<8x8xf32>
    %45 = arith.addf %43, %44 : vector<8x8xf32>
    %cst_23 = arith.constant dense<0xFF800000> : vector<8xf32>
    %46 = vector.multi_reduction <maximumf>, %45, %cst_23 [1] : vector<8x8xf32> to vector<8xf32>
    %47 = vector.shape_cast %46 : vector<8xf32> to vector<8x1xf32>
    %48 = vector.broadcast %47 : vector<8x1xf32> to vector<8x8xf32>
    %49 = arith.subf %45, %48 : vector<8x8xf32>
    %50 = math.exp %49 : vector<8x8xf32>
    %cst_24 = arith.constant dense<0.000000e+00> : vector<8xf32>
    %51 = vector.multi_reduction <add>, %50, %cst_24 [1] : vector<8x8xf32> to vector<8xf32>
    %52 = vector.shape_cast %51 : vector<8xf32> to vector<8x1xf32>
    %cst_25 = arith.constant dense<0.000000e+00> : vector<8x8xf32>
    %53 = tpu.matmul %50, %42, %cst_25 {dimension_numbers = #tpu.dot_dimension_numbers<[1], [0], [0], [1], [0, 0, 1, 1], [], []>} : vector<8x8xf32>, vector<8x8xf32>, vector<8x8xf32> -> vector<8x8xf32>
    %54 = tpu.reciprocal %52 {approx = true} : vector<8x1xf32> -> vector<8x1xf32>
    %55 = vector.broadcast %54 : vector<8x1xf32> to vector<8x8xf32>
    %56 = arith.mulf %53, %55 : vector<8x8xf32>
    %c0_26 = arith.constant 0 : index
    %c8 = arith.constant 8 : index
    %57 = vector.load %arg35[%c0_26, %c8] : memref<8x32xf32, #tpu.memory_space<vmem>>, vector<8x8xf32>
    tpu.vector_store %arg35[%c0_26, %c8], %56 {strides = array<i32>} : memref<8x32xf32, #tpu.memory_space<vmem>>, vector<8x8xf32>,
    %58 = vector.extract_strided_slice %19 {offsets = [0, 16], sizes = [8, 8], strides = [1, 1]} : vector<8x32xf32> to vector<8x8xf32>
    %59 = vector.extract_strided_slice %20 {offsets = [0, 16], sizes = [8, 8], strides = [1, 1]} : vector<8x32xf32> to vector<8x8xf32>
    %60 = vector.extract_strided_slice %21 {offsets = [0, 16], sizes = [8, 8], strides = [1, 1]} : vector<8x32xf32> to vector<8x8xf32>
    %cst_27 = arith.constant dense<0.000000e+00> : vector<8x8xf32>
    %61 = tpu.matmul %58, %59, %cst_27 {dimension_numbers = #tpu.dot_dimension_numbers<[1], [1], [0], [0], [0, 0, 1, 0], [], []>} : vector<8x8xf32>, vector<8x8xf32>, vector<8x8xf32> -> vector<8x8xf32>
    %62 = vector.broadcast %10 : vector<1x8xf32> to vector<8x8xf32>
    %63 = arith.addf %61, %62 : vector<8x8xf32>
    %cst_28 = arith.constant dense<0xFF800000> : vector<8xf32>
    %64 = vector.multi_reduction <maximumf>, %63, %cst_28 [1] : vector<8x8xf32> to vector<8xf32>
    %65 = vector.shape_cast %64 : vector<8xf32> to vector<8x1xf32>
    %66 = vector.broadcast %65 : vector<8x1xf32> to vector<8x8xf32>
    %67 = arith.subf %63, %66 : vector<8x8xf32>
    %68 = math.exp %67 : vector<8x8xf32>
    %cst_29 = arith.constant dense<0.000000e+00> : vector<8xf32>
    %69 = vector.multi_reduction <add>, %68, %cst_29 [1] : vector<8x8xf32> to vector<8xf32>
    %70 = vector.shape_cast %69 : vector<8xf32> to vector<8x1xf32>
    %cst_30 = arith.constant dense<0.000000e+00> : vector<8x8xf32>
    %71 = tpu.matmul %68, %60, %cst_30 {dimension_numbers = #tpu.dot_dimension_numbers<[1], [0], [0], [1], [0, 0, 1, 1], [], []>} : vector<8x8xf32>, vector<8x8xf32>, vector<8x8xf32> -> vector<8x8xf32>
    %72 = tpu.reciprocal %70 {approx = true} : vector<8x1xf32> -> vector<8x1xf32>
    %73 = vector.broadcast %72 : vector<8x1xf32> to vector<8x8xf32>
    %74 = arith.mulf %71, %73 : vector<8x8xf32>
    %c0_31 = arith.constant 0 : index
    %c16 = arith.constant 16 : index
    %75 = vector.load %arg35[%c0_31, %c16] : memref<8x32xf32, #tpu.memory_space<vmem>>, vector<8x8xf32>
    tpu.vector_store %arg35[%c0_31, %c16], %74 {strides = array<i32>} : memref<8x32xf32, #tpu.memory_space<vmem>>, vector<8x8xf32>,
    %76 = vector.extract_strided_slice %19 {offsets = [0, 24], sizes = [8, 8], strides = [1, 1]} : vector<8x32xf32> to vector<8x8xf32>
    %77 = vector.extract_strided_slice %20 {offsets = [0, 24], sizes = [8, 8], strides = [1, 1]} : vector<8x32xf32> to vector<8x8xf32>
    %78 = vector.extract_strided_slice %21 {offsets = [0, 24], sizes = [8, 8], strides = [1, 1]} : vector<8x32xf32> to vector<8x8xf32>
    %cst_32 = arith.constant dense<0.000000e+00> : vector<8x8xf32>
    %79 = tpu.matmul %76, %77, %cst_32 {dimension_numbers = #tpu.dot_dimension_numbers<[1], [1], [0], [0], [0, 0, 1, 0], [], []>} : vector<8x8xf32>, vector<8x8xf32>, vector<8x8xf32> -> vector<8x8xf32>
    %80 = vector.broadcast %10 : vector<1x8xf32> to vector<8x8xf32>
    %81 = arith.addf %79, %80 : vector<8x8xf32>
    %cst_33 = arith.constant dense<0xFF800000> : vector<8xf32>
    %82 = vector.multi_reduction <maximumf>, %81, %cst_33 [1] : vector<8x8xf32> to vector<8xf32>
    %83 = vector.shape_cast %82 : vector<8xf32> to vector<8x1xf32>
    %84 = vector.broadcast %83 : vector<8x1xf32> to vector<8x8xf32>
    %85 = arith.subf %81, %84 : vector<8x8xf32>
    %86 = math.exp %85 : vector<8x8xf32>
    %cst_34 = arith.constant dense<0.000000e+00> : vector<8xf32>
    %87 = vector.multi_reduction <add>, %86, %cst_34 [1] : vector<8x8xf32> to vector<8xf32>
    %88 = vector.shape_cast %87 : vector<8xf32> to vector<8x1xf32>
    %cst_35 = arith.constant dense<0.000000e+00> : vector<8x8xf32>
    %89 = tpu.matmul %86, %78, %cst_35 {dimension_numbers = #tpu.dot_dimension_numbers<[1], [0], [0], [1], [0, 0, 1, 1], [], []>} : vector<8x8xf32>, vector<8x8xf32>, vector<8x8xf32> -> vector<8x8xf32>
    %90 = tpu.reciprocal %88 {approx = true} : vector<8x1xf32> -> vector<8x1xf32>
    %91 = vector.broadcast %90 : vector<8x1xf32> to vector<8x8xf32>
    %92 = arith.mulf %89, %91 : vector<8x8xf32>
    %c0_36 = arith.constant 0 : index
    %c24 = arith.constant 24 : index
    %93 = vector.load %arg35[%c0_36, %c24] : memref<8x32xf32, #tpu.memory_space<vmem>>, vector<8x8xf32>
    tpu.vector_store %arg35[%c0_36, %c24], %92 {strides = array<i32>} : memref<8x32xf32, #tpu.memory_space<vmem>>, vector<8x8xf32>,
    %c0_37 = arith.constant 0 : index
    %c0_38 = arith.constant 0 : index
    %94 = vector.load %arg35[%c0_37, %c0_38] : memref<8x32xf32, #tpu.memory_space<vmem>>, vector<8x32xf32>
    %95 = arith.truncf %94 : vector<8x32xf32> to vector<8x32xbf16>
    %c0_39 = arith.constant 0 : index
    %c0_40 = arith.constant 0 : index
    %96 = vector.load %arg8[%c0_39, %c0_40] : memref<32x32xbf16, #tpu.memory_space<vmem>>, vector<32x32xbf16>
    %cst_41 = arith.constant dense<0.000000e+00> : vector<8x32xf32>
    %97 = tpu.matmul %95, %96, %cst_41 {dimension_numbers = #tpu.dot_dimension_numbers<[1], [0], [0], [1], [0, 0, 1, 1], [], []>} : vector<8x32xbf16>, vector<32x32xbf16>, vector<8x32xf32> -> vector<8x32xf32>
    %c0_42 = arith.constant 0 : index
    %c0_43 = arith.constant 0 : index
    %98 = vector.load %arg9[%c0_42, %c0_43] : memref<1x32xf32, #tpu.memory_space<vmem>>, vector<1x32xf32>
    %99 = vector.broadcast %98 : vector<1x32xf32> to vector<8x32xf32>
    %100 = arith.addf %97, %99 : vector<8x32xf32>
    %101 = arith.addf %8, %100 : vector<8x32xf32>
    %c0_44 = arith.constant 0 : index
    %c0_45 = arith.constant 0 : index
    %102 = vector.load %arg10[%c0_44, %c0_45] : memref<1x32xf32, #tpu.memory_space<vmem>>, vector<1x32xf32>
    %c0_46 = arith.constant 0 : index
    %c0_47 = arith.constant 0 : index
    %103 = vector.load %arg11[%c0_46, %c0_47] : memref<1x32xf32, #tpu.memory_space<vmem>>, vector<1x32xf32>
    %cst_48 = arith.constant dense<0.000000e+00> : vector<8xf32>
    %104 = vector.multi_reduction <add>, %101, %cst_48 [1] : vector<8x32xf32> to vector<8xf32>
    %105 = vector.shape_cast %104 : vector<8xf32> to vector<8x1xf32>
    %cst_49 = arith.constant 3.200000e+01 : f32
    %106 = vector.broadcast %cst_49 : f32 to vector<8x1xf32>
    %107 = arith.divf %105, %106 : vector<8x1xf32>
    %108 = vector.broadcast %107 : vector<8x1xf32> to vector<8x32xf32>
    %109 = arith.subf %101, %108 : vector<8x32xf32>
    %110 = arith.mulf %109, %109 : vector<8x32xf32>
    %cst_50 = arith.constant dense<0.000000e+00> : vector<8xf32>
    %111 = vector.multi_reduction <add>, %110, %cst_50 [1] : vector<8x32xf32> to vector<8xf32>
    %112 = vector.shape_cast %111 : vector<8xf32> to vector<8x1xf32>
    %cst_51 = arith.constant 3.200000e+01 : f32
    %113 = vector.broadcast %cst_51 : f32 to vector<8x1xf32>
    %114 = arith.divf %112, %113 : vector<8x1xf32>
    %115 = vector.broadcast %107 : vector<8x1xf32> to vector<8x32xf32>
    %116 = arith.subf %101, %115 : vector<8x32xf32>
    %cst_52 = arith.constant 9.99999974E-6 : f32
    %117 = vector.broadcast %cst_52 : f32 to vector<8x1xf32>
    %118 = arith.addf %114, %117 : vector<8x1xf32>
    %119 = math.rsqrt %118 : vector<8x1xf32>
    %120 = vector.broadcast %119 : vector<8x1xf32> to vector<8x32xf32>
    %121 = arith.mulf %116, %120 : vector<8x32xf32>
    %122 = vector.broadcast %102 : vector<1x32xf32> to vector<8x32xf32>
    %123 = arith.mulf %121, %122 : vector<8x32xf32>
    %124 = vector.broadcast %103 : vector<1x32xf32> to vector<8x32xf32>
    %125 = arith.addf %123, %124 : vector<8x32xf32>
    %126 = arith.truncf %125 : vector<8x32xf32> to vector<8x32xbf16>
    %c0_53 = arith.constant 0 : index
    %c0_54 = arith.constant 0 : index
    %127 = vector.load %arg12[%c0_53, %c0_54] : memref<32x2048xbf16, #tpu.memory_space<vmem>>, vector<32x2048xbf16>
    %cst_55 = arith.constant dense<0.000000e+00> : vector<8x2048xf32>
    %128 = tpu.matmul %126, %127, %cst_55 {dimension_numbers = #tpu.dot_dimension_numbers<[1], [0], [0], [1], [0, 0, 1, 1], [], []>} : vector<8x32xbf16>, vector<32x2048xbf16>, vector<8x2048xf32> -> vector<8x2048xf32>
    %c0_56 = arith.constant 0 : index
    %c0_57 = arith.constant 0 : index
    %129 = vector.load %arg13[%c0_56, %c0_57] : memref<1x2048xf32, #tpu.memory_space<vmem>>, vector<1x2048xf32>
    %130 = vector.broadcast %129 : vector<1x2048xf32> to vector<8x2048xf32>
    %131 = arith.addf %128, %130 : vector<8x2048xf32>
    %cst_58 = arith.constant 0.000000e+00 : f32
    %132 = vector.broadcast %cst_58 : f32 to vector<8x2048xf32>
    %133 = arith.maximumf %131, %132 : vector<8x2048xf32>
    %134 = arith.truncf %133 : vector<8x2048xf32> to vector<8x2048xbf16>
    %c0_59 = arith.constant 0 : index
    %c0_60 = arith.constant 0 : index
    %135 = vector.load %arg14[%c0_59, %c0_60] : memref<2048x32xbf16, #tpu.memory_space<vmem>>, vector<2048x32xbf16>
    %cst_61 = arith.constant dense<0.000000e+00> : vector<8x32xf32>
    %136 = tpu.matmul %134, %135, %cst_61 {dimension_numbers = #tpu.dot_dimension_numbers<[1], [0], [0], [1], [0, 0, 1, 1], [], []>} : vector<8x2048xbf16>, vector<2048x32xbf16>, vector<8x32xf32> -> vector<8x32xf32>
    %c0_62 = arith.constant 0 : index
    %c0_63 = arith.constant 0 : index
    %137 = vector.load %arg15[%c0_62, %c0_63] : memref<1x32xf32, #tpu.memory_space<vmem>>, vector<1x32xf32>
    %138 = vector.broadcast %137 : vector<1x32xf32> to vector<8x32xf32>
    %139 = arith.addf %136, %138 : vector<8x32xf32>
    %140 = arith.addf %125, %139 : vector<8x32xf32>
    %c0_64 = arith.constant 0 : index
    %c0_65 = arith.constant 0 : index
    %141 = vector.load %arg16[%c0_64, %c0_65] : memref<1x32xf32, #tpu.memory_space<vmem>>, vector<1x32xf32>
    %c0_66 = arith.constant 0 : index
    %c0_67 = arith.constant 0 : index
    %142 = vector.load %arg17[%c0_66, %c0_67] : memref<1x32xf32, #tpu.memory_space<vmem>>, vector<1x32xf32>
    %cst_68 = arith.constant dense<0.000000e+00> : vector<8xf32>
    %143 = vector.multi_reduction <add>, %140, %cst_68 [1] : vector<8x32xf32> to vector<8xf32>
    %144 = vector.shape_cast %143 : vector<8xf32> to vector<8x1xf32>
    %cst_69 = arith.constant 3.200000e+01 : f32
    %145 = vector.broadcast %cst_69 : f32 to vector<8x1xf32>
    %146 = arith.divf %144, %145 : vector<8x1xf32>
    %147 = vector.broadcast %146 : vector<8x1xf32> to vector<8x32xf32>
    %148 = arith.subf %140, %147 : vector<8x32xf32>
    %149 = arith.mulf %148, %148 : vector<8x32xf32>
    %cst_70 = arith.constant dense<0.000000e+00> : vector<8xf32>
    %150 = vector.multi_reduction <add>, %149, %cst_70 [1] : vector<8x32xf32> to vector<8xf32>
    %151 = vector.shape_cast %150 : vector<8xf32> to vector<8x1xf32>
    %cst_71 = arith.constant 3.200000e+01 : f32
    %152 = vector.broadcast %cst_71 : f32 to vector<8x1xf32>
    %153 = arith.divf %151, %152 : vector<8x1xf32>
    %154 = vector.broadcast %146 : vector<8x1xf32> to vector<8x32xf32>
    %155 = arith.subf %140, %154 : vector<8x32xf32>
    %cst_72 = arith.constant 9.99999974E-6 : f32
    %156 = vector.broadcast %cst_72 : f32 to vector<8x1xf32>
    %157 = arith.addf %153, %156 : vector<8x1xf32>
    %158 = math.rsqrt %157 : vector<8x1xf32>
    %159 = vector.broadcast %158 : vector<8x1xf32> to vector<8x32xf32>
    %160 = arith.mulf %155, %159 : vector<8x32xf32>
    %161 = vector.broadcast %141 : vector<1x32xf32> to vector<8x32xf32>
    %162 = arith.mulf %160, %161 : vector<8x32xf32>
    %163 = vector.broadcast %142 : vector<1x32xf32> to vector<8x32xf32>
    %164 = arith.addf %162, %163 : vector<8x32xf32>
    %165 = arith.truncf %164 : vector<8x32xf32> to vector<8x32xbf16>
    %c0_73 = arith.constant 0 : index
    %c0_74 = arith.constant 0 : index
    %166 = vector.load %arg18[%c0_73, %c0_74] : memref<32x96xbf16, #tpu.memory_space<vmem>>, vector<32x96xbf16>
    %cst_75 = arith.constant dense<0.000000e+00> : vector<8x96xf32>
    %167 = tpu.matmul %165, %166, %cst_75 {dimension_numbers = #tpu.dot_dimension_numbers<[1], [0], [0], [1], [0, 0, 1, 1], [], []>} : vector<8x32xbf16>, vector<32x96xbf16>, vector<8x96xf32> -> vector<8x96xf32>
    %c0_76 = arith.constant 0 : index
    %c0_77 = arith.constant 0 : index
    %168 = vector.load %arg19[%c0_76, %c0_77] : memref<1x96xf32, #tpu.memory_space<vmem>>, vector<1x96xf32>
    %169 = vector.broadcast %168 : vector<1x96xf32> to vector<8x96xf32>
    %170 = arith.addf %167, %169 : vector<8x96xf32>
    %171 = vector.extract_strided_slice %170 {offsets = [0, 0], sizes = [8, 32], strides = [1, 1]} : vector<8x96xf32> to vector<8x32xf32>
    %cst_78 = arith.constant 0.353553385 : f32
    %172 = vector.broadcast %cst_78 : f32 to vector<8x32xf32>
    %173 = arith.mulf %171, %172 : vector<8x32xf32>
    %174 = vector.extract_strided_slice %170 {offsets = [0, 32], sizes = [8, 32], strides = [1, 1]} : vector<8x96xf32> to vector<8x32xf32>
    %175 = vector.extract_strided_slice %170 {offsets = [0, 64], sizes = [8, 32], strides = [1, 1]} : vector<8x96xf32> to vector<8x32xf32>
    %176 = vector.extract_strided_slice %173 {offsets = [0, 0], sizes = [8, 8], strides = [1, 1]} : vector<8x32xf32> to vector<8x8xf32>
    %177 = vector.extract_strided_slice %174 {offsets = [0, 0], sizes = [8, 8], strides = [1, 1]} : vector<8x32xf32> to vector<8x8xf32>
    %178 = vector.extract_strided_slice %175 {offsets = [0, 0], sizes = [8, 8], strides = [1, 1]} : vector<8x32xf32> to vector<8x8xf32>
    %cst_79 = arith.constant dense<0.000000e+00> : vector<8x8xf32>
    %179 = tpu.matmul %176, %177, %cst_79 {dimension_numbers = #tpu.dot_dimension_numbers<[1], [1], [0], [0], [0, 0, 1, 0], [], []>} : vector<8x8xf32>, vector<8x8xf32>, vector<8x8xf32> -> vector<8x8xf32>
    %180 = vector.broadcast %10 : vector<1x8xf32> to vector<8x8xf32>
    %181 = arith.addf %179, %180 : vector<8x8xf32>
    %cst_80 = arith.constant dense<0xFF800000> : vector<8xf32>
    %182 = vector.multi_reduction <maximumf>, %181, %cst_80 [1] : vector<8x8xf32> to vector<8xf32>
    %183 = vector.shape_cast %182 : vector<8xf32> to vector<8x1xf32>
    %184 = vector.broadcast %183 : vector<8x1xf32> to vector<8x8xf32>
    %185 = arith.subf %181, %184 : vector<8x8xf32>
    %186 = math.exp %185 : vector<8x8xf32>
    %cst_81 = arith.constant dense<0.000000e+00> : vector<8xf32>
    %187 = vector.multi_reduction <add>, %186, %cst_81 [1] : vector<8x8xf32> to vector<8xf32>
    %188 = vector.shape_cast %187 : vector<8xf32> to vector<8x1xf32>
    %cst_82 = arith.constant dense<0.000000e+00> : vector<8x8xf32>
    %189 = tpu.matmul %186, %178, %cst_82 {dimension_numbers = #tpu.dot_dimension_numbers<[1], [0], [0], [1], [0, 0, 1, 1], [], []>} : vector<8x8xf32>, vector<8x8xf32>, vector<8x8xf32> -> vector<8x8xf32>
    %190 = tpu.reciprocal %188 {approx = true} : vector<8x1xf32> -> vector<8x1xf32>
    %191 = vector.broadcast %190 : vector<8x1xf32> to vector<8x8xf32>
    %192 = arith.mulf %189, %191 : vector<8x8xf32>
    %c0_83 = arith.constant 0 : index
    %c0_84 = arith.constant 0 : index
    %193 = vector.load %arg35[%c0_83, %c0_84] : memref<8x32xf32, #tpu.memory_space<vmem>>, vector<8x8xf32>
    tpu.vector_store %arg35[%c0_83, %c0_84], %192 {strides = array<i32>} : memref<8x32xf32, #tpu.memory_space<vmem>>, vector<8x8xf32>,
    %194 = vector.extract_strided_slice %173 {offsets = [0, 8], sizes = [8, 8], strides = [1, 1]} : vector<8x32xf32> to vector<8x8xf32>
    %195 = vector.extract_strided_slice %174 {offsets = [0, 8], sizes = [8, 8], strides = [1, 1]} : vector<8x32xf32> to vector<8x8xf32>
    %196 = vector.extract_strided_slice %175 {offsets = [0, 8], sizes = [8, 8], strides = [1, 1]} : vector<8x32xf32> to vector<8x8xf32>
    %cst_85 = arith.constant dense<0.000000e+00> : vector<8x8xf32>
    %197 = tpu.matmul %194, %195, %cst_85 {dimension_numbers = #tpu.dot_dimension_numbers<[1], [1], [0], [0], [0, 0, 1, 0], [], []>} : vector<8x8xf32>, vector<8x8xf32>, vector<8x8xf32> -> vector<8x8xf32>
    %198 = vector.broadcast %10 : vector<1x8xf32> to vector<8x8xf32>
    %199 = arith.addf %197, %198 : vector<8x8xf32>
    %cst_86 = arith.constant dense<0xFF800000> : vector<8xf32>
    %200 = vector.multi_reduction <maximumf>, %199, %cst_86 [1] : vector<8x8xf32> to vector<8xf32>
    %201 = vector.shape_cast %200 : vector<8xf32> to vector<8x1xf32>
    %202 = vector.broadcast %201 : vector<8x1xf32> to vector<8x8xf32>
    %203 = arith.subf %199, %202 : vector<8x8xf32>
    %204 = math.exp %203 : vector<8x8xf32>
    %cst_87 = arith.constant dense<0.000000e+00> : vector<8xf32>
    %205 = vector.multi_reduction <add>, %204, %cst_87 [1] : vector<8x8xf32> to vector<8xf32>
    %206 = vector.shape_cast %205 : vector<8xf32> to vector<8x1xf32>
    %cst_88 = arith.constant dense<0.000000e+00> : vector<8x8xf32>
    %207 = tpu.matmul %204, %196, %cst_88 {dimension_numbers = #tpu.dot_dimension_numbers<[1], [0], [0], [1], [0, 0, 1, 1], [], []>} : vector<8x8xf32>, vector<8x8xf32>, vector<8x8xf32> -> vector<8x8xf32>
    %208 = tpu.reciprocal %206 {approx = true} : vector<8x1xf32> -> vector<8x1xf32>
    %209 = vector.broadcast %208 : vector<8x1xf32> to vector<8x8xf32>
    %210 = arith.mulf %207, %209 : vector<8x8xf32>
    %c0_89 = arith.constant 0 : index
    %c8_90 = arith.constant 8 : index
    %211 = vector.load %arg35[%c0_89, %c8_90] : memref<8x32xf32, #tpu.memory_space<vmem>>, vector<8x8xf32>
    tpu.vector_store %arg35[%c0_89, %c8_90], %210 {strides = array<i32>} : memref<8x32xf32, #tpu.memory_space<vmem>>, vector<8x8xf32>,
    %212 = vector.extract_strided_slice %173 {offsets = [0, 16], sizes = [8, 8], strides = [1, 1]} : vector<8x32xf32> to vector<8x8xf32>
    %213 = vector.extract_strided_slice %174 {offsets = [0, 16], sizes = [8, 8], strides = [1, 1]} : vector<8x32xf32> to vector<8x8xf32>
    %214 = vector.extract_strided_slice %175 {offsets = [0, 16], sizes = [8, 8], strides = [1, 1]} : vector<8x32xf32> to vector<8x8xf32>
    %cst_91 = arith.constant dense<0.000000e+00> : vector<8x8xf32>
    %215 = tpu.matmul %212, %213, %cst_91 {dimension_numbers = #tpu.dot_dimension_numbers<[1], [1], [0], [0], [0, 0, 1, 0], [], []>} : vector<8x8xf32>, vector<8x8xf32>, vector<8x8xf32> -> vector<8x8xf32>
    %216 = vector.broadcast %10 : vector<1x8xf32> to vector<8x8xf32>
    %217 = arith.addf %215, %216 : vector<8x8xf32>
    %cst_92 = arith.constant dense<0xFF800000> : vector<8xf32>
    %218 = vector.multi_reduction <maximumf>, %217, %cst_92 [1] : vector<8x8xf32> to vector<8xf32>
    %219 = vector.shape_cast %218 : vector<8xf32> to vector<8x1xf32>
    %220 = vector.broadcast %219 : vector<8x1xf32> to vector<8x8xf32>
    %221 = arith.subf %217, %220 : vector<8x8xf32>
    %222 = math.exp %221 : vector<8x8xf32>
    %cst_93 = arith.constant dense<0.000000e+00> : vector<8xf32>
    %223 = vector.multi_reduction <add>, %222, %cst_93 [1] : vector<8x8xf32> to vector<8xf32>
    %224 = vector.shape_cast %223 : vector<8xf32> to vector<8x1xf32>
    %cst_94 = arith.constant dense<0.000000e+00> : vector<8x8xf32>
    %225 = tpu.matmul %222, %214, %cst_94 {dimension_numbers = #tpu.dot_dimension_numbers<[1], [0], [0], [1], [0, 0, 1, 1], [], []>} : vector<8x8xf32>, vector<8x8xf32>, vector<8x8xf32> -> vector<8x8xf32>
    %226 = tpu.reciprocal %224 {approx = true} : vector<8x1xf32> -> vector<8x1xf32>
    %227 = vector.broadcast %226 : vector<8x1xf32> to vector<8x8xf32>
    %228 = arith.mulf %225, %227 : vector<8x8xf32>
    %c0_95 = arith.constant 0 : index
    %c16_96 = arith.constant 16 : index
    %229 = vector.load %arg35[%c0_95, %c16_96] : memref<8x32xf32, #tpu.memory_space<vmem>>, vector<8x8xf32>
    tpu.vector_store %arg35[%c0_95, %c16_96], %228 {strides = array<i32>} : memref<8x32xf32, #tpu.memory_space<vmem>>, vector<8x8xf32>,
    %230 = vector.extract_strided_slice %173 {offsets = [0, 24], sizes = [8, 8], strides = [1, 1]} : vector<8x32xf32> to vector<8x8xf32>
    %231 = vector.extract_strided_slice %174 {offsets = [0, 24], sizes = [8, 8], strides = [1, 1]} : vector<8x32xf32> to vector<8x8xf32>
    %232 = vector.extract_strided_slice %175 {offsets = [0, 24], sizes = [8, 8], strides = [1, 1]} : vector<8x32xf32> to vector<8x8xf32>
    %cst_97 = arith.constant dense<0.000000e+00> : vector<8x8xf32>
    %233 = tpu.matmul %230, %231, %cst_97 {dimension_numbers = #tpu.dot_dimension_numbers<[1], [1], [0], [0], [0, 0, 1, 0], [], []>} : vector<8x8xf32>, vector<8x8xf32>, vector<8x8xf32> -> vector<8x8xf32>
    %234 = vector.broadcast %10 : vector<1x8xf32> to vector<8x8xf32>
    %235 = arith.addf %233, %234 : vector<8x8xf32>
    %cst_98 = arith.constant dense<0xFF800000> : vector<8xf32>
    %236 = vector.multi_reduction <maximumf>, %235, %cst_98 [1] : vector<8x8xf32> to vector<8xf32>
    %237 = vector.shape_cast %236 : vector<8xf32> to vector<8x1xf32>
    %238 = vector.broadcast %237 : vector<8x1xf32> to vector<8x8xf32>
    %239 = arith.subf %235, %238 : vector<8x8xf32>
    %240 = math.exp %239 : vector<8x8xf32>
    %cst_99 = arith.constant dense<0.000000e+00> : vector<8xf32>
    %241 = vector.multi_reduction <add>, %240, %cst_99 [1] : vector<8x8xf32> to vector<8xf32>
    %242 = vector.shape_cast %241 : vector<8xf32> to vector<8x1xf32>
    %cst_100 = arith.constant dense<0.000000e+00> : vector<8x8xf32>
    %243 = tpu.matmul %240, %232, %cst_100 {dimension_numbers = #tpu.dot_dimension_numbers<[1], [0], [0], [1], [0, 0, 1, 1], [], []>} : vector<8x8xf32>, vector<8x8xf32>, vector<8x8xf32> -> vector<8x8xf32>
    %244 = tpu.reciprocal %242 {approx = true} : vector<8x1xf32> -> vector<8x1xf32>
    %245 = vector.broadcast %244 : vector<8x1xf32> to vector<8x8xf32>
    %246 = arith.mulf %243, %245 : vector<8x8xf32>
    %c0_101 = arith.constant 0 : index
    %c24_102 = arith.constant 24 : index
    %247 = vector.load %arg35[%c0_101, %c24_102] : memref<8x32xf32, #tpu.memory_space<vmem>>, vector<8x8xf32>
    tpu.vector_store %arg35[%c0_101, %c24_102], %246 {strides = array<i32>} : memref<8x32xf32, #tpu.memory_space<vmem>>, vector<8x8xf32>,
    %c0_103 = arith.constant 0 : index
    %c0_104 = arith.constant 0 : index
    %248 = vector.load %arg35[%c0_103, %c0_104] : memref<8x32xf32, #tpu.memory_space<vmem>>, vector<8x32xf32>
    %249 = arith.truncf %248 : vector<8x32xf32> to vector<8x32xbf16>
    %c0_105 = arith.constant 0 : index
    %c0_106 = arith.constant 0 : index
    %250 = vector.load %arg20[%c0_105, %c0_106] : memref<32x32xbf16, #tpu.memory_space<vmem>>, vector<32x32xbf16>
    %cst_107 = arith.constant dense<0.000000e+00> : vector<8x32xf32>
    %251 = tpu.matmul %249, %250, %cst_107 {dimension_numbers = #tpu.dot_dimension_numbers<[1], [0], [0], [1], [0, 0, 1, 1], [], []>} : vector<8x32xbf16>, vector<32x32xbf16>, vector<8x32xf32> -> vector<8x32xf32>
    %c0_108 = arith.constant 0 : index
    %c0_109 = arith.constant 0 : index
    %252 = vector.load %arg21[%c0_108, %c0_109] : memref<1x32xf32, #tpu.memory_space<vmem>>, vector<1x32xf32>
    %253 = vector.broadcast %252 : vector<1x32xf32> to vector<8x32xf32>
    %254 = arith.addf %251, %253 : vector<8x32xf32>
    %255 = arith.addf %164, %254 : vector<8x32xf32>
    %c0_110 = arith.constant 0 : index
    %c0_111 = arith.constant 0 : index
    %256 = vector.load %arg22[%c0_110, %c0_111] : memref<1x32xf32, #tpu.memory_space<vmem>>, vector<1x32xf32>
    %c0_112 = arith.constant 0 : index
    %c0_113 = arith.constant 0 : index
    %257 = vector.load %arg23[%c0_112, %c0_113] : memref<1x32xf32, #tpu.memory_space<vmem>>, vector<1x32xf32>
    %cst_114 = arith.constant dense<0.000000e+00> : vector<8xf32>
    %258 = vector.multi_reduction <add>, %255, %cst_114 [1] : vector<8x32xf32> to vector<8xf32>
    %259 = vector.shape_cast %258 : vector<8xf32> to vector<8x1xf32>
    %cst_115 = arith.constant 3.200000e+01 : f32
    %260 = vector.broadcast %cst_115 : f32 to vector<8x1xf32>
    %261 = arith.divf %259, %260 : vector<8x1xf32>
    %262 = vector.broadcast %261 : vector<8x1xf32> to vector<8x32xf32>
    %263 = arith.subf %255, %262 : vector<8x32xf32>
    %264 = arith.mulf %263, %263 : vector<8x32xf32>
    %cst_116 = arith.constant dense<0.000000e+00> : vector<8xf32>
    %265 = vector.multi_reduction <add>, %264, %cst_116 [1] : vector<8x32xf32> to vector<8xf32>
    %266 = vector.shape_cast %265 : vector<8xf32> to vector<8x1xf32>
    %cst_117 = arith.constant 3.200000e+01 : f32
    %267 = vector.broadcast %cst_117 : f32 to vector<8x1xf32>
    %268 = arith.divf %266, %267 : vector<8x1xf32>
    %269 = vector.broadcast %261 : vector<8x1xf32> to vector<8x32xf32>
    %270 = arith.subf %255, %269 : vector<8x32xf32>
    %cst_118 = arith.constant 9.99999974E-6 : f32
    %271 = vector.broadcast %cst_118 : f32 to vector<8x1xf32>
    %272 = arith.addf %268, %271 : vector<8x1xf32>
    %273 = math.rsqrt %272 : vector<8x1xf32>
    %274 = vector.broadcast %273 : vector<8x1xf32> to vector<8x32xf32>
    %275 = arith.mulf %270, %274 : vector<8x32xf32>
    %276 = vector.broadcast %256 : vector<1x32xf32> to vector<8x32xf32>
    %277 = arith.mulf %275, %276 : vector<8x32xf32>
    %278 = vector.broadcast %257 : vector<1x32xf32> to vector<8x32xf32>
    %279 = arith.addf %277, %278 : vector<8x32xf32>
    %280 = arith.truncf %279 : vector<8x32xf32> to vector<8x32xbf16>
    %c0_119 = arith.constant 0 : index
    %c0_120 = arith.constant 0 : index
    %281 = vector.load %arg24[%c0_119, %c0_120] : memref<32x2048xbf16, #tpu.memory_space<vmem>>, vector<32x2048xbf16>
    %cst_121 = arith.constant dense<0.000000e+00> : vector<8x2048xf32>
    %282 = tpu.matmul %280, %281, %cst_121 {dimension_numbers = #tpu.dot_dimension_numbers<[1], [0], [0], [1], [0, 0, 1, 1], [], []>} : vector<8x32xbf16>, vector<32x2048xbf16>, vector<8x2048xf32> -> vector<8x2048xf32>
    %c0_122 = arith.constant 0 : index
    %c0_123 = arith.constant 0 : index
    %283 = vector.load %arg25[%c0_122, %c0_123] : memref<1x2048xf32, #tpu.memory_space<vmem>>, vector<1x2048xf32>
    %284 = vector.broadcast %283 : vector<1x2048xf32> to vector<8x2048xf32>
    %285 = arith.addf %282, %284 : vector<8x2048xf32>
    %cst_124 = arith.constant 0.000000e+00 : f32
    %286 = vector.broadcast %cst_124 : f32 to vector<8x2048xf32>
    %287 = arith.maximumf %285, %286 : vector<8x2048xf32>
    %288 = arith.truncf %287 : vector<8x2048xf32> to vector<8x2048xbf16>
    %c0_125 = arith.constant 0 : index
    %c0_126 = arith.constant 0 : index
    %289 = vector.load %arg26[%c0_125, %c0_126] : memref<2048x32xbf16, #tpu.memory_space<vmem>>, vector<2048x32xbf16>
    %cst_127 = arith.constant dense<0.000000e+00> : vector<8x32xf32>
    %290 = tpu.matmul %288, %289, %cst_127 {dimension_numbers = #tpu.dot_dimension_numbers<[1], [0], [0], [1], [0, 0, 1, 1], [], []>} : vector<8x2048xbf16>, vector<2048x32xbf16>, vector<8x32xf32> -> vector<8x32xf32>
    %c0_128 = arith.constant 0 : index
    %c0_129 = arith.constant 0 : index
    %291 = vector.load %arg27[%c0_128, %c0_129] : memref<1x32xf32, #tpu.memory_space<vmem>>, vector<1x32xf32>
    %292 = vector.broadcast %291 : vector<1x32xf32> to vector<8x32xf32>
    %293 = arith.addf %290, %292 : vector<8x32xf32>
    %294 = arith.addf %279, %293 : vector<8x32xf32>
    %c0_130 = arith.constant 0 : index
    %c0_131 = arith.constant 0 : index
    %295 = vector.load %arg28[%c0_130, %c0_131] : memref<1x32xf32, #tpu.memory_space<vmem>>, vector<1x32xf32>
    %c0_132 = arith.constant 0 : index
    %c0_133 = arith.constant 0 : index
    %296 = vector.load %arg29[%c0_132, %c0_133] : memref<1x32xf32, #tpu.memory_space<vmem>>, vector<1x32xf32>
    %cst_134 = arith.constant dense<0.000000e+00> : vector<8xf32>
    %297 = vector.multi_reduction <add>, %294, %cst_134 [1] : vector<8x32xf32> to vector<8xf32>
    %298 = vector.shape_cast %297 : vector<8xf32> to vector<8x1xf32>
    %cst_135 = arith.constant 3.200000e+01 : f32
    %299 = vector.broadcast %cst_135 : f32 to vector<8x1xf32>
    %300 = arith.divf %298, %299 : vector<8x1xf32>
    %301 = vector.broadcast %300 : vector<8x1xf32> to vector<8x32xf32>
    %302 = arith.subf %294, %301 : vector<8x32xf32>
    %303 = arith.mulf %302, %302 : vector<8x32xf32>
    %cst_136 = arith.constant dense<0.000000e+00> : vector<8xf32>
    %304 = vector.multi_reduction <add>, %303, %cst_136 [1] : vector<8x32xf32> to vector<8xf32>
    %305 = vector.shape_cast %304 : vector<8xf32> to vector<8x1xf32>
    %cst_137 = arith.constant 3.200000e+01 : f32
    %306 = vector.broadcast %cst_137 : f32 to vector<8x1xf32>
    %307 = arith.divf %305, %306 : vector<8x1xf32>
    %308 = vector.broadcast %300 : vector<8x1xf32> to vector<8x32xf32>
    %309 = arith.subf %294, %308 : vector<8x32xf32>
    %cst_138 = arith.constant 9.99999974E-6 : f32
    %310 = vector.broadcast %cst_138 : f32 to vector<8x1xf32>
    %311 = arith.addf %307, %310 : vector<8x1xf32>
    %312 = math.rsqrt %311 : vector<8x1xf32>
    %313 = vector.broadcast %312 : vector<8x1xf32> to vector<8x32xf32>
    %314 = arith.mulf %309, %313 : vector<8x32xf32>
    %315 = vector.broadcast %295 : vector<1x32xf32> to vector<8x32xf32>
    %316 = arith.mulf %314, %315 : vector<8x32xf32>
    %317 = vector.broadcast %296 : vector<1x32xf32> to vector<8x32xf32>
    %318 = arith.addf %316, %317 : vector<8x32xf32>
    %319 = arith.truncf %318 : vector<8x32xf32> to vector<8x32xbf16>
    %c0_139 = arith.constant 0 : index
    %c0_140 = arith.constant 0 : index
    %320 = vector.load %arg30[%c0_139, %c0_140] : memref<32x32xbf16, #tpu.memory_space<vmem>>, vector<32x32xbf16>
    %cst_141 = arith.constant dense<0.000000e+00> : vector<8x32xf32>
    %321 = tpu.matmul %319, %320, %cst_141 {dimension_numbers = #tpu.dot_dimension_numbers<[1], [0], [0], [1], [0, 0, 1, 1], [], []>} : vector<8x32xbf16>, vector<32x32xbf16>, vector<8x32xf32> -> vector<8x32xf32>
    %c0_142 = arith.constant 0 : index
    %c0_143 = arith.constant 0 : index
    %322 = vector.load %arg31[%c0_142, %c0_143] : memref<1x32xf32, #tpu.memory_space<vmem>>, vector<1x32xf32>
    %323 = vector.broadcast %322 : vector<1x32xf32> to vector<8x32xf32>
    %324 = arith.addf %321, %323 : vector<8x32xf32>
    %cst_144 = arith.constant 0.000000e+00 : f32
    %325 = vector.broadcast %cst_144 : f32 to vector<8x32xf32>
    %326 = arith.maximumf %324, %325 : vector<8x32xf32>
    %327 = arith.truncf %326 : vector<8x32xf32> to vector<8x32xbf16>
    %c0_145 = arith.constant 0 : index
    %c0_146 = arith.constant 0 : index
    %328 = vector.load %arg32[%c0_145, %c0_146] : memref<32x16xbf16, #tpu.memory_space<vmem>>, vector<32x16xbf16>
    %cst_147 = arith.constant dense<0.000000e+00> : vector<8x16xf32>
    %329 = tpu.matmul %327, %328, %cst_147 {dimension_numbers = #tpu.dot_dimension_numbers<[1], [0], [0], [1], [0, 0, 1, 1], [], []>} : vector<8x32xbf16>, vector<32x16xbf16>, vector<8x16xf32> -> vector<8x16xf32>
    %c0_148 = arith.constant 0 : index
    %c0_149 = arith.constant 0 : index
    %330 = vector.load %arg33[%c0_148, %c0_149] : memref<1x16xf32, #tpu.memory_space<vmem>>, vector<1x16xf32>
    %331 = vector.broadcast %330 : vector<1x16xf32> to vector<8x16xf32>
    %332 = arith.addf %329, %331 : vector<8x16xf32>
    %cst_150 = arith.constant 0.000000e+00 : f32
    %333 = vector.broadcast %cst_150 : f32 to vector<8x16xf32>
    %334 = arith.maximumf %332, %333 : vector<8x16xf32>
    %cst_151 = arith.constant dense<0xFF800000> : vector<16xf32>
    %335 = vector.multi_reduction <maximumf>, %334, %cst_151 [0] : vector<8x16xf32> to vector<16xf32>
    %336 = vector.shape_cast %335 : vector<16xf32> to vector<1x16xf32>
    %337 = vector.broadcast %336 : vector<1x16xf32> to vector<8x16xf32>
    %338 = arith.subf %334, %337 : vector<8x16xf32>
    %339 = math.exp %338 : vector<8x16xf32>
    %340 = vector.broadcast %336 : vector<1x16xf32> to vector<8x16xf32>
    %341 = arith.subf %334, %340 : vector<8x16xf32>
    %cst_152 = arith.constant dense<0.000000e+00> : vector<16xf32>
    %342 = vector.multi_reduction <add>, %339, %cst_152 [0] : vector<8x16xf32> to vector<16xf32>
    %343 = vector.shape_cast %342 : vector<16xf32> to vector<1x16xf32>
    %344 = math.log %343 : vector<1x16xf32>
    %345 = vector.broadcast %344 : vector<1x16xf32> to vector<8x16xf32>
    %346 = arith.subf %341, %345 : vector<8x16xf32>
    %c0_153 = arith.constant 0 : index
    %c0_154 = arith.constant 0 : index
    %347 = vector.load %arg34[%c0_153, %c0_154] : memref<8x16xf32, #tpu.memory_space<vmem>>, vector<8x16xf32>
    tpu.vector_store %arg34[%c0_153, %c0_154], %346 {strides = array<i32>} : memref<8x16xf32, #tpu.memory_space<vmem>>, vector<8x16xf32>,
    return
  }
  func.func @transform_0(%arg0: i32) -> (i32, i32) {
    %c0_i32 = arith.constant 0 : i32
    %c0_i32_0 = arith.constant 0 : i32
    return %arg0, %c0_i32 : i32, i32
  }
  func.func @transform_1(%arg0: i32) -> (i32, i32, i32) {
    %c0_i32 = arith.constant 0 : i32
    %c0_i32_0 = arith.constant 0 : i32
    %c0_i32_1 = arith.constant 0 : i32
    return %arg0, %c0_i32, %c0_i32_0 : i32, i32, i32
  }
  func.func @transform_2(%arg0: i32) -> (i32, i32) {
    %c0_i32 = arith.constant 0 : i32
    %c0_i32_0 = arith.constant 0 : i32
    %c0_i32_1 = arith.constant 0 : i32
    return %c0_i32, %c0_i32_0 : i32, i32
  }
  func.func @transform_3(%arg0: i32) -> (i32, i32) {
    %c0_i32 = arith.constant 0 : i32
    %c0_i32_0 = arith.constant 0 : i32
    %c0_i32_1 = arith.constant 0 : i32
    return %c0_i32, %c0_i32_0 : i32, i32
  }
  func.func @transform_4(%arg0: i32) -> (i32, i32) {
    %c0_i32 = arith.constant 0 : i32
    %c0_i32_0 = arith.constant 0 : i32
    %c0_i32_1 = arith.constant 0 : i32
    return %c0_i32, %c0_i32_0 : i32, i32
  }
  func.func @transform_5(%arg0: i32) -> (i32, i32) {
    %c0_i32 = arith.constant 0 : i32
    %c0_i32_0 = arith.constant 0 : i32
    %c0_i32_1 = arith.constant 0 : i32
    return %c0_i32, %c0_i32_0 : i32, i32
  }
  func.func @transform_6(%arg0: i32) -> (i32, i32) {
    %c0_i32 = arith.constant 0 : i32
    %c0_i32_0 = arith.constant 0 : i32
    %c0_i32_1 = arith.constant 0 : i32
    return %c0_i32, %c0_i32_0 : i32, i32
  }
  func.func @transform_7(%arg0: i32) -> (i32, i32) {
    %c0_i32 = arith.constant 0 : i32
    %c0_i32_0 = arith.constant 0 : i32
    %c0_i32_1 = arith.constant 0 : i32
    return %c0_i32, %c0_i32_0 : i32, i32
  }
  func.func @transform_8(%arg0: i32) -> (i32, i32) {
    %c0_i32 = arith.constant 0 : i32
    %c0_i32_0 = arith.constant 0 : i32
    %c0_i32_1 = arith.constant 0 : i32
    return %c0_i32, %c0_i32_0 : i32, i32
  }
  func.func @transform_9(%arg0: i32) -> (i32, i32) {
    %c0_i32 = arith.constant 0 : i32
    %c0_i32_0 = arith.constant 0 : i32
    %c0_i32_1 = arith.constant 0 : i32
    return %c0_i32, %c0_i32_0 : i32, i32
  }
  func.func @transform_10(%arg0: i32) -> (i32, i32) {
    %c0_i32 = arith.constant 0 : i32
    %c0_i32_0 = arith.constant 0 : i32
    %c0_i32_1 = arith.constant 0 : i32
    return %c0_i32, %c0_i32_0 : i32, i32
  }
  func.func @transform_11(%arg0: i32) -> (i32, i32) {
    %c0_i32 = arith.constant 0 : i32
    %c0_i32_0 = arith.constant 0 : i32
    %c0_i32_1 = arith.constant 0 : i32
    return %c0_i32, %c0_i32_0 : i32, i32
  }
  func.func @transform_12(%arg0: i32) -> (i32, i32) {
    %c0_i32 = arith.constant 0 : i32
    %c0_i32_0 = arith.constant 0 : i32
    %c0_i32_1 = arith.constant 0 : i32
    return %c0_i32, %c0_i32_0 : i32, i32
  }
  func.func @transform_13(%arg0: i32) -> (i32, i32) {
    %c0_i32 = arith.constant 0 : i32
    %c0_i32_0 = arith.constant 0 : i32
    %c0_i32_1 = arith.constant 0 : i32
    return %c0_i32, %c0_i32_0 : i32, i32
  }
  func.func @transform_14(%arg0: i32) -> (i32, i32) {
    %c0_i32 = arith.constant 0 : i32
    %c0_i32_0 = arith.constant 0 : i32
    %c0_i32_1 = arith.constant 0 : i32
    return %c0_i32, %c0_i32_0 : i32, i32
  }
  func.func @transform_15(%arg0: i32) -> (i32, i32) {
    %c0_i32 = arith.constant 0 : i32
    %c0_i32_0 = arith.constant 0 : i32
    %c0_i32_1 = arith.constant 0 : i32
    return %c0_i32, %c0_i32_0 : i32, i32
  }
  func.func @transform_16(%arg0: i32) -> (i32, i32) {
    %c0_i32 = arith.constant 0 : i32
    %c0_i32_0 = arith.constant 0 : i32
    %c0_i32_1 = arith.constant 0 : i32
    return %c0_i32, %c0_i32_0 : i32, i32
  }
  func.func @transform_17(%arg0: i32) -> (i32, i32) {
    %c0_i32 = arith.constant 0 : i32
    %c0_i32_0 = arith.constant 0 : i32
    %c0_i32_1 = arith.constant 0 : i32
    return %c0_i32, %c0_i32_0 : i32, i32
  }
  func.func @transform_18(%arg0: i32) -> (i32, i32) {
    %c0_i32 = arith.constant 0 : i32
    %c0_i32_0 = arith.constant 0 : i32
    %c0_i32_1 = arith.constant 0 : i32
    return %c0_i32, %c0_i32_0 : i32, i32
  }
  func.func @transform_19(%arg0: i32) -> (i32, i32) {
    %c0_i32 = arith.constant 0 : i32
    %c0_i32_0 = arith.constant 0 : i32
    %c0_i32_1 = arith.constant 0 : i32
    return %c0_i32, %c0_i32_0 : i32, i32
  }
  func.func @transform_20(%arg0: i32) -> (i32, i32) {
    %c0_i32 = arith.constant 0 : i32
    %c0_i32_0 = arith.constant 0 : i32
    %c0_i32_1 = arith.constant 0 : i32
    return %c0_i32, %c0_i32_0 : i32, i32
  }
  func.func @transform_21(%arg0: i32) -> (i32, i32) {
    %c0_i32 = arith.constant 0 : i32
    %c0_i32_0 = arith.constant 0 : i32
    %c0_i32_1 = arith.constant 0 : i32
    return %c0_i32, %c0_i32_0 : i32, i32
  }
  func.func @transform_22(%arg0: i32) -> (i32, i32) {
    %c0_i32 = arith.constant 0 : i32
    %c0_i32_0 = arith.constant 0 : i32
    %c0_i32_1 = arith.constant 0 : i32
    return %c0_i32, %c0_i32_0 : i32, i32
  }
  func.func @transform_23(%arg0: i32) -> (i32, i32) {
    %c0_i32 = arith.constant 0 : i32
    %c0_i32_0 = arith.constant 0 : i32
    %c0_i32_1 = arith.constant 0 : i32
    return %c0_i32, %c0_i32_0 : i32, i32
  }
  func.func @transform_24(%arg0: i32) -> (i32, i32) {
    %c0_i32 = arith.constant 0 : i32
    %c0_i32_0 = arith.constant 0 : i32
    %c0_i32_1 = arith.constant 0 : i32
    return %c0_i32, %c0_i32_0 : i32, i32
  }
  func.func @transform_25(%arg0: i32) -> (i32, i32) {
    %c0_i32 = arith.constant 0 : i32
    %c0_i32_0 = arith.constant 0 : i32
    %c0_i32_1 = arith.constant 0 : i32
    return %c0_i32, %c0_i32_0 : i32, i32
  }
  func.func @transform_26(%arg0: i32) -> (i32, i32) {
    %c0_i32 = arith.constant 0 : i32
    %c0_i32_0 = arith.constant 0 : i32
    %c0_i32_1 = arith.constant 0 : i32
    return %c0_i32, %c0_i32_0 : i32, i32
  }
  func.func @transform_27(%arg0: i32) -> (i32, i32) {
    %c0_i32 = arith.constant 0 : i32
    %c0_i32_0 = arith.constant 0 : i32
    %c0_i32_1 = arith.constant 0 : i32
    return %c0_i32, %c0_i32_0 : i32, i32
  }
  func.func @transform_28(%arg0: i32) -> (i32, i32) {
    %c0_i32 = arith.constant 0 : i32
    %c0_i32_0 = arith.constant 0 : i32
    %c0_i32_1 = arith.constant 0 : i32
    return %c0_i32, %c0_i32_0 : i32, i32
  }
  func.func @transform_29(%arg0: i32) -> (i32, i32) {
    %c0_i32 = arith.constant 0 : i32
    %c0_i32_0 = arith.constant 0 : i32
    %c0_i32_1 = arith.constant 0 : i32
    return %c0_i32, %c0_i32_0 : i32, i32
  }
  func.func @transform_30(%arg0: i32) -> (i32, i32) {
    %c0_i32 = arith.constant 0 : i32
    %c0_i32_0 = arith.constant 0 : i32
    %c0_i32_1 = arith.constant 0 : i32
    return %c0_i32, %c0_i32_0 : i32, i32
  }
  func.func @transform_31(%arg0: i32) -> (i32, i32) {
    %c0_i32 = arith.constant 0 : i32
    %c0_i32_0 = arith.constant 0 : i32
    %c0_i32_1 = arith.constant 0 : i32
    return %c0_i32, %c0_i32_0 : i32, i32
  }
  func.func @transform_32(%arg0: i32) -> (i32, i32) {
    %c0_i32 = arith.constant 0 : i32
    %c0_i32_0 = arith.constant 0 : i32
    %c0_i32_1 = arith.constant 0 : i32
    return %c0_i32, %c0_i32_0 : i32, i32
  }
  func.func @transform_33(%arg0: i32) -> (i32, i32) {
    %c0_i32 = arith.constant 0 : i32
    %c0_i32_0 = arith.constant 0 : i32
    return %arg0, %c0_i32 : i32, i32
  }
}

</mosaic_0001>

<bundles_post_ra>
// kernel: dtn_forward.1
= control target key start
LH: loop header
LB: loop body
LE: loop exit
PB: predicated region body
PF: predicated region fallthrough
CT: control target
= control target key end

     0   :  { %s8506_s6 = smov 1   ;;  %s8507_s10 = smov 2   ;;  %s9572_s0 = inlined_call_operand.smem [shape: u32[34], index: -1, kind: input, shape index: {}] }
   0x1   :  { %s8565_s5 = sld [smem:[%s9572_s0]]   ;;  %s8508_s14 = smov 3  }
   0x2   :  { %s8570_s9 = sld [smem:[%s9572_s0 + %s8506_s6]]   ;;  %s8509_s18 = smov 4  }
   0x3   :  { %s8575_s13 = sld [smem:[%s9572_s0 + %s8507_s10]]   ;;  %s8510_s22 = smov 5  }
   0x4   :  { %s8580_s17 = sld [smem:[%s9572_s0 + %s8508_s14]]   ;;  %s8511_s26 = smov 6  }
   0x5   :  { %s8585_s21 = sld [smem:[%s9572_s0 + %s8509_s18]]   ;;  %s8512_s30 = smov 7  }
   0x6   :  { %s8590_s25 = sld [smem:[%s9572_s0 + %s8510_s22]]   ;;  %s8513_s4 = smov 8  }
   0x7   :  { %9597 = sst [smem:[#allocation6_spill]] %s8565_s5  ;;  %s8514_s10 = smov 9  }
   0x8   :  { %9598 = sst [smem:[#allocation7_spill]] %s8570_s9  ;;  %s8515_s15 = smov 10  }
   0x9   :  { %9599 = sst [smem:[#allocation8_spill]] %s8575_s13  ;;  %s8516_s20 = smov 11  }
   0xa   :  { %9600 = sst [smem:[#allocation9_spill]] %s8580_s17  ;;  %s8518_s1 = smov 13  }
   0xb   :  { %s8595_s29 = sld [smem:[%s9572_s0 + %s8511_s26]]   ;;  %s8517_s26 = smov 12  }
   0xc   :  { %s8600_s3 = sld [smem:[%s9572_s0 + %s8512_s30]]   ;;  %s8519_s7 = smov 14  }
   0xd   :  { %s8605_s8 = sld [smem:[%s9572_s0 + %s8513_s4]]   ;;  %s8521_s22 = smov 16  }
   0xe   :  { %s8610_s14 = sld [smem:[%s9572_s0 + %s8514_s10]]   ;;  %s8522_s28 = smov 17  }
   0xf   :  { %s8615_s19 = sld [smem:[%s9572_s0 + %s8515_s15]]   ;;  %s8520_s15 = smov 15  }
  0x10   :  { %s8620_s24 = sld [smem:[%s9572_s0 + %s8516_s20]]  }
  0x11   :  { %s8625_s30 = sld [smem:[%s9572_s0 + %s8517_s26]]  }
  0x12   :  { %9601 = sst [smem:[#allocation10_spill]] %s8600_s3 }
  0x13   :  { %9602 = sst [smem:[#allocation11_spill]] %s8605_s8 }
  0x14   :  { %9603 = sst [smem:[#allocation12_spill]] %s8610_s14 }
  0x15   :  { %s8630_s6 = sld [smem:[%s9572_s0 + %s8518_s1]]  }
  0x16   :  { %s8635_s12 = sld [smem:[%s9572_s0 + %s8519_s7]]   ;;  %s8523_s7 = smov 18  }
  0x17   :  { %s8640_s20 = sld [smem:[%s9572_s0 + %s8520_s15]]   ;;  %s8524_s15 = smov 19  }
  0x18   :  { %s8645_s27 = sld [smem:[%s9572_s0 + %s8521_s22]]   ;;  %s8525_s22 = smov 20  }
  0x19   :  { %s8650_s4 = sld [smem:[%s9572_s0 + %s8522_s28]]   ;;  %s8526_s28 = smov 21  }
  0x1b   :  { %9604 = sst [smem:[#allocation13_spill]] %s8630_s6 }
  0x1c   :  { %9605 = sst [smem:[#allocation14_spill]] %s8635_s12 }
  0x1d   :  { %9606 = sst [smem:[#allocation15_spill]] %s8640_s20 }
  0x1e   :  { %9607 = sst [smem:[#allocation16_spill]] %s8645_s27 }
  0x1f   :  { %9608 = sst [smem:[#allocation17_spill]] %s8650_s4 }
  0x20   :  { %s8655_s12 = sld [smem:[%s9572_s0 + %s8523_s7]]   ;;  %s8527_s7 = smov 22  }
  0x21   :  { %s8660_s20 = sld [smem:[%s9572_s0 + %s8524_s15]]   ;;  %s8528_s15 = smov 23  }
  0x22   :  { %s8665_s27 = sld [smem:[%s9572_s0 + %s8525_s22]]   ;;  %s8529_s22 = smov 24  }
  0x23   :  { %s8670_s4 = sld [smem:[%s9572_s0 + %s8526_s28]]   ;;  %s8530_s28 = smov 25  }
  0x26   :  { %9609 = sst [smem:[#allocation18_spill]] %s8655_s12 }
  0x27   :  { %9610 = sst [smem:[#allocation19_spill]] %s8660_s20 }
  0x28   :  { %9611 = sst [smem:[#allocation20_spill]] %s8665_s27 }
  0x29   :  { %9612 = sst [smem:[#allocation21_spill]] %s8670_s4 }
  0x2a   :  { %s8675_s12 = sld [smem:[%s9572_s0 + %s8527_s7]]   ;;  %s8531_s7 = smov 26  }
  0x2b   :  { %s8680_s20 = sld [smem:[%s9572_s0 + %s8528_s15]]   ;;  %s8532_s15 = smov 27  }
  0x2c   :  { %s8685_s27 = sld [smem:[%s9572_s0 + %s8529_s22]]   ;;  %s8533_s22 = smov 28  }
  0x2d   :  { %s8690_s4 = sld [smem:[%s9572_s0 + %s8530_s28]]   ;;  %s8534_s28 = smov 29  }
  0x30   :  { %9613 = sst [smem:[#allocation22_spill]] %s8675_s12 }
  0x31   :  { %9614 = sst [smem:[#allocation23_spill]] %s8680_s20 }
  0x32   :  { %9615 = sst [smem:[#allocation24_spill]] %s8685_s27 }
  0x33   :  { %9616 = sst [smem:[#allocation25_spill]] %s8690_s4 }
  0x34   :  { %s8695_s12 = sld [smem:[%s9572_s0 + %s8531_s7]]   ;;  %s8535_s7 = smov 30  }
  0x35   :  { %s8700_s20 = sld [smem:[%s9572_s0 + %s8532_s15]]   ;;  %s8536_s15 = smov 31  }
  0x36   :  { %s8705_s27 = sld [smem:[%s9572_s0 + %s8533_s22]]   ;;  %s8537_s22 = smov 32  }
  0x37   :  { %s8710_s4 = sld [smem:[%s9572_s0 + %s8534_s28]]   ;;  %s8538_s28 = smov 33  }
  0x3a   :  { %9617 = sst [smem:[#allocation26_spill]] %s8695_s12 }
  0x3b   :  { %9618 = sst [smem:[#allocation27_spill]] %s8700_s20 }
  0x3c   :  { %9619 = sst [smem:[#allocation28_spill]] %s8705_s27 }
  0x3d   :  { %9620 = sst [smem:[#allocation29_spill]] %s8710_s4 }
  0x3e   :  { %s8715_s12 = sld [smem:[%s9572_s0 + %s8535_s7]]  }
  0x3f   :  { %s8720_s20 = sld [smem:[%s9572_s0 + %s8536_s15]]  }
  0x40   :  { %s8725_s27 = sld [smem:[%s9572_s0 + %s8537_s22]]  }
  0x41   :  { %s8730_s4 = sld [smem:[%s9572_s0 + %s8538_s28]]  }
  0x44   :  { %9621 = sst [smem:[#allocation30_spill]] %s8715_s12 }
  0x45   :  { %72 = vsyncpa [#allocation4], 0 }
  0x46   :  { %74 = vsyncpa [#allocation4 + $0x1], 0  ;;  %s8732_s7 = smov 0   ;;  %s8734_s10 = smov 0  }
  0x47   :  { %s8736_s11 = smov 0   ;;  %s8738_s15 = smov 0  }
  0x48 LB: > { %s9622_s6 = sld [smem:[#allocation13_spill]]  ;;  %s8753_s0 = sadd.s32 4294967295, %s8504_s15   ;;  %s8496_s10 = sphi %s8734_s10, %s9662_s10   ;;  %s8492_s7 = sphi %s8732_s7, %s9661_s7   ;;  %s8504_s15 = sphi %s8738_s15, %s9664_s15   ;;  %s8500_s11 = sphi %s8736_s11, %s9663_s11  }
  0x49   : > { %s9623_s3 = sld [smem:[#allocation10_spill]]  ;;  %s7097_s16 = sadd.s32 4294967294, %s8504_s15  }
  0x4a   : > { %s8757_s18 = sadd.s32 1, %s8504_s15   ;;  %s790_s22 = sadd.s32 1, %s8500_s11 }
  0x4b   : > { %s787_s23 = ssub.s32 %s8504_s15, %s8757_s18  ;;  %p800_p0 = scmp.ne.s32.totalorder %s8500_s11, %s8496_s10 }
  0x4c   : > { %p788_p1 = scmp.eq.s32.totalorder %s787_s23, 0  ;;  %p801_p2 = scmp.eq.s32.totalorder %s8753_s0, 1 }
  0x4d   : > { %p806_p3 = scmp.ne.s32.totalorder %s8496_s10, %s8492_s7  ;;  %p807_p4 = scmp.eq.s32.totalorder %s7097_s16, 1 }
  0x4e   : > { %s8768_s26 = scalar_select %p788_p1, %s8500_s11, %s790_s22  }
  0x4f   : > { %p8770_p5 = por %p801_p2, %p800_p0  ;;  %p8774_p6 = por %p807_p4, %p806_p3 }
  0x50   : > { %p7100_p7 = scmp.ge.s32.totalorder %s8504_s15, 1  ;;  %p931_p8 = scmp.lt.s32.totalorder %s8504_s15, 3 }
  0x52   : > { %p932_p9 = pnand %p7100_p7, %p931_p8 }
  0x53   : > { %s9626_s17 = sld [smem:[#allocation9_spill]] (!%p932_p9)  ;;  %p1017_p10 = scmp.lt.s32.totalorder (!%p932_p9), %s8753_s0, 1 }
  0x54   : > { %935 = sbr.rel (%p932_p9) target bundleno = 5478 (0x1566), region = 152  ;;  %s9627_s5 = sld [smem:[#allocation6_spill]] (!%p932_p9) }
  0x55   : > { %s9628_s13 = sld [smem:[#allocation8_spill]] (!%p932_p9)  ;;  %s9579_s23 = smov (!%p932_p9), 96  }
  0x56   : > { %s9629_s9 = sld [smem:[#allocation7_spill]] (!%p932_p9) }
  0x57   : > { %s9630_s8 = sld [smem:[#allocation11_spill]] (!%p932_p9) }
  0x58   : > { %s9631_s14 = sld [smem:[#allocation12_spill]] (!%p932_p9) }
  0x59   : > { %v1027_v0 = vld [vmem:[%s9626_s17] sm:$0x3]  ;;  %vm1039_vm0 = vcmask 1041408   ;;  %v8539_v1 = vmov 0.0   ;;  %vm8540_vm1 = vmmov 0   ;;  %s8786_s2 = scalar_select %p1017_p10, %s8753_s0, 1 }
  0x5a   : > { %7908 = vmatprep.subr.bf16.mxu0 %v8539_v1  ;;  %v1041_v2 = vsel %vm1039_vm0, %v1027_v0, 0  ;;  %7910 = vmatprep.mubr.msk.bf16.mxu0 %vm8540_vm1, %v8539_v1  ;;  %vm1035_vm2 = vcmask 31744   ;;  %v8131_v5 = vld [vmem:[%s8590_s25 + $0x8] sm:$0xff]   ;;  %v8132_v6 = vld [vmem:[%s8590_s25] sm:$0xff]   ;;  %vm1110_vm3 = vcmask 261120   ;;  %s9580_s17 = smov 72  }
  0x5b   : > { %7909 = vmatpush3.bf16.msra.mxu0 %v1041_v2  ;;  %7914 = vmatprep.subr.bf16.mxu1 %v8539_v1  ;;  %s7102_s16 = sshll.u32 %s8786_s2, 3  ;;  %v7103_v7 = vld [vmem:[%s8585_s21] ss:$0 sm:$0xff]  ;;  %vm1164_vm4 = vcmask 64512   ;;  %vm1497_vm5 = vcmask 130112   ;;  %vm1668_vm6 = vcmask 195712  }
  0x5c   : > { %7918 = vmatprep.mubr.msk.bf16.mxu1 %vm8540_vm1, %v8539_v1  ;;  %7922 = vmatprep.subr.mxu0 %v8539_v1  ;;  %s1020_s22 = scalar_lea.vmem %s9627_s5, %s7102_s16  ;;  %v1083_v9 = vld [vmem:[%s9628_s13] sm:$0xff]  ;;  %s9583_s16 = smov 120   ;;  %vm1839_vm7 = vcmask 261312   ;;  %vm6960_vm8 = vcmask 130048  }
  0x5d   : > { %v1025_v3 = vld [vmem:[%s1020_s22] sm:$0xff]  ;;  %7915 = vmatpush3.bf16.msra.mxu1 %v8131_v5  ;;  %s8543_s22 = smov 88   ;;  %s9581_s5 = smov 80  }
  0x5e   : > { %v1026_v4 = vpack.c.bf16 %v1025_v3, %v1025_v3  ;;  %7916 = vmatprep.subr.bf16.mxu1 %v8539_v1  ;;  %v7105_v16 = vld [vmem:[%s8595_s29] ss:$0 sm:$0xff]  ;;  %s8545_s13 = smov 112   ;;  %s9660_s12 = sld [smem:[#allocation30_spill]] }
  0x60   : > { %7911 = vmatmul.mubr.msk.bf16.vlgmr.msra.gmra.mxu0 %vm1035_vm2, %v1026_v4 }
  0x61   : > { %7924 = vmatprep.mubr.msk.f32.mxu0 %vm8540_vm1, %v8539_v1  ;;  %7917 = vmatpush3.bf16.msra.mxu1 %v8132_v6 }
  0x62   : > { %7932 = vmatprep.subr.mxu1 %v8539_v1 }
 0x120   : > { %v1077_v8 = vpop.f32.mrf.mxu0 }
 0x121   : > { %v1078_v10 = vadd.f32 %v7103_v7, %v1077_v8 }
 0x122   : > { %v7912_v11 = vpop.f32.mrf.mxu0 }
 0x123   : > { %v8802_v12 = vadd.f32 %v1083_v9, %v1078_v10 }
 0x124   : > { %v1080_v13 = vpop.f32.mrf.mxu0 }
 0x125   : > { %v1086_v14 = vpack.c.bf16 %v8802_v12, %v8802_v12 }
 0x126   : > { %v7913_v15 = vpop.f32.mrf.mxu0 }
 0x127   : > { %7919 = vmatmul.mubr.msk.bf16.vlgmr.msra.gmra.mxu1 %vm1110_vm3, %v1086_v14 }
 0x128   : > { %7934 = vmatprep.mubr.msk.f32.mxu1 %vm8540_vm1, %v8539_v1 }
 0x1e7   : > { %v1148_v17 = vpop.f32.mrf.mxu1 }
 0x1e8   : > { %v8810_v18 = vadd.f32 %v7105_v16, %v1148_v17 }
 0x1e9   : > { %v7920_v19 = vpop.f32.mrf.mxu1 }
 0x1ea   : > { %1162 = vrot.lane.b32.xlu0 %v8810_v18, %s9579_s23  ;;  %v1154_v20 = vmul.f32 0.35355338, %v8810_v18  ;;  %s9582_s23 = smov 104  }
 0x1eb   : > { %v1151_v21 = vpop.f32.mrf.mxu1 }
 0x1ec   : > { %1328 = vrot.lane.b32.xlu1 %v1154_v20, %s9583_s16  ;;  %s9584_s16 = smov 48  }
 0x1ed   : > { %v7921_v22 = vpop.f32.mrf.mxu1 }
 0x1ee   : > { %1330 = vrot.lane.b32.xlu0 %v8810_v18, %s8543_s22 }
 0x1f0   : > { %1501 = vrot.lane.b32.xlu1 %v8810_v18, %s9581_s5  ;;  %s9589_s5 = smov 64  }
 0x1f2   : > { %1499 = vrot.lane.b32.xlu0 %v1154_v20, %s8545_s13 }
 0x1f4   : > { %1672 = vrot.lane.b32.xlu1 %v8810_v18, %s9580_s17  ;;  %s8846_s17 = scalar_lea.vmem %s9629_s9, %s8786_s2  ;;  %s9590_s2 = smov 56  }
 0x1f5   : > { %v7109_v30 = vld [vmem:[%s8846_s17] ss:$0 sm:$0xff] }
 0x1f6   : > { %1670 = vrot.lane.b32.xlu0 %v1154_v20, %s9582_s23  ;;  %s9585_s23 = smov 40  }
 0x25c   : > { %v1163_v23 = vpop.permute.xlu0 %1162 }
 0x25d   : > { %7923 = vmatpush3.xpose.msk.msra.mxu0 %vm1164_vm4, %v1163_v23 }
 0x25e   : > { %v1329_v24 = vpop.permute.xlu1 %1328  ;;  %7927 = vmatprep.subr.mxu0 %v8539_v1 }
 0x260   : > { %v1331_v25 = vpop.permute.xlu0 %1330  ;;  %7925 = vmatmul.mubr.msk.f32.vlgmr.msra.gmra.mxu0 %vm1164_vm4, %v1154_v20 }
 0x261   : > { %7933 = vmatpush3.xpose.msk.msra.mxu1 %vm1164_vm4, %v1331_v25  ;;  %7929 = vmatprep.mubr.msk.f32.mxu0 %vm8540_vm1, %v8539_v1  ;;  %v8133_v25 = vld [vmem:[%s9623_s3 + $0x8] sm:$0xff]  }
 0x262   : > { %v1502_v26 = vpop.permute.xlu1 %1501  ;;  %7942 = vmatprep.subr.mxu1 %v8539_v1 }
 0x264   : > { %7935 = vmatmul.mubr.msk.f32.vlgmr.msra.gmra.mxu1 %vm1164_vm4, %v1329_v24  ;;  %v1500_v27 = vpop.permute.xlu0 %1499 }
 0x265   : > { %7943 = vmatpush3.xpose.msk.msra.mxu1 %vm1164_vm4, %v1502_v26  ;;  %7944 = vmatprep.mubr.msk.f32.mxu1 %vm8540_vm1, %v8539_v1  ;;  %v8134_v26 = vld [vmem:[%s9623_s3] sm:$0xff]   ;;  %s9639_s3 = smov 104  }
 0x266   : > { %7952 = vmatprep.subr.mxu1 %v8539_v1  ;;  %v1673_v28 = vpop.permute.xlu1 %1672 }
 0x268   : > { %7945 = vmatmul.mubr.msk.f32.vlgmr.msra.gmra.mxu1 %vm1164_vm4, %v1500_v27  ;;  %v1671_v29 = vpop.permute.xlu0 %1670 }
 0x269   : > { %7953 = vmatpush3.xpose.msk.msra.mxu1 %vm1164_vm4, %v1673_v28  ;;  %7954 = vmatprep.mubr.msk.f32.mxu1 %vm8540_vm1, %v8539_v1 }
 0x26a   : > { %7962 = vmatprep.subr.bf16.mxu1 %v8539_v1 }
 0x26c   : > { %7955 = vmatmul.mubr.msk.f32.vlgmr.msra.gmra.mxu1 %vm1164_vm4, %v1671_v29 }
 0x26d   : > { %7966 = vmatprep.mubr.msk.bf16.mxu1 %vm8540_vm1, %v8539_v1  ;;  %7963 = vmatpush3.bf16.msra.mxu1 %v8133_v25 }
 0x26e   : > { %7964 = vmatprep.subr.bf16.mxu1 %v8539_v1 }
 0x271   : > { %7965 = vmatpush3.bf16.msra.mxu1 %v8134_v26 }
 0x320   : > { %v1236_v31 = vpop.f32.mrf.mxu0 }
 0x321   : > { %v1237_v32 = vadd.f32 %v7109_v30, %v1236_v31 }
 0x322   : > { %v7926_v33 = vpop.f32.mrf.mxu0 }
 0x323   : > { %v1240_v34 = vsel %vm1164_vm4, %v1237_v32, -inf }
 0x324   : > { %v1402_v35 = vpop.f32.mrf.mxu1  ;;  %1241 = vmax.xlane.f32.xlu1 %v1240_v34 }
 0x325   : > { %v1403_v36 = vadd.f32 %v7109_v30, %v1402_v35 }
 0x326   : > { %v7936_v37 = vpop.f32.mrf.mxu1 }
 0x327   : > { %v1406_v38 = vsel %vm1164_vm4, %v1403_v36, -inf }
 0x328   : > { %1407 = vmax.xlane.f32.xlu0 %v1406_v38  ;;  %v1573_v39 = vpop.f32.mrf.mxu1 }
 0x329   : > { %v1574_v40 = vadd.f32 %v7109_v30, %v1573_v39 }
 0x32a   : > { %v7946_v41 = vpop.f32.mrf.mxu1 }
 0x32b   : > { %v1577_v42 = vsel %vm1164_vm4, %v1574_v40, -inf }
 0x32c   : > { %1578 = vmax.xlane.f32.xlu0 %v1577_v42  ;;  %v1744_v43 = vpop.f32.mrf.mxu1 }
 0x32d   : > { %v1745_v45 = vadd.f32 %v7109_v30, %v1744_v43 }
 0x32e   : > { %v7956_v44 = vpop.f32.mrf.mxu1 }
 0x32f   : > { %v1748_v46 = vsel %vm1164_vm4, %v1745_v45, -inf }
 0x335   : > { %1415 = vrot.lane.b32.xlu1 %v8810_v18, %s9590_s2  ;;  %s9636_s2 = sld [smem:[#allocation18_spill]] }
 0x342   : > { %1249 = vrot.lane.b32.xlu0 %v8810_v18, %s9589_s5  ;;  %s9635_s5 = sld [smem:[#allocation16_spill]] }
 0x346   : > { %1757 = vrot.lane.b32.xlu0 %v8810_v18, %s9585_s23  ;;  %s9588_s23 = smov 16  }
 0x359   : > { %1749 = vmax.xlane.f32.xlu1 %v1748_v46 }
 0x36a   : > { %1586 = vrot.lane.b32.xlu1 %v8810_v18, %s9584_s16  ;;  %s9586_s16 = smov 8  }
 0x3ad   : > { %v1242_v47 = vpop.xlane.xlu1 %1241 }
 0x3ae   : > { %v1243_v48 = vsub.f32 %v1237_v32, %v1242_v47 }
 0x3b0   : > { %v1244_v49 = vmul.f32 1.442695, %v1243_v48 }
 0x3b1   : > { %v1408_v50 = vpop.xlane.xlu0 %1407  ;;  %v1416_v58 = vpop.permute.xlu1 %1415 }
 0x3b2   : > { %8399 = vpow2.f32 %v1244_v49  ;;  %v1409_v51 = vsub.f32 %v1403_v36, %v1408_v50  ;;  %v7122_v36 = vld [vmem:[%s9630_s8] ss:$0 sm:$0xff]  ;;  %s9641_s8 = smov 72  }
 0x3b3   : > { %v1957_v49 = vld [vmem:[%s8620_s24 + $0x80] sm:$0xff] }
 0x3b4   : > { %v1410_v52 = vmul.f32 1.442695, %v1409_v51  ;;  %v1965_v50 = vld [vmem:[%s8620_s24 + $0xc0] sm:$0xff]  ;;  %v1958_v51 = vld [vmem:[%s8620_s24 + $0x88] sm:$0xff] }
 0x3b5   : > { %v1579_v53 = vpop.xlane.xlu0 %1578 }
 0x3b6   : > { %8401 = vpow2.f32 %v1410_v52  ;;  %v1580_v54 = vsub.f32 %v1574_v40, %v1579_v53  ;;  %v1966_v52 = vld [vmem:[%s8620_s24 + $0xc8] sm:$0xff]  ;;  %v7144_v53 = vcombine.low %v1957_v49, %v1965_v50 }
 0x3b8   : > { %v1581_v55 = vmul.f32 1.442695, %v1580_v54  ;;  %v7146_v54 = vcombine.low %v1958_v51, %v1966_v52 }
 0x3b9   : > { %v1250_v56 = vpop.permute.xlu0 %1249 }
 0x3ba   : > { %8403 = vpow2.f32 %v1581_v55  ;;  %7928 = vmatpush3.msra.mxu0 %v1250_v56  ;;  %v7147_v55 = vcombine.high %v1958_v51, %v1966_v52  ;;  %v1941_v56 = vld [vmem:[%s8620_s24] sm:$0xff]  ;;  %v1947_v51 = vld [vmem:[%s8620_s24 + $0x30] sm:$0xff]  ;;  %v1948_v52 = vld [vmem:[%s8620_s24 + $0x38] sm:$0xff] }
 0x3bb   : > { %7937 = vmatprep.subr.mxu0 %v8539_v1 }
 0x3bc   : > { %2273 = vmatprep.subr.bf16.mxu1 %v7147_v55 }
 0x3bd   : > { %v1758_v5 = vpop.permute.xlu0 %1757 }
 0x3bf   : > { %v8400_v57 = vpop.eup %8399 }
 0x3c0   : > { %7930 = vmatmul.mubr.msk.f32.vlgmr.msra.gmra.mxu0 %vm1164_vm4, %v8400_v57  ;;  %v1246_v63 = vsel %vm1164_vm4, %v8400_v57, 0.0  ;;  %v1949_v57 = vld [vmem:[%s8620_s24 + $0x40] sm:$0xff] }
 0x3c1   : > { %7938 = vmatpush3.msra.mxu0 %v1416_v58  ;;  %7939 = vmatprep.mubr.msk.f32.mxu0 %vm8540_vm1, %v8539_v1  ;;  %v1942_v58 = vld [vmem:[%s8620_s24 + $0x8] sm:$0xff] }
 0x3c2   : > { %7947 = vmatprep.subr.mxu0 %v8539_v1 }
 0x3c3   : > { %v8402_v59 = vpop.eup %8401 }
 0x3c4   : > { %7940 = vmatmul.mubr.msk.f32.vlgmr.msra.gmra.mxu0 %vm1164_vm4, %v8402_v59  ;;  %v1412_v60 = vsel %vm1164_vm4, %v8402_v59, 0.0  ;;  %v7129_v59 = vcombine.high %v1941_v56, %v1949_v57 }
 0x3c5   : > { %1413 = vadd.xlane.f32.xlu1 %v1412_v60  ;;  %7949 = vmatprep.mubr.msk.f32.mxu0 %vm8540_vm1, %v8539_v1  ;;  %v1950_v60 = vld [vmem:[%s8620_s24 + $0x48] sm:$0xff] }
 0x3c7   : > { %v8404_v61 = vpop.eup %8403 }
 0x3c8   : > { %v1583_v62 = vsel %vm1164_vm4, %v8404_v61, 0.0 }
 0x3c9   : > { %1584 = vadd.xlane.f32.xlu0 %v1583_v62  ;;  %1247 = vadd.xlane.f32.xlu1 %v1246_v63  ;;  %v7130_v62 = vcombine.low %v1942_v58, %v1950_v60  ;;  %v7131_v63 = vcombine.high %v1942_v58, %v1950_v60  ;;  %v8135_v60 = vld [vmem:[%s9622_s6 + $0x78] sm:$0xff]  }
 0x3e2   : > { %v1750_v0 = vpop.xlane.xlu1 %1749 }
 0x3e3   : > { %v1751_v2 = vsub.f32 %v1745_v45, %v1750_v0  ;;  %v1959_v0 = vld [vmem:[%s8620_s24 + $0x90] sm:$0xff] }
 0x3e5   : > { %v1752_v3 = vmul.f32 1.442695, %v1751_v2  ;;  %v1967_v2 = vld [vmem:[%s8620_s24 + $0xd0] sm:$0xff] }
 0x3e6   : > { %v1587_v4 = vpop.permute.xlu1 %1586 }
 0x3e7   : > { %8405 = vpow2.f32 %v1752_v3  ;;  %7948 = vmatpush3.msra.mxu0 %v1587_v4  ;;  %v1960_v3 = vld [vmem:[%s8620_s24 + $0x98] sm:$0xff]  ;;  %v8555_v4 = vmov 0  }
 0x3e8   : > { %7950 = vmatmul.mubr.msk.f32.vlgmr.msra.gmra.mxu0 %vm1164_vm4, %v8404_v61  ;;  %7957 = vmatprep.subr.mxu0 %v8539_v1  ;;  %v7128_v61 = vcombine.low %v1941_v56, %v1949_v57 }
 0x3e9   : > { %7958 = vmatpush3.msra.mxu0 %v1758_v5  ;;  %7959 = vmatprep.mubr.msk.f32.mxu0 %vm8540_vm1, %v8539_v1  ;;  %v7149_v5 = vcombine.high %v1959_v0, %v1967_v2 }
 0x3f4   : > { %v8406_v6 = vpop.eup %8405 }
 0x3f5   : > { %7960 = vmatmul.mubr.msk.f32.vlgmr.msra.gmra.mxu0 %vm1164_vm4, %v8406_v6  ;;  %v1754_v7 = vsel %vm1164_vm4, %v8406_v6, 0.0  ;;  %v1968_v6 = vld [vmem:[%s8620_s24 + $0xd8] sm:$0xff] }
 0x3f6   : > { %1755 = vadd.xlane.f32.xlu0 %v1754_v7  ;;  %2252 = vmatprep.mubr.bf16.mxu0 %v8555_v4  ;;  %v7148_v7 = vcombine.low %v1959_v0, %v1967_v2  ;;  %v8139_v0 = vld [vmem:[%s9622_s6 + $0x70] sm:$0xff]  }
 0x3f7   : > { %v8140_v2 = vld [vmem:[%s9622_s6 + $0xf0] sm:$0xff]  }
 0x44e   : > { %v1414_v8 = vpop.xlane.xlu1 %1413 }
 0x452   : > { %v1248_v9 = vpop.xlane.xlu1 %1247  ;;  %v1585_v19 = vpop.xlane.xlu0 %1584 }
 0x453   : > { %8407 = vrcp.f32 %v1248_v9  ;;  %v7151_v9 = vcombine.high %v1960_v3, %v1968_v6 }
 0x454   : > { %8409 = vrcp.f32 %v1414_v8  ;;  %v7150_v8 = vcombine.low %v1960_v3, %v1968_v6  ;;  %v8141_v3 = vld [vmem:[%s9622_s6 + $0x30] sm:$0xff]   ;;  %v8143_v6 = vld [vmem:[%s9622_s6 + $0x68] sm:$0xff]  }
 0x455   : > { %8411 = vrcp.f32 %v1585_v19  ;;  %v1943_v19 = vld [vmem:[%s8620_s24 + $0x10] sm:$0xff] }
 0x460   : > { %v8408_v10 = vpop.eup %8407 }
 0x461   : > { %v8410_v15 = vpop.eup %8409 }
 0x462   : > { %v8412_v21 = vpop.eup %8411 }
 0x47f   : > { %v1756_v20 = vpop.xlane.xlu0 %1755 }
 0x480   : > { %v1321_v11 = vpop.f32.mrf.mxu0  ;;  %8413 = vrcp.f32 %v1756_v20  ;;  %v1951_v20 = vld [vmem:[%s8620_s24 + $0x50] sm:$0xff] }
 0x481   : > { %v1326_v13 = vmul.f32 %v8408_v10, %v1321_v11  ;;  %v7133_v25 = vcombine.high %v1943_v19, %v1951_v20 }
 0x482   : > { %v7931_v14 = vpop.f32.mrf.mxu0 }
 0x483   : > { %1327 = vst.msk [vmem:[#allocation2] sm:$0xff] %vm1164_vm4, %v1326_v13 }
 0x484   : > { %v1487_v16 = vpop.f32.mrf.mxu0 }
 0x485   : > { %v1492_v17 = vmul.f32 %v8410_v15, %v1487_v16  ;;  %v7126_v15 = vld [vmem:[%s9631_s14] ss:$0 sm:$0xff] }
 0x486   : > { %v7941_v18 = vpop.f32.mrf.mxu0 }
 0x487   : > { %1494 = vrot.lane.b32.xlu0 %v1492_v17, %s9586_s16  ;;  %s9587_s16 = smov 24   ;;  %v7127_v17 = vld [vmem:[%s8615_s19] ss:$0 sm:$0xff] }
 0x48d   : > { %v8414_v27 = vpop.eup %8413 }
 0x4a8   : > { %v1658_v22 = vpop.f32.mrf.mxu0 }
 0x4a9   : > { %v1663_v23 = vmul.f32 %v8412_v21, %v1658_v22  ;;  %v1944_v21 = vld [vmem:[%s8620_s24 + $0x18] sm:$0xff] }
 0x4aa   : > { %v7951_v24 = vpop.f32.mrf.mxu0  ;;  %v1952_v22 = vld [vmem:[%s8620_s24 + $0x58] sm:$0xff] }
 0x4ab   : > { %1665 = vrot.lane.b32.xlu1 %v1663_v23, %s9588_s23  ;;  %v7135_v26 = vcombine.high %v1944_v21, %v1952_v22  ;;  %s9634_s23 = sld [smem:[#allocation15_spill]] }
 0x4b5   : > { %v1829_v28 = vpop.f32.mrf.mxu0 }
 0x4b6   : > { %v1834_v29 = vmul.f32 %v8414_v27, %v1829_v28  ;;  %v1961_v27 = vld [vmem:[%s8620_s24 + $0xa0] sm:$0xff] }
 0x4b7   : > { %v7961_v30 = vpop.f32.mrf.mxu0  ;;  %v1969_v28 = vld [vmem:[%s8620_s24 + $0xe0] sm:$0xff] }
 0x4b8   : > { %1836 = vrot.lane.b32.xlu1 %v1834_v29, %s9587_s16  ;;  %v1962_v29 = vld [vmem:[%s8620_s24 + $0xa8] sm:$0xff]  ;;  %s9632_s16 = sld [smem:[#allocation14_spill]] }
 0x4b9   : > { %v1970_v30 = vld [vmem:[%s8620_s24 + $0xe8] sm:$0xff] }
 0x4f9   : > { %v1495_v31 = vpop.permute.xlu0 %1494 }
 0x4fa   : > { %1498 = vst.msk [vmem:[#allocation2] sm:$0xff] %vm1497_vm5, %v1495_v31  ;;  %v7132_v31 = vcombine.low %v1943_v19, %v1951_v20  ;;  %v8155_v19 = vld [vmem:[%s9622_s6 + $0x50] sm:$0xff]  }
 0x4fb   : > { %v8156_v20 = vld [vmem:[%s9622_s6 + $0xd0] sm:$0xff]  }
 0x51d   : > { %v1666_v32 = vpop.permute.xlu1 %1665 }
 0x51e   : > { %1669 = vst.msk [vmem:[#allocation2] sm:$0xff] %vm1668_vm6, %v1666_v32  ;;  %v7134_v32 = vcombine.low %v1944_v21, %v1952_v22  ;;  %v8157_v21 = vld [vmem:[%s9622_s6 + $0x10] sm:$0xff]  }
 0x51f   : > { %v8158_v22 = vld [vmem:[%s9622_s6 + $0x90] sm:$0xff]  }
 0x52a   : > { %v1837_v33 = vpop.permute.xlu1 %1836 }
 0x52b   : > { %1840 = vst.msk [vmem:[#allocation2] sm:$0xff] %vm1839_vm7, %v1837_v33  ;;  %v7153_v33 = vcombine.high %v1961_v27, %v1969_v28 }
 0x532   : > { %v1841_v34 = vld [vmem:[#allocation2] sm:$0xff] }
 0x533   : > { %v1842_v35 = vpack.c.bf16 %v1841_v34, %v1841_v34  ;;  %v7155_v34 = vcombine.high %v1962_v29, %v1970_v30 }
 0x535   : > { %7967 = vmatmul.mubr.msk.bf16.vlgmr.msra.gmra.mxu1 %vm1110_vm3, %v1842_v35  ;;  %v1945_v35 = vld [vmem:[%s8620_s24 + $0x20] sm:$0xff] }
 0x536   : > { %2274 = vmatpush1.bf16.msra.mxu1 %v7146_v54  ;;  %2293 = vmatprep.mubr.bf16.mxu1 %v8555_v4 }
 0x537   : > { %2275 = vmatprep.subr.bf16.mxu1 %v7131_v63  ;;  %v8138_v63 = vld [vmem:[%s9622_s6 + $0xb8] sm:$0xff]  }
 0x53a   : > { %2276 = vmatpush1.bf16.msra.mxu1 %v7130_v62  ;;  %v8137_v62 = vld [vmem:[%s9622_s6 + $0x38] sm:$0xff]  }
 0x53b   : > { %2355 = vmatprep.subr.bf16.mxu1 %v7151_v9  ;;  %v8146_v9 = vld [vmem:[%s9622_s6 + $0xa8] sm:$0xff]  }
 0x5f5   : > { %v1903_v37 = vpop.f32.mrf.mxu1 }
 0x5f6   : > { %v1904_v38 = vadd.f32 %v7122_v36, %v1903_v37  ;;  %v1953_v36 = vld [vmem:[%s8620_s24 + $0x60] sm:$0xff]  ;;  %v1946_v37 = vld [vmem:[%s8620_s24 + $0x28] sm:$0xff] }
 0x5f7   : > { %v7968_v39 = vpop.f32.mrf.mxu1 }
 0x5f8   : > { %v1909_v40 = vadd.f32 %v1904_v38, %v8802_v12  ;;  %v7145_v12 = vcombine.high %v1957_v49, %v1965_v50  ;;  %v1954_v38 = vld [vmem:[%s8620_s24 + $0x68] sm:$0xff]  ;;  %v7152_v39 = vcombine.low %v1961_v27, %v1969_v28  ;;  %v8163_v28 = vld [vmem:[%s9622_s6 + $0x40] sm:$0xff]  }
 0x5f9   : > { %v1906_v41 = vpop.f32.mrf.mxu1  ;;  %v8162_v27 = vld [vmem:[%s9622_s6 + $0x88] sm:$0xff]  }
 0x5fa   : > { %v1912_v42 = vsel %vm1110_vm3, %v1909_v40, 0.0  ;;  %2232 = vmatprep.subr.bf16.mxu0 %v7145_v12  ;;  %v7137_v41 = vcombine.high %v1945_v35, %v1953_v36  ;;  %v1955_v12 = vld [vmem:[%s8620_s24 + $0x70] sm:$0xff] }
 0x5fb   : > { %1913 = vadd.xlane.f32.xlu0 %v1912_v42  ;;  %v7969_v43 = vpop.f32.mrf.mxu1  ;;  %2233 = vmatpush1.bf16.msra.mxu0 %v7144_v53  ;;  %v7139_v42 = vcombine.high %v1946_v37, %v1954_v38  ;;  %v1956_v53 = vld [vmem:[%s8620_s24 + $0x78] sm:$0xff]  ;;  %v7141_v56 = vcombine.high %v1947_v51, %v1955_v12  ;;  %v7140_v58 = vcombine.low %v1947_v51, %v1955_v12 }
 0x5fc   : > { %2234 = vmatprep.subr.bf16.mxu0 %v7129_v59  ;;  %v1963_v43 = vld [vmem:[%s8620_s24 + $0xb0] sm:$0xff]  ;;  %v7143_v57 = vcombine.high %v1948_v52, %v1956_v53  ;;  %v7142_v59 = vcombine.low %v1948_v52, %v1956_v53 }
 0x5ff   : > { %2235 = vmatpush1.bf16.msra.mxu0 %v7128_v61  ;;  %v8136_v61 = vld [vmem:[%s9622_s6 + $0xf8] sm:$0xff]  }
 0x600   : > { %2314 = vmatprep.subr.bf16.mxu0 %v7149_v5  ;;  %v8142_v5 = vld [vmem:[%s9622_s6 + $0xb0] sm:$0xff]  }
 0x684   : > { %v1914_v44 = vpop.xlane.xlu0 %1913 }
 0x685   : > { %v1916_v45 = vmul.f32 0.03125, %v1914_v44  ;;  %v1971_v44 = vld [vmem:[%s8620_s24 + $0xf0] sm:$0xff] }
 0x686   : > { %v7157_v49 = vcombine.high %v1963_v43, %v1971_v44  ;;  %v7156_v54 = vcombine.low %v1963_v43, %v1971_v44 }
 0x687   : > { %v1917_v46 = vsub.f32 %v1909_v40, %v1916_v45  ;;  %v7154_v40 = vcombine.low %v1962_v29, %v1970_v30  ;;  %v1964_v45 = vld [vmem:[%s8620_s24 + $0xb8] sm:$0xff]  ;;  %v8164_v29 = vld [vmem:[%s9622_s6 + $0xc0] sm:$0xff]  }
 0x688   : > { %v8165_v30 = vld [vmem:[%s9622_s6] sm:$0xff]  }
 0x689   : > { %v1918_v47 = vmul.f32 %v1917_v46, %v1917_v46 }
 0x68b   : > { %v1919_v48 = vsel %vm1110_vm3, %v1918_v47, 0.0  ;;  %v7136_v47 = vcombine.low %v1945_v35, %v1953_v36 }
 0x68c   : > { %1920 = vadd.xlane.f32.xlu1 %v1919_v48  ;;  %v7138_v48 = vcombine.low %v1946_v37, %v1954_v38  ;;  %v9000_v38 = vld [vmem:[%s8625_s30] sm:$0xff] }
 0x715   : > { %v1921_v10 = vpop.xlane.xlu1 %1920 }
 0x716   : > { %v1922_v11 = vmul.f32 0.03125, %v1921_v10  ;;  %v8147_v10 = vld [vmem:[%s9622_s6 + $0x60] sm:$0xff]  }
 0x718   : > { %v1923_v13 = vadd.f32 1e-05, %v1922_v11  ;;  %v8148_v11 = vld [vmem:[%s9622_s6 + $0xe0] sm:$0xff]  }
 0x71a   : > { %8415 = vrsqrt.f32 %v1923_v13  ;;  %v8149_v13 = vld [vmem:[%s9622_s6 + $0x20] sm:$0xff]  }
 0x727   : > { %v8416_v14 = vpop.eup %8415 }
 0x728   : > { %v1925_v16 = vmul.f32 %v8416_v14, %v1917_v46  ;;  %v1972_v46 = vld [vmem:[%s8620_s24 + $0xf8] sm:$0xff]  ;;  %v8150_v14 = vld [vmem:[%s9622_s6 + $0xa0] sm:$0xff]  }
 0x729   : > { %v7159_v50 = vcombine.high %v1964_v45, %v1972_v46  ;;  %v7158_v55 = vcombine.low %v1964_v45, %v1972_v46 }
 0x72a   : > { %v1932_v18 = vmul.f32 %v7126_v15, %v1925_v16  ;;  %v8151_v15 = vld [vmem:[%s9622_s6 + $0x58] sm:$0xff]  }
 0x72b   : > { %v8152_v16 = vld [vmem:[%s9622_s6 + $0xd8] sm:$0xff]  }
 0x72c   : > { %v8913_v23 = vadd.f32 %v7127_v17, %v1932_v18  ;;  %v8153_v17 = vld [vmem:[%s9622_s6 + $0x18] sm:$0xff]  }
 0x72d   : > { %v8154_v18 = vld [vmem:[%s9622_s6 + $0x98] sm:$0xff]  }
 0x72e   : > { %v8917_v24 = vpack.c.bf16 %v8913_v23, %v8913_v23 }
 0x730   : > { %7160 = vmatmul.mubr.msk.bf16.vlgmr.msra.gmra.mxu0 %vm1110_vm3, %v8917_v24  ;;  %7161 = vmatmul.mubr.msk.bf16.vlgmr.msra.gmra.mxu1 %vm1110_vm3, %v8917_v24 }
 0x731   : > { %2315 = vmatpush1.bf16.msra.mxu0 %v7148_v7  ;;  %2356 = vmatpush1.bf16.msra.mxu1 %v7150_v8  ;;  %v8144_v7 = vld [vmem:[%s9622_s6 + $0xe8] sm:$0xff]  }
 0x732   : > { %2316 = vmatprep.subr.bf16.mxu0 %v7133_v25  ;;  %2357 = vmatprep.subr.bf16.mxu1 %v7135_v26  ;;  %v8145_v8 = vld [vmem:[%s9622_s6 + $0x28] sm:$0xff]  }
 0x733   : > { %2334 = vmatprep.mubr.bf16.mxu0 %v8555_v4  ;;  %2375 = vmatprep.mubr.bf16.mxu1 %v8555_v4  ;;  %v8160_v25 = vld [vmem:[%s9622_s6 + $0xc8] sm:$0xff]  }
 0x734   : > { %v8161_v26 = vld [vmem:[%s9622_s6 + $0x8] sm:$0xff]  }
 0x735   : > { %2317 = vmatpush1.bf16.msra.mxu0 %v7132_v31  ;;  %2358 = vmatpush1.bf16.msra.mxu1 %v7134_v32  ;;  %v8166_v31 = vld [vmem:[%s9622_s6 + $0x80] sm:$0xff]   ;;  %v8167_v32 = vld [vmem:[%s9622_s6 + $0x178] sm:$0xff]  }
 0x736   : > { %2396 = vmatprep.subr.bf16.mxu0 %v7153_v33  ;;  %2437 = vmatprep.subr.bf16.mxu1 %v7155_v34  ;;  %v8168_v33 = vld [vmem:[%s9622_s6 + $0x1f8] sm:$0xff]   ;;  %v1977_v34 = vlaneseq }
 0x738   : > { %7162 = vmatmul.mubr.msk.bf16.vlgmr.msra.gmra.mxu0 %vm1110_vm3, %v8917_v24  ;;  %7163 = vmatmul.mubr.msk.bf16.vlgmr.msra.gmra.mxu1 %vm1110_vm3, %v8917_v24  ;;  %v8991_v35 = vshrl.u32 %v1977_v34, 7  ;;  %v8179_v34 = vld [vmem:[%s9622_s6 + $0x160] sm:$0xff]  }
 0x739   : > { %2397 = vmatpush1.bf16.msra.mxu0 %v7152_v39  ;;  %2438 = vmatpush1.bf16.msra.mxu1 %v7154_v40 }
 0x73a   : > { %2398 = vmatprep.subr.bf16.mxu0 %v7137_v41  ;;  %2439 = vmatprep.subr.bf16.mxu1 %v7139_v42  ;;  %v8994_v36 = vsub.s32 0, %v8991_v35  ;;  %v8997_v37 = vsub.s32 2, %v8991_v35  ;;  %v9003_v39 = vsub.s32 1, %v8991_v35  ;;  %v9006_v40 = vsub.s32 3, %v8991_v35 }
 0x73b   : > { %2416 = vmatprep.mubr.bf16.mxu0 %v8555_v4  ;;  %2457 = vmatprep.mubr.bf16.mxu1 %v8555_v4  ;;  %v9017_v52 = vsub.s32 5, %v8991_v35  ;;  %v9020_v53 = vsub.s32 7, %v8991_v35 }
 0x73c   : > { %v1980_v41 = vrot.slane %v9000_v38, %v8994_v36  ;;  %v1988_v42 = vrot.slane %v9000_v38, %v8997_v37  ;;  %v1984_v43 = vrot.slane %v9000_v38, %v9003_v39  ;;  %v1992_v44 = vrot.slane %v9000_v38, %v9006_v40 }
 0x73d   : > { %2399 = vmatpush1.bf16.msra.mxu0 %v7136_v47  ;;  %2440 = vmatpush1.bf16.msra.mxu1 %v7138_v48 }
 0x73e   : > { %2478 = vmatprep.subr.bf16.mxu0 %v7157_v49  ;;  %2519 = vmatprep.subr.bf16.mxu1 %v7159_v50 }
 0x740   : > { %7164 = vmatmul.mubr.msk.bf16.vlgmr.msra.gmra.mxu0 %vm1110_vm3, %v8917_v24  ;;  %7165 = vmatmul.mubr.msk.bf16.vlgmr.msra.gmra.mxu1 %vm1110_vm3, %v8917_v24 }
 0x741   : > { %2479 = vmatpush1.bf16.msra.mxu0 %v7156_v54  ;;  %2520 = vmatpush1.bf16.msra.mxu1 %v7158_v55 }
 0x742   : > { %2480 = vmatprep.subr.bf16.mxu0 %v7141_v56  ;;  %2521 = vmatprep.subr.bf16.mxu1 %v7143_v57 }
 0x743   : > { %2498 = vmatprep.mubr.bf16.mxu0 %v8555_v4  ;;  %2539 = vmatprep.mubr.bf16.mxu1 %v8555_v4 }
 0x745   : > { %2481 = vmatpush1.bf16.msra.mxu0 %v7140_v58  ;;  %2522 = vmatpush1.bf16.msra.mxu1 %v7142_v59 }
 0x746   : > { %7528 = vmatprep.subr.bf16.mxu0 %v8135_v60  ;;  %7550 = vmatprep.subr.bf16.mxu1 %v8136_v61 }
 0x748   : > { %7166 = vmatmul.mubr.msk.bf16.vlgmr.msra.gmra.mxu0 %vm1110_vm3, %v8917_v24  ;;  %7167 = vmatmul.mubr.msk.bf16.vlgmr.msra.gmra.mxu1 %vm1110_vm3, %v8917_v24  ;;  %v8159_v24 = vld [vmem:[%s9622_s6 + $0x48] sm:$0xff]  }
 0x749   : > { %7529 = vmatpush3.bf16.msra.mxu0 %v8137_v62  ;;  %7551 = vmatpush3.bf16.msra.mxu1 %v8138_v63 }
 0x74a   : > { %7530 = vmatprep.subr.bf16.mxu0 %v8139_v0  ;;  %7552 = vmatprep.subr.bf16.mxu1 %v8140_v2  ;;  %v2000_v0 = vrot.slane %v9000_v38, %v9017_v52  ;;  %v2008_v2 = vrot.slane %v9000_v38, %v9020_v53 }
 0x74d   : > { %7531 = vmatpush3.bf16.msra.mxu0 %v8141_v3  ;;  %7553 = vmatpush3.bf16.msra.mxu1 %v8142_v5  ;;  %v8169_v3 = vld [vmem:[%s9622_s6 + $0x138] sm:$0xff]  }
 0x74e   : > { %7532 = vmatprep.subr.bf16.mxu0 %v8143_v6  ;;  %7554 = vmatprep.subr.bf16.mxu1 %v8144_v7  ;;  %v8170_v5 = vld [vmem:[%s9622_s6 + $0x1b8] sm:$0xff]  }
 0x751   : > { %7533 = vmatpush3.bf16.msra.mxu0 %v8145_v8  ;;  %7555 = vmatpush3.bf16.msra.mxu1 %v8146_v9 }
 0x752   : > { %7534 = vmatprep.subr.bf16.mxu0 %v8147_v10  ;;  %7556 = vmatprep.subr.bf16.mxu1 %v8148_v11  ;;  %v8171_v10 = vld [vmem:[%s9622_s6 + $0x170] sm:$0xff]  }
 0x753   : > { %v8172_v11 = vld [vmem:[%s9622_s6 + $0x1f0] sm:$0xff]  }
 0x755   : > { %7535 = vmatpush3.bf16.msra.mxu0 %v8149_v13  ;;  %7557 = vmatpush3.bf16.msra.mxu1 %v8150_v14 }
 0x756   : > { %7536 = vmatprep.subr.bf16.mxu0 %v8151_v15  ;;  %7558 = vmatprep.subr.bf16.mxu1 %v8152_v16 }
 0x759   : > { %7537 = vmatpush3.bf16.msra.mxu0 %v8153_v17  ;;  %7559 = vmatpush3.bf16.msra.mxu1 %v8154_v18  ;;  %v8173_v17 = vld [vmem:[%s9622_s6 + $0x130] sm:$0xff]  }
 0x75a   : > { %7538 = vmatprep.subr.bf16.mxu0 %v8155_v19  ;;  %7560 = vmatprep.subr.bf16.mxu1 %v8156_v20  ;;  %v8174_v18 = vld [vmem:[%s9622_s6 + $0x1b0] sm:$0xff]  }
 0x75d   : > { %7539 = vmatpush3.bf16.msra.mxu0 %v8157_v21  ;;  %7561 = vmatpush3.bf16.msra.mxu1 %v8158_v22  ;;  %v8175_v21 = vld [vmem:[%s9622_s6 + $0x168] sm:$0xff]  }
 0x75e   : > { %7540 = vmatprep.subr.bf16.mxu0 %v8159_v24  ;;  %7562 = vmatprep.subr.bf16.mxu1 %v8160_v25  ;;  %v8176_v22 = vld [vmem:[%s9622_s6 + $0x1e8] sm:$0xff]  }
 0x761   : > { %7541 = vmatpush3.bf16.msra.mxu0 %v8161_v26  ;;  %7563 = vmatpush3.bf16.msra.mxu1 %v8162_v27 }
 0x762   : > { %7542 = vmatprep.subr.bf16.mxu0 %v8163_v28  ;;  %7564 = vmatprep.subr.bf16.mxu1 %v8164_v29 }
 0x765   : > { %7543 = vmatpush3.bf16.msra.mxu0 %v8165_v30  ;;  %7565 = vmatpush3.bf16.msra.mxu1 %v8166_v31  ;;  %v8177_v30 = vld [vmem:[%s9622_s6 + $0x128] sm:$0xff]  }
 0x766   : > { %7572 = vmatprep.subr.bf16.mxu0 %v8167_v32  ;;  %7594 = vmatprep.subr.bf16.mxu1 %v8168_v33  ;;  %v8178_v31 = vld [vmem:[%s9622_s6 + $0x1a8] sm:$0xff]  }
 0x7f0   : > { %v2254_v45 = vpop.f32.mrf.mxu0  ;;  %v2295_v46 = vpop.f32.mrf.mxu1 }
 0x7f1   : > { %v2255_v47 = vadd.f32 %v2254_v45, %v1980_v41  ;;  %v2296_v48 = vadd.f32 %v2295_v46, %v1988_v42  ;;  %v8180_v41 = vld [vmem:[%s9622_s6 + $0x1e0] sm:$0xff]  }
 0x7f2   : > { %v2256_v49 = vpop.f32.mrf.mxu0  ;;  %v2297_v50 = vpop.f32.mrf.mxu1  ;;  %v8181_v45 = vld [vmem:[%s9622_s6 + $0x120] sm:$0xff]  }
 0x7f3   : > { %v2257_v51 = vadd.f32 %v2256_v49, %v1984_v43  ;;  %v2298_v12 = vadd.f32 %v2297_v50, %v1992_v44  ;;  %v2548_v54 = vmax.f32 %v2255_v47, 0.0  ;;  %v2550_v55 = vmax.f32 %v2296_v48, 0.0  ;;  %v8182_v46 = vld [vmem:[%s9622_s6 + $0x1a0] sm:$0xff]   ;;  %v9052_v47 = vld [vmem:[%s8625_s30 + $0x8] sm:$0xff]  ;;  %v8183_v50 = vld [vmem:[%s9622_s6 + $0x158] sm:$0xff]  }
 0x7f4   : > { %v2258_v56 = vpop.f32.mrf.mxu0  ;;  %v2299_v57 = vpop.f32.mrf.mxu1  ;;  %v9047_v44 = vsub.s32 6, %v8991_v35 }
 0x7f5   : > { %v2549_v58 = vmax.f32 %v2257_v51, 0.0  ;;  %v2551_v59 = vmax.f32 %v2298_v12, 0.0  ;;  %v2564_v6 = vpack.c.bf16 %v2548_v54, %v2548_v54  ;;  %v2566_v7 = vpack.c.bf16 %v2550_v55, %v2550_v55  ;;  %v8184_v51 = vld [vmem:[%s9622_s6 + $0x1d8] sm:$0xff]  }
 0x7f6   : > { %v2259_v60 = vpop.f32.mrf.mxu0  ;;  %v2300_v61 = vpop.f32.mrf.mxu1  ;;  %v2036_v12 = vrot.slane %v9052_v47, %v9047_v44  ;;  %v8185_v56 = vld [vmem:[%s9622_s6 + $0x118] sm:$0xff]  }
 0x7f7   : > { %v2565_v62 = vpack.c.bf16 %v2549_v58, %v2549_v58  ;;  %v2567_v63 = vpack.c.bf16 %v2551_v59, %v2551_v59  ;;  %v8186_v57 = vld [vmem:[%s9622_s6 + $0x198] sm:$0xff]   ;;  %v9061_v58 = vsub.s32 4, %v8991_v35  ;;  %v8187_v61 = vld [vmem:[%s9622_s6 + $0x150] sm:$0xff]  }
 0x7f8   : > { %v9028_v8 = vpop.f32.mrf.mxu0  ;;  %v9030_v9 = vpop.f32.mrf.mxu1  ;;  %v8190_v35 = vld [vmem:[%s9622_s6 + $0x190] sm:$0xff]  }
 0x7f9   : > { %3643 = vmatprep.mubr.bf16.mxu0 %v2565_v62  ;;  %3683 = vmatprep.mubr.bf16.mxu1 %v2567_v63  ;;  %v8188_v62 = vld [vmem:[%s9622_s6 + $0x1d0] sm:$0xff]  }
 0x7fa   : > { %v2338_v13 = vpop.f32.mrf.mxu0  ;;  %v2379_v14 = vpop.f32.mrf.mxu1  ;;  %3644 = vmatmul.mubr.bf16.vlgmr.msra.gmra.mxu0 %v2564_v6  ;;  %3684 = vmatmul.mubr.bf16.vlgmr.msra.gmra.mxu1 %v2566_v7  ;;  %v2004_v6 = vrot.slane %v9000_v38, %v9047_v44 }
 0x7fb   : > { %v2339_v15 = vadd.f32 %v2338_v13, %v2000_v0  ;;  %v2380_v16 = vadd.f32 %v2379_v14, %v2008_v2  ;;  %7573 = vmatpush3.bf16.msra.mxu0 %v8169_v3  ;;  %7595 = vmatpush3.bf16.msra.mxu1 %v8170_v5  ;;  %v8189_v3 = vld [vmem:[%s9622_s6 + $0x110] sm:$0xff]   ;;  %v1996_v5 = vrot.slane %v9000_v38, %v9061_v58  ;;  %v8192_v13 = vld [vmem:[%s9622_s6 + $0x1c8] sm:$0xff]  }
 0x7fc   : > { %v2340_v19 = vpop.f32.mrf.mxu0  ;;  %v2381_v20 = vpop.f32.mrf.mxu1  ;;  %7574 = vmatprep.subr.bf16.mxu0 %v8171_v10  ;;  %7596 = vmatprep.subr.bf16.mxu1 %v8172_v11  ;;  %v8191_v11 = vld [vmem:[%s9622_s6 + $0x148] sm:$0xff]   ;;  %v2016_v14 = vrot.slane %v9052_v47, %v9003_v39 }
 0x7fd   : > { %v2553_v24 = vmax.f32 %v2339_v15, 0.0  ;;  %v2555_v25 = vmax.f32 %v2380_v16, 0.0  ;;  %v2024_v15 = vrot.slane %v9052_v47, %v9006_v40  ;;  %v8193_v38 = vld [vmem:[%s9622_s6 + $0x108] sm:$0xff]   ;;  %v2337_v19 = vadd.f32 %v9028_v8, %v1996_v5  ;;  %v8199_v8 = vld [vmem:[%s9622_s6 + $0x278] sm:$0xff]  }
 0x7fe   : > { %v2341_v26 = vpop.f32.mrf.mxu0  ;;  %v2382_v27 = vpop.f32.mrf.mxu1  ;;  %v2378_v20 = vadd.f32 %v9030_v9, %v2004_v6  ;;  %v8200_v9 = vld [vmem:[%s9622_s6 + $0x2f8] sm:$0xff]  }
 0x7ff   : > { %v2569_v28 = vpack.c.bf16 %v2553_v24, %v2553_v24  ;;  %v2571_v29 = vpack.c.bf16 %v2555_v25, %v2555_v25  ;;  %7575 = vmatpush3.bf16.msra.mxu0 %v8173_v17  ;;  %7597 = vmatpush3.bf16.msra.mxu1 %v8174_v18  ;;  %v8194_v18 = vld [vmem:[%s9622_s6 + $0x188] sm:$0xff]   ;;  %v8197_v26 = vld [vmem:[%s9622_s6 + $0x100] sm:$0xff]   ;;  %v8217_v5 = vld [vmem:[%s9622_s6 + $0x218] sm:$0xff]  }
 0x800   : > { %v9040_v32 = vpop.f32.mrf.mxu0  ;;  %v9042_v33 = vpop.f32.mrf.mxu1  ;;  %7576 = vmatprep.subr.bf16.mxu0 %v8175_v21  ;;  %7598 = vmatprep.subr.bf16.mxu1 %v8176_v22  ;;  %v8195_v21 = vld [vmem:[%s9622_s6 + $0x140] sm:$0xff]   ;;  %v8218_v6 = vld [vmem:[%s9622_s6 + $0x298] sm:$0xff]  }
 0x801   : > { %3723 = vmatprep.mubr.bf16.mxu0 %v2569_v28  ;;  %3763 = vmatprep.mubr.bf16.mxu1 %v2571_v29  ;;  %v8196_v22 = vld [vmem:[%s9622_s6 + $0x1c0] sm:$0xff]   ;;  %v2552_v28 = vmax.f32 %v2337_v19, 0.0  ;;  %v2554_v29 = vmax.f32 %v2378_v20, 0.0  ;;  %v8225_v19 = vld [vmem:[%s9622_s6 + $0x208] sm:$0xff]  }
 0x802   : > { %v2420_v42 = vpop.f32.mrf.mxu0  ;;  %v2461_v43 = vpop.f32.mrf.mxu1  ;;  %v8198_v27 = vld [vmem:[%s9622_s6 + $0x180] sm:$0xff]  }
 0x803   : > { %7577 = vmatpush3.bf16.msra.mxu0 %v8177_v30  ;;  %7599 = vmatpush3.bf16.msra.mxu1 %v8178_v31  ;;  %v2421_v24 = vadd.f32 %v2420_v42, %v2016_v14  ;;  %v2462_v25 = vadd.f32 %v2461_v43, %v2024_v15  ;;  %v2570_v42 = vpack.c.bf16 %v2554_v29, %v2554_v29  ;;  %v8202_v43 = vld [vmem:[%s9622_s6 + $0x2b8] sm:$0xff]   ;;  %v8222_v14 = vld [vmem:[%s9622_s6 + $0x290] sm:$0xff]   ;;  %v8223_v15 = vld [vmem:[%s9622_s6 + $0x248] sm:$0xff]  }
 0x804   : > { %v2422_v48 = vpop.f32.mrf.mxu0  ;;  %v2463_v49 = vpop.f32.mrf.mxu1  ;;  %7578 = vmatprep.subr.bf16.mxu0 %v8179_v34  ;;  %7600 = vmatprep.subr.bf16.mxu1 %v8180_v41  ;;  %v8201_v34 = vld [vmem:[%s9622_s6 + $0x238] sm:$0xff]   ;;  %v2568_v41 = vpack.c.bf16 %v2552_v28, %v2552_v28  ;;  %v8229_v28 = vld [vmem:[%s9622_s6 + $0x200] sm:$0xff]  }
 0x805   : > { %v2557_v30 = vmax.f32 %v2421_v24, 0.0  ;;  %v2559_v31 = vmax.f32 %v2462_v25, 0.0  ;;  %v8204_v48 = vld [vmem:[%s9622_s6 + $0x2f0] sm:$0xff]   ;;  %v8228_v25 = vld [vmem:[%s9622_s6 + $0x2c0] sm:$0xff]  }
 0x806   : > { %v2423_v54 = vpop.f32.mrf.mxu0  ;;  %v2464_v55 = vpop.f32.mrf.mxu1 }
 0x807   : > { %7579 = vmatpush3.bf16.msra.mxu0 %v8181_v45  ;;  %7601 = vmatpush3.bf16.msra.mxu1 %v8182_v46  ;;  %v2573_v45 = vpack.c.bf16 %v2557_v30, %v2557_v30  ;;  %v8203_v46 = vld [vmem:[%s9622_s6 + $0x270] sm:$0xff]   ;;  %v2575_v49 = vpack.c.bf16 %v2559_v31, %v2559_v31  ;;  %v8208_v54 = vld [vmem:[%s9622_s6 + $0x2e8] sm:$0xff]  }
 0x808   : > { %v9063_v59 = vpop.f32.mrf.mxu0  ;;  %v2541_v60 = vpop.f32.mrf.mxu1  ;;  %7580 = vmatprep.subr.bf16.mxu0 %v8183_v50  ;;  %7602 = vmatprep.subr.bf16.mxu1 %v8184_v51  ;;  %v8205_v50 = vld [vmem:[%s9622_s6 + $0x230] sm:$0xff]   ;;  %v8209_v55 = vld [vmem:[%s9622_s6 + $0x228] sm:$0xff]  }
 0x809   : > { %v9067_v63 = vadd.f32 %v2541_v60, %v2036_v12  ;;  %v8206_v51 = vld [vmem:[%s9622_s6 + $0x2b0] sm:$0xff]   ;;  %v8207_v12 = vld [vmem:[%s9622_s6 + $0x268] sm:$0xff]   ;;  %v8212_v60 = vld [vmem:[%s9622_s6 + $0x2e0] sm:$0xff]  }
 0x80a   : > { %v9069_v0 = vpop.f32.mrf.mxu0  ;;  %v9071_v2 = vpop.f32.mrf.mxu1 }
 0x80b   : > { %7581 = vmatpush3.bf16.msra.mxu0 %v8185_v56  ;;  %7603 = vmatpush3.bf16.msra.mxu1 %v8186_v57  ;;  %v8210_v56 = vld [vmem:[%s9622_s6 + $0x2a8] sm:$0xff]   ;;  %v8211_v57 = vld [vmem:[%s9622_s6 + $0x260] sm:$0xff]  }
 0x80c   : > { %v2504_v7 = vpop.f32.mrf.mxu0  ;;  %v2545_v10 = vpop.f32.mrf.mxu1  ;;  %7582 = vmatprep.subr.bf16.mxu0 %v8187_v61  ;;  %7604 = vmatprep.subr.bf16.mxu1 %v8188_v62  ;;  %v8213_v61 = vld [vmem:[%s9622_s6 + $0x220] sm:$0xff]  }
 0x80d   : > { %v8214_v62 = vld [vmem:[%s9622_s6 + $0x2a0] sm:$0xff]   ;;  %v8219_v7 = vld [vmem:[%s9622_s6 + $0x250] sm:$0xff]  }
 0x80e   : > { %v2505_v16 = vpop.f32.mrf.mxu0  ;;  %v2546_v17 = vpop.f32.mrf.mxu1  ;;  %v8220_v10 = vld [vmem:[%s9622_s6 + $0x2d0] sm:$0xff]  }
 0x80f   : > { %7583 = vmatpush3.bf16.msra.mxu0 %v8189_v3  ;;  %7605 = vmatpush3.bf16.msra.mxu1 %v8190_v35  ;;  %v8215_v3 = vld [vmem:[%s9622_s6 + $0x258] sm:$0xff]   ;;  %v2020_v16 = vrot.slane %v9052_v47, %v8997_v37  ;;  %v8224_v17 = vld [vmem:[%s9622_s6 + $0x2c8] sm:$0xff]  }
 0x810   : > { %7584 = vmatprep.subr.bf16.mxu0 %v8191_v11  ;;  %7606 = vmatprep.subr.bf16.mxu1 %v8192_v13  ;;  %v8216_v35 = vld [vmem:[%s9622_s6 + $0x2d8] sm:$0xff]   ;;  %v8221_v11 = vld [vmem:[%s9622_s6 + $0x210] sm:$0xff]   ;;  %v2012_v13 = vrot.slane %v9052_v47, %v8994_v36 }
 0x811   : > { %v2460_v24 = vadd.f32 %v9042_v33, %v2020_v16  ;;  %v8232_v33 = vld [vmem:[%s9622_s6 + $0x3f8] sm:$0xff]  }
 0x812   : > { %v2419_v20 = vadd.f32 %v9040_v32, %v2012_v13  ;;  %v8230_v32 = vld [vmem:[%s9622_s6 + $0x280] sm:$0xff]   ;;  %v8255_v13 = vld [vmem:[%s9622_s6 + $0x348] sm:$0xff]  }
 0x813   : > { %7585 = vmatpush3.bf16.msra.mxu0 %v8193_v38  ;;  %7607 = vmatpush3.bf16.msra.mxu1 %v8194_v18  ;;  %v2032_v38 = vrot.slane %v9052_v47, %v9017_v52  ;;  %v2040_v18 = vrot.slane %v9052_v47, %v9020_v53 }
 0x814   : > { %7586 = vmatprep.subr.bf16.mxu0 %v8195_v21  ;;  %7608 = vmatprep.subr.bf16.mxu1 %v8196_v22  ;;  %v8226_v21 = vld [vmem:[%s9622_s6 + $0x288] sm:$0xff]   ;;  %v8227_v22 = vld [vmem:[%s9622_s6 + $0x240] sm:$0xff]   ;;  %v2556_v29 = vmax.f32 %v2419_v20, 0.0 }
 0x815   : > { %v8262_v20 = vld [vmem:[%s9622_s6 + $0x380] sm:$0xff]  }
 0x817   : > { %7587 = vmatpush3.bf16.msra.mxu0 %v8197_v26  ;;  %7609 = vmatpush3.bf16.msra.mxu1 %v8198_v27  ;;  %v2503_v26 = vadd.f32 %v9069_v0, %v2032_v38  ;;  %v2544_v27 = vadd.f32 %v9071_v2, %v2040_v18  ;;  %v8233_v0 = vld [vmem:[%s9622_s6 + $0x338] sm:$0xff]   ;;  %v8259_v38 = vld [vmem:[%s9622_s6 + $0x340] sm:$0xff]  }
 0x818   : > { %7616 = vmatprep.subr.bf16.mxu0 %v8199_v8  ;;  %7638 = vmatprep.subr.bf16.mxu1 %v8200_v9  ;;  %v8231_v8 = vld [vmem:[%s9622_s6 + $0x378] sm:$0xff]   ;;  %v2558_v9 = vmax.f32 %v2460_v24, 0.0  ;;  %v8260_v18 = vld [vmem:[%s9622_s6 + $0x3c0] sm:$0xff]  }
 0x819   : > { %v2561_v30 = vmax.f32 %v2503_v26, 0.0  ;;  %v2563_v31 = vmax.f32 %v2544_v27, 0.0  ;;  %v8234_v2 = vld [vmem:[%s9622_s6 + $0x3b8] sm:$0xff]  }
 0x81a   : > { %3724 = vmatmul.mubr.bf16.vlgmr.msra.gmra.mxu0 %v2568_v41  ;;  %3764 = vmatmul.mubr.bf16.vlgmr.msra.gmra.mxu1 %v2570_v42  ;;  %v2574_v41 = vpack.c.bf16 %v2558_v9, %v2558_v9  ;;  %v8235_v42 = vld [vmem:[%s9622_s6 + $0x370] sm:$0xff]  }
 0x81b   : > { %7617 = vmatpush3.bf16.msra.mxu0 %v8201_v34  ;;  %3803 = vmatprep.mubr.bf16.mxu0 %v2573_v45  ;;  %v2572_v34 = vpack.c.bf16 %v2556_v29, %v2556_v29  ;;  %v8236_v45 = vld [vmem:[%s9622_s6 + $0x3f0] sm:$0xff]  }
 0x81c   : > { %7639 = vmatpush3.bf16.msra.mxu1 %v8202_v43  ;;  %3843 = vmatprep.mubr.bf16.mxu1 %v2575_v49  ;;  %v2577_v43 = vpack.c.bf16 %v2561_v30, %v2561_v30  ;;  %v8238_v49 = vld [vmem:[%s9622_s6 + $0x3b0] sm:$0xff]  }
 0x81d   : > { %7618 = vmatprep.subr.bf16.mxu0 %v8203_v46  ;;  %7640 = vmatprep.subr.bf16.mxu1 %v8204_v48  ;;  %v2579_v46 = vpack.c.bf16 %v2563_v31, %v2563_v31  ;;  %v8237_v48 = vld [vmem:[%s9622_s6 + $0x330] sm:$0xff]  }
 0x81f   : > { %7619 = vmatpush3.bf16.msra.mxu0 %v8205_v50  ;;  %v8239_v50 = vld [vmem:[%s9622_s6 + $0x368] sm:$0xff]  }
 0x820   : > { %7641 = vmatpush3.bf16.msra.mxu1 %v8206_v51  ;;  %7620 = vmatprep.subr.bf16.mxu0 %v8207_v12  ;;  %v8240_v51 = vld [vmem:[%s9622_s6 + $0x3e8] sm:$0xff]  }
 0x821   : > { %7642 = vmatprep.subr.bf16.mxu1 %v8208_v54  ;;  %v8241_v12 = vld [vmem:[%s9622_s6 + $0x328] sm:$0xff]  }
 0x822   : > { %v8242_v54 = vld [vmem:[%s9622_s6 + $0x3a8] sm:$0xff]  }
 0x823   : > { %7621 = vmatpush3.bf16.msra.mxu0 %v8209_v55  ;;  %v8243_v55 = vld [vmem:[%s9622_s6 + $0x360] sm:$0xff]  }
 0x824   : > { %7643 = vmatpush3.bf16.msra.mxu1 %v8210_v56  ;;  %7622 = vmatprep.subr.bf16.mxu0 %v8211_v57  ;;  %v8244_v56 = vld [vmem:[%s9622_s6 + $0x3e0] sm:$0xff]  }
 0x825   : > { %7644 = vmatprep.subr.bf16.mxu1 %v8212_v60  ;;  %v8245_v57 = vld [vmem:[%s9622_s6 + $0x320] sm:$0xff]  }
 0x826   : > { %v8246_v60 = vld [vmem:[%s9622_s6 + $0x3a0] sm:$0xff]  }
 0x827   : > { %7623 = vmatpush3.bf16.msra.mxu0 %v8213_v61  ;;  %v8247_v61 = vld [vmem:[%s9622_s6 + $0x358] sm:$0xff]  }
 0x828   : > { %7645 = vmatpush3.bf16.msra.mxu1 %v8214_v62  ;;  %7624 = vmatprep.subr.bf16.mxu0 %v8215_v3  ;;  %v8248_v62 = vld [vmem:[%s9622_s6 + $0x3d8] sm:$0xff]  }
 0x829   : > { %7646 = vmatprep.subr.bf16.mxu1 %v8216_v35  ;;  %v8249_v3 = vld [vmem:[%s9622_s6 + $0x318] sm:$0xff]  }
 0x82a   : > { %v8250_v35 = vld [vmem:[%s9622_s6 + $0x398] sm:$0xff]  }
 0x82b   : > { %7625 = vmatpush3.bf16.msra.mxu0 %v8217_v5  ;;  %v8251_v5 = vld [vmem:[%s9622_s6 + $0x350] sm:$0xff]  }
 0x82c   : > { %7647 = vmatpush3.bf16.msra.mxu1 %v8218_v6  ;;  %7626 = vmatprep.subr.bf16.mxu0 %v8219_v7  ;;  %v8252_v6 = vld [vmem:[%s9622_s6 + $0x3d0] sm:$0xff]  }
 0x82d   : > { %7648 = vmatprep.subr.bf16.mxu1 %v8220_v10  ;;  %v8253_v7 = vld [vmem:[%s9622_s6 + $0x310] sm:$0xff]   ;;  %v2028_v10 = vrot.slane %v9052_v47, %v9061_v58  ;;  %v8261_v47 = vld [vmem:[%s9622_s6 + $0x300] sm:$0xff]  }
 0x82f   : > { %7627 = vmatpush3.bf16.msra.mxu0 %v8221_v11  ;;  %v8254_v11 = vld [vmem:[%s9622_s6 + $0x390] sm:$0xff]   ;;  %v2501_v16 = vadd.f32 %v9063_v59, %v2028_v10 }
 0x830   : > { %7649 = vmatpush3.bf16.msra.mxu1 %v8222_v14  ;;  %7628 = vmatprep.subr.bf16.mxu0 %v8223_v15  ;;  %v8256_v14 = vld [vmem:[%s9622_s6 + $0x3c8] sm:$0xff]  }
 0x831   : > { %7650 = vmatprep.subr.bf16.mxu1 %v8224_v17  ;;  %v8257_v15 = vld [vmem:[%s9622_s6 + $0x308] sm:$0xff]  }
 0x832   : > { %v8258_v17 = vld [vmem:[%s9622_s6 + $0x388] sm:$0xff]   ;;  %s9640_s6 = smov 80  }
 0x833   : > { %7629 = vmatpush3.bf16.msra.mxu0 %v8225_v19  ;;  %v2560_v19 = vmax.f32 %v2501_v16, 0.0 }
 0x834   : > { %7651 = vmatpush3.bf16.msra.mxu1 %v8226_v21  ;;  %7630 = vmatprep.subr.bf16.mxu0 %v8227_v22  ;;  %v2562_v21 = vmax.f32 %v9067_v63, 0.0  ;;  %v7168_v63 = vld [vmem:[%s9632_s16] ss:$0 sm:$0xff]  ;;  %s9633_s16 = sld [smem:[#allocation17_spill]] }
 0x835   : > { %7652 = vmatprep.subr.bf16.mxu1 %v8228_v25  ;;  %v2576_v22 = vpack.c.bf16 %v2560_v19, %v2560_v19 }
 0x836   : > { %v2578_v59 = vpack.c.bf16 %v2562_v21, %v2562_v21 }
 0x837   : > { %7631 = vmatpush3.bf16.msra.mxu0 %v8229_v28 }
 0x838   : > { %7653 = vmatpush3.bf16.msra.mxu1 %v8230_v32  ;;  %7660 = vmatprep.subr.bf16.mxu0 %v8231_v8 }
 0x839   : > { %7682 = vmatprep.subr.bf16.mxu1 %v8232_v33 }
 0x83a   : > { %3804 = vmatmul.mubr.bf16.vlgmr.msra.gmra.mxu0 %v2572_v34 }
 0x83b   : > { %3844 = vmatmul.mubr.bf16.vlgmr.msra.gmra.mxu1 %v2574_v41  ;;  %7661 = vmatpush3.bf16.msra.mxu0 %v8233_v0 }
 0x83c   : > { %3883 = vmatprep.mubr.bf16.mxu0 %v2577_v43  ;;  %7683 = vmatpush3.bf16.msra.mxu1 %v8234_v2 }
 0x83d   : > { %3923 = vmatprep.mubr.bf16.mxu1 %v2579_v46  ;;  %7662 = vmatprep.subr.bf16.mxu0 %v8235_v42 }
 0x83e   : > { %7684 = vmatprep.subr.bf16.mxu1 %v8236_v45 }
 0x83f   : > { %7663 = vmatpush3.bf16.msra.mxu0 %v8237_v48 }
 0x840   : > { %7685 = vmatpush3.bf16.msra.mxu1 %v8238_v49  ;;  %7664 = vmatprep.subr.bf16.mxu0 %v8239_v50 }
 0x841   : > { %7686 = vmatprep.subr.bf16.mxu1 %v8240_v51 }
 0x843   : > { %7665 = vmatpush3.bf16.msra.mxu0 %v8241_v12 }
 0x844   : > { %7687 = vmatpush3.bf16.msra.mxu1 %v8242_v54  ;;  %7666 = vmatprep.subr.bf16.mxu0 %v8243_v55 }
 0x845   : > { %7688 = vmatprep.subr.bf16.mxu1 %v8244_v56 }
 0x847   : > { %7667 = vmatpush3.bf16.msra.mxu0 %v8245_v57 }
 0x848   : > { %7689 = vmatpush3.bf16.msra.mxu1 %v8246_v60  ;;  %7668 = vmatprep.subr.bf16.mxu0 %v8247_v61 }
 0x849   : > { %7690 = vmatprep.subr.bf16.mxu1 %v8248_v62 }
 0x84b   : > { %7669 = vmatpush3.bf16.msra.mxu0 %v8249_v3 }
 0x84c   : > { %7691 = vmatpush3.bf16.msra.mxu1 %v8250_v35  ;;  %7670 = vmatprep.subr.bf16.mxu0 %v8251_v5 }
 0x84d   : > { %7692 = vmatprep.subr.bf16.mxu1 %v8252_v6 }
 0x84f   : > { %7671 = vmatpush3.bf16.msra.mxu0 %v8253_v7 }
 0x850   : > { %7693 = vmatpush3.bf16.msra.mxu1 %v8254_v11  ;;  %7672 = vmatprep.subr.bf16.mxu0 %v8255_v13 }
 0x851   : > { %7694 = vmatprep.subr.bf16.mxu1 %v8256_v14 }
 0x853   : > { %7673 = vmatpush3.bf16.msra.mxu0 %v8257_v15 }
 0x854   : > { %7695 = vmatpush3.bf16.msra.mxu1 %v8258_v17  ;;  %7674 = vmatprep.subr.bf16.mxu0 %v8259_v38 }
 0x855   : > { %7696 = vmatprep.subr.bf16.mxu1 %v8260_v18 }
 0x857   : > { %7675 = vmatpush3.bf16.msra.mxu0 %v8261_v47 }
 0x858   : > { %7697 = vmatpush3.bf16.msra.mxu1 %v8262_v20  ;;  %7970 = vmatprep.subr.bf16.mxu0 %v8539_v1 }
 0x859   : > { %7978 = vmatprep.subr.mxu1 %v8539_v1 }
 0x85a   : > { %3884 = vmatmul.mubr.bf16.vlgmr.msra.gmra.mxu0 %v2576_v22 }
 0x85b   : > { %3924 = vmatmul.mubr.bf16.vlgmr.msra.gmra.mxu1 %v2578_v59  ;;  %7974 = vmatprep.mubr.msk.bf16.mxu0 %vm8540_vm1, %v8539_v1 }
 0x85c   : > { %7980 = vmatprep.mubr.msk.f32.mxu1 %vm8540_vm1, %v8539_v1 }
 0x8ba   : > { %v7544_v24 = vpop.f32.mrf.mxu0  ;;  %v7566_v25 = vpop.f32.mrf.mxu1 }
 0x8bc   : > { %v7545_v26 = vpop.f32.mrf.mxu0  ;;  %v7567_v27 = vpop.f32.mrf.mxu1 }
 0x8bd   : > { %v7546_v28 = vadd.f32 %v7545_v26, %v7544_v24  ;;  %v7568_v29 = vadd.f32 %v7567_v27, %v7566_v25  ;;  %v8263_v26 = vld [vmem:[%s9633_s16 + $0x8] sm:$0xff]   ;;  %v8264_v27 = vld [vmem:[%s9633_s16] sm:$0xff]  }
 0x8be   : > { %v7547_v32 = vpop.f32.mrf.mxu0  ;;  %v7569_v8 = vpop.f32.mrf.mxu1  ;;  %7971 = vmatpush3.bf16.msra.mxu0 %v8263_v26 }
 0x8bf   : > { %v3646_v9 = vadd.f32 %v7546_v28, %v7168_v63  ;;  %7972 = vmatprep.subr.bf16.mxu0 %v8539_v1  ;;  %v7297_v8 = vld [vmem:[%s9634_s23] ss:$0 sm:$0xff]  ;;  %s9637_s23 = smov 96  }
 0x8c0   : > { %v7548_v33 = vpop.f32.mrf.mxu0  ;;  %v7570_v30 = vpop.f32.mrf.mxu1 }
 0x8c1   : > { %v3686_v31 = vadd.f32 %v7568_v29, %v3646_v9  ;;  %v7298_v33 = vld [vmem:[%s9635_s5] ss:$0 sm:$0xff]  ;;  %s9638_s5 = smov 120  }
 0x8c2   : > { %7973 = vmatpush3.bf16.msra.mxu0 %v8264_v27 }
 0x8c3   : > { %7983 = vmatprep.subr.mxu0 %v8539_v1 }
 0x8da   : > { %v7588_v0 = vpop.f32.mrf.mxu0  ;;  %v7610_v34 = vpop.f32.mrf.mxu1 }
 0x8dc   : > { %v7589_v2 = vpop.f32.mrf.mxu0  ;;  %v7611_v41 = vpop.f32.mrf.mxu1 }
 0x8dd   : > { %v7590_v57 = vadd.f32 %v7589_v2, %v7588_v0  ;;  %v7612_v61 = vadd.f32 %v7611_v41, %v7610_v34  ;;  %v7299_v34 = vld [vmem:[%s9636_s2] ss:$0 sm:$0xff]  ;;  %s9648_s2 = smov 16  }
 0x8de   : > { %v7591_v42 = vpop.f32.mrf.mxu0  ;;  %v7613_v43 = vpop.f32.mrf.mxu1 }
 0x8df   : > { %v3726_v60 = vadd.f32 %v7590_v57, %v3686_v31  ;;  %v8443_v57 = vld [vmem:[%s8846_s17] ss:$0 sm:$0xff]  ;;  %s9643_s17 = smov 64  }
 0x8e0   : > { %v7592_v45 = vpop.f32.mrf.mxu0  ;;  %v7614_v46 = vpop.f32.mrf.mxu1 }
 0x8e1   : > { %v3766_v3 = vadd.f32 %v7612_v61, %v3726_v60 }
 0x8fa   : > { %v7632_v48 = vpop.f32.mrf.mxu0 }
 0x8fb   : > { %v7654_v49 = vpop.f32.mrf.mxu1 }
 0x8fc   : > { %v7633_v50 = vpop.f32.mrf.mxu0 }
 0x8fd   : > { %v7655_v51 = vpop.f32.mrf.mxu1  ;;  %v7634_v62 = vadd.f32 %v7633_v50, %v7632_v48 }
 0x8fe   : > { %v7635_v12 = vpop.f32.mrf.mxu0  ;;  %v7656_v6 = vadd.f32 %v7655_v51, %v7654_v49 }
 0x8ff   : > { %v7657_v54 = vpop.f32.mrf.mxu1  ;;  %v3806_v35 = vadd.f32 %v7634_v62, %v3766_v3 }
 0x900   : > { %v7636_v55 = vpop.f32.mrf.mxu0 }
 0x901   : > { %v7658_v56 = vpop.f32.mrf.mxu1  ;;  %v3846_v11 = vadd.f32 %v7656_v6, %v3806_v35 }
 0x91a   : > { %v7676_v5 = vpop.f32.mrf.mxu0 }
 0x91b   : > { %v7698_v7 = vpop.f32.mrf.mxu1 }
 0x91c   : > { %v7677_v10 = vpop.f32.mrf.mxu0 }
 0x91d   : > { %v7678_v13 = vadd.f32 %v7677_v10, %v7676_v5  ;;  %v7699_v14 = vpop.f32.mrf.mxu1 }
 0x91e   : > { %v7679_v15 = vpop.f32.mrf.mxu0  ;;  %v7700_v17 = vadd.f32 %v7699_v14, %v7698_v7 }
 0x91f   : > { %v3886_v16 = vadd.f32 %v7678_v13, %v3846_v11  ;;  %v7701_v38 = vpop.f32.mrf.mxu1 }
 0x920   : > { %v7680_v18 = vpop.f32.mrf.mxu0 }
 0x921   : > { %v3926_v47 = vadd.f32 %v7700_v17, %v3886_v16  ;;  %v7702_v19 = vpop.f32.mrf.mxu1 }
 0x923   : > { %v3931_v20 = vadd.f32 %v3926_v47, %v8913_v23 }
 0x925   : > { %v3934_v21 = vsel %vm1110_vm3, %v3931_v20, 0.0 }
 0x926   : > { %3935 = vadd.xlane.f32.xlu0 %v3934_v21 }
 0x9af   : > { %v3936_v22 = vpop.xlane.xlu0 %3935 }
 0x9b0   : > { %v3937_v59 = vmul.f32 0.03125, %v3936_v22 }
 0x9b2   : > { %v3938_v24 = vsub.f32 %v3931_v20, %v3937_v59 }
 0x9b4   : > { %v3939_v25 = vmul.f32 %v3938_v24, %v3938_v24 }
 0x9b6   : > { %v3940_v63 = vsel %vm1110_vm3, %v3939_v25, 0.0 }
 0x9b7   : > { %3941 = vadd.xlane.f32.xlu0 %v3940_v63 }
 0xa40   : > { %v3942_v23 = vpop.xlane.xlu0 %3941 }
 0xa41   : > { %v3943_v28 = vmul.f32 0.03125, %v3942_v23 }
 0xa43   : > { %v3944_v29 = vadd.f32 1e-05, %v3943_v28 }
 0xa45   : > { %8417 = vrsqrt.f32 %v3944_v29 }
 0xa52   : > { %v8418_v32 = vpop.eup %8417 }
 0xa53   : > { %v3946_v9 = vmul.f32 %v8418_v32, %v3938_v24 }
 0xa55   : > { %v3953_v30 = vmul.f32 %v7297_v8, %v3946_v9 }
 0xa57   : > { %v9189_v31 = vadd.f32 %v7298_v33, %v3953_v30 }
 0xa59   : > { %v3961_v0 = vpack.c.bf16 %v9189_v31, %v9189_v31 }
 0xa5b   : > { %7975 = vmatmul.mubr.msk.bf16.vlgmr.msra.gmra.mxu0 %vm1110_vm3, %v3961_v0 }
 0xa5c   : > { %7985 = vmatprep.mubr.msk.f32.mxu0 %vm8540_vm1, %v8539_v1 }
 0xb1b   : > { %v4022_v2 = vpop.f32.mrf.mxu0 }
 0xb1c   : > { %v4023_v41 = vadd.f32 %v7299_v34, %v4022_v2 }
 0xb1d   : > { %v7976_v42 = vpop.f32.mrf.mxu0 }
 0xb1e   : > { %4197 = vrot.lane.b32.xlu0 %v4023_v41, %s8543_s22  ;;  %4030 = vrot.lane.b32.xlu1 %v4023_v41, %s9637_s23  ;;  %v4028_v45 = vmul.f32 0.35355338, %v4023_v41  ;;  %s9647_s22 = smov 8   ;;  %s9649_s23 = sld [smem:[#allocation20_spill]] }
 0xb1f   : > { %v4025_v43 = vpop.f32.mrf.mxu0 }
 0xb21   : > { %v7977_v46 = vpop.f32.mrf.mxu0 }
 0xb22   : > { %4365 = vrot.lane.b32.xlu0 %v4028_v45, %s8545_s13  ;;  %4195 = vrot.lane.b32.xlu1 %v4028_v45, %s9638_s5  ;;  %s9642_s13 = smov 56   ;;  %s9650_s5 = smov 24  }
 0xb26   : > { %4535 = vrot.lane.b32.xlu0 %v4028_v45, %s9639_s3  ;;  %4367 = vrot.lane.b32.xlu1 %v4023_v41, %s9640_s6  ;;  %s9644_s3 = smov 40   ;;  %s9646_s6 = sld [smem:[#allocation19_spill]] }
 0xb2a   : > { %4537 = vrot.lane.b32.xlu1 %v4023_v41, %s9641_s8  ;;  %s9645_s8 = smov 48  }
 0xb90   : > { %v4031_v48 = vpop.permute.xlu1 %4030  ;;  %v4198_v49 = vpop.permute.xlu0 %4197 }
 0xb91   : > { %7979 = vmatpush3.xpose.msk.msra.mxu1 %vm1164_vm4, %v4031_v48 }
 0xb92   : > { %7988 = vmatprep.subr.mxu1 %v8539_v1 }
 0xb94   : > { %v4196_v50 = vpop.permute.xlu1 %4195  ;;  %7981 = vmatmul.mubr.msk.f32.vlgmr.msra.gmra.mxu1 %vm1164_vm4, %v4028_v45  ;;  %v4366_v12 = vpop.permute.xlu0 %4365 }
 0xb95   : > { %7989 = vmatpush3.xpose.msk.msra.mxu1 %vm1164_vm4, %v4198_v49  ;;  %7990 = vmatprep.mubr.msk.f32.mxu1 %vm8540_vm1, %v8539_v1 }
 0xb96   : > { %7998 = vmatprep.subr.mxu1 %v8539_v1 }
 0xb98   : > { %v4368_v51 = vpop.permute.xlu1 %4367  ;;  %7991 = vmatmul.mubr.msk.f32.vlgmr.msra.gmra.mxu1 %vm1164_vm4, %v4196_v50  ;;  %v4536_v55 = vpop.permute.xlu0 %4535 }
 0xb99   : > { %7999 = vmatpush3.xpose.msk.msra.mxu1 %vm1164_vm4, %v4368_v51  ;;  %8000 = vmatprep.mubr.msk.f32.mxu1 %vm8540_vm1, %v8539_v1 }
 0xb9a   : > { %8008 = vmatprep.subr.mxu1 %v8539_v1 }
 0xb9c   : > { %v4538_v54 = vpop.permute.xlu1 %4537  ;;  %8001 = vmatmul.mubr.msk.f32.vlgmr.msra.gmra.mxu1 %vm1164_vm4, %v4366_v12 }
 0xb9d   : > { %8009 = vmatpush3.xpose.msk.msra.mxu1 %vm1164_vm4, %v4538_v54  ;;  %8010 = vmatprep.mubr.msk.f32.mxu1 %vm8540_vm1, %v8539_v1 }
 0xb9e   : > { %8018 = vmatprep.subr.bf16.mxu1 %v8539_v1 }
 0xba0   : > { %8011 = vmatmul.mubr.msk.f32.vlgmr.msra.gmra.mxu1 %vm1164_vm4, %v4536_v55 }
 0xba1   : > { %8022 = vmatprep.mubr.msk.bf16.mxu1 %vm8540_vm1, %v8539_v1 }
 0xc54   : > { %v4103_v56 = vpop.f32.mrf.mxu1 }
 0xc55   : > { %v4104_v60 = vadd.f32 %v8443_v57, %v4103_v56 }
 0xc56   : > { %v7982_v61 = vpop.f32.mrf.mxu1 }
 0xc57   : > { %v4107_v62 = vsel %vm1164_vm4, %v4104_v60, -inf }
 0xc58   : > { %4108 = vmax.xlane.f32.xlu1 %v4107_v62  ;;  %v4269_v3 = vpop.f32.mrf.mxu1  ;;  %v8265_v62 = vld [vmem:[%s9646_s6 + $0x8] sm:$0xff]  }
 0xc59   : > { %v4270_v35 = vadd.f32 %v8443_v57, %v4269_v3  ;;  %8019 = vmatpush3.bf16.msra.mxu1 %v8265_v62  ;;  %v8266_v3 = vld [vmem:[%s9646_s6] sm:$0xff]  }
 0xc5a   : > { %v7992_v5 = vpop.f32.mrf.mxu1  ;;  %8020 = vmatprep.subr.bf16.mxu1 %v8539_v1 }
 0xc5b   : > { %v4273_v6 = vsel %vm1164_vm4, %v4270_v35, -inf }
 0xc5c   : > { %4274 = vmax.xlane.f32.xlu0 %v4273_v6  ;;  %v4439_v7 = vpop.f32.mrf.mxu1 }
 0xc5d   : > { %v4440_v10 = vadd.f32 %v8443_v57, %v4439_v7  ;;  %8021 = vmatpush3.bf16.msra.mxu1 %v8266_v3 }
 0xc5e   : > { %v8002_v11 = vpop.f32.mrf.mxu1 }
 0xc5f   : > { %v4443_v13 = vsel %vm1164_vm4, %v4440_v10, -inf }
 0xc60   : > { %4444 = vmax.xlane.f32.xlu0 %v4443_v13  ;;  %v4609_v14 = vpop.f32.mrf.mxu1 }
 0xc61   : > { %v4610_v16 = vadd.f32 %v8443_v57, %v4609_v14 }
 0xc62   : > { %v8012_v15 = vpop.f32.mrf.mxu1 }
 0xc63   : > { %v4613_v17 = vsel %vm1164_vm4, %v4610_v16, -inf }
 0xc69   : > { %4282 = vrot.lane.b32.xlu1 %v4023_v41, %s9642_s13  ;;  %s9651_s13 = sld [smem:[#allocation23_spill]] }
 0xc76   : > { %4116 = vrot.lane.b32.xlu0 %v4023_v41, %s9643_s17  ;;  %s9652_s17 = sld [smem:[#allocation21_spill]] }
 0xc7a   : > { %4622 = vrot.lane.b32.xlu0 %v4023_v41, %s9644_s3  ;;  %s9653_s3 = sld [smem:[#allocation22_spill]] }
 0xc80   : > { %v7320_v62 = vld [vmem:[%s9653_s3] ss:$0 sm:$0xff]  ;;  %s1014_s3 = sand.u32 1, %s8496_s10  }
 0xc81   : > { %s6983_s9 = scalar_lea.sflag [#allocation4], %s1014_s3 }
 0xc8d   : > { %4614 = vmax.xlane.f32.xlu1 %v4613_v17 }
 0xc9e   : > { %4452 = vrot.lane.b32.xlu1 %v4023_v41, %s9645_s8  ;;  %s9654_s8 = sld [smem:[#allocation25_spill]] }
 0xce1   : > { %v4109_v38 = vpop.xlane.xlu1 %4108 }
 0xce2   : > { %v4110_v18 = vsub.f32 %v4104_v60, %v4109_v38 }
 0xce4   : > { %v4111_v47 = vmul.f32 1.442695, %v4110_v18 }
 0xce5   : > { %v4275_v19 = vpop.xlane.xlu0 %4274  ;;  %v4283_v26 = vpop.permute.xlu1 %4282 }
 0xce6   : > { %8419 = vpow2.f32 %v4111_v47  ;;  %v4276_v20 = vsub.f32 %v4270_v35, %v4275_v19 }
 0xce8   : > { %v4277_v21 = vmul.f32 1.442695, %v4276_v20 }
 0xce9   : > { %v4445_v22 = vpop.xlane.xlu0 %4444 }
 0xcea   : > { %8421 = vpow2.f32 %v4277_v21  ;;  %v4446_v59 = vsub.f32 %v4440_v10, %v4445_v22 }
 0xcec   : > { %v4447_v24 = vmul.f32 1.442695, %v4446_v59 }
 0xced   : > { %v4117_v25 = vpop.permute.xlu0 %4116 }
 0xcee   : > { %8423 = vpow2.f32 %v4447_v24  ;;  %7984 = vmatpush3.msra.mxu0 %v4117_v25 }
 0xcef   : > { %7993 = vmatprep.subr.mxu0 %v8539_v1 }
 0xcf1   : > { %v4623_v0 = vpop.permute.xlu0 %4622 }
 0xcf3   : > { %v8420_v63 = vpop.eup %8419 }
 0xcf4   : > { %7986 = vmatmul.mubr.msk.f32.vlgmr.msra.gmra.mxu0 %vm1164_vm4, %v8420_v63  ;;  %v4113_v32 = vsel %vm1164_vm4, %v8420_v63, 0.0 }
 0xcf5   : > { %7994 = vmatpush3.msra.mxu0 %v4283_v26  ;;  %7995 = vmatprep.mubr.msk.f32.mxu0 %vm8540_vm1, %v8539_v1  ;;  %v4820_v26 = vld [vmem:[%s9651_s13 + $0x80] sm:$0xff] }
 0xcf6   : > { %8003 = vmatprep.subr.mxu0 %v8539_v1 }
 0xcf7   : > { %v8422_v27 = vpop.eup %8421 }
 0xcf8   : > { %7996 = vmatmul.mubr.msk.f32.vlgmr.msra.gmra.mxu0 %vm1164_vm4, %v8422_v27  ;;  %v4279_v23 = vsel %vm1164_vm4, %v8422_v27, 0.0  ;;  %v4828_v27 = vld [vmem:[%s9651_s13 + $0xc0] sm:$0xff] }
 0xcf9   : > { %4280 = vadd.xlane.f32.xlu1 %v4279_v23  ;;  %8005 = vmatprep.mubr.msk.f32.mxu0 %vm8540_vm1, %v8539_v1  ;;  %v4821_v23 = vld [vmem:[%s9651_s13 + $0x88] sm:$0xff] }
 0xcfb   : > { %v8424_v28 = vpop.eup %8423 }
 0xcfc   : > { %v4449_v29 = vsel %vm1164_vm4, %v8424_v28, 0.0 }
 0xcfd   : > { %4450 = vadd.xlane.f32.xlu0 %v4449_v29  ;;  %4114 = vadd.xlane.f32.xlu1 %v4113_v32  ;;  %v7337_v29 = vcombine.low %v4820_v26, %v4828_v27 }
 0xd16   : > { %v4615_v8 = vpop.xlane.xlu1 %4614 }
 0xd17   : > { %v4616_v9 = vsub.f32 %v4610_v16, %v4615_v8  ;;  %v7315_v16 = vld [vmem:[%s9649_s23] ss:$0 sm:$0xff]  ;;  %s9657_s23 = sld [smem:[#allocation29_spill]] }
 0xd19   : > { %v4617_v33 = vmul.f32 1.442695, %v4616_v9  ;;  %v4804_v9 = vld [vmem:[%s9651_s13] sm:$0xff] }
 0xd1a   : > { %v4453_v30 = vpop.permute.xlu1 %4452 }
 0xd1b   : > { %8425 = vpow2.f32 %v4617_v33  ;;  %8004 = vmatpush3.msra.mxu0 %v4453_v30  ;;  %v4812_v33 = vld [vmem:[%s9651_s13 + $0x40] sm:$0xff]  ;;  %v4805_v30 = vld [vmem:[%s9651_s13 + $0x8] sm:$0xff] }
 0xd1c   : > { %8006 = vmatmul.mubr.msk.f32.vlgmr.msra.gmra.mxu0 %vm1164_vm4, %v8424_v28  ;;  %8013 = vmatprep.subr.mxu0 %v8539_v1  ;;  %v4829_v28 = vld [vmem:[%s9651_s13 + $0xc8] sm:$0xff] }
 0xd1d   : > { %8014 = vmatpush3.msra.mxu0 %v4623_v0  ;;  %8015 = vmatprep.mubr.msk.f32.mxu0 %vm8540_vm1, %v8539_v1  ;;  %v7339_v32 = vcombine.low %v4821_v23, %v4829_v28  ;;  %v7340_v8 = vcombine.high %v4821_v23, %v4829_v28  ;;  %v7322_v0 = vcombine.high %v4804_v9, %v4812_v33  ;;  %v4826_v23 = vld [vmem:[%s9651_s13 + $0xb0] sm:$0xff]  ;;  %v4827_v28 = vld [vmem:[%s9651_s13 + $0xb8] sm:$0xff] }
 0xd1f   : > { %5136 = vmatprep.subr.bf16.mxu1 %v7340_v8 }
 0xd28   : > { %v8426_v34 = vpop.eup %8425 }
 0xd29   : > { %8016 = vmatmul.mubr.msk.f32.vlgmr.msra.gmra.mxu0 %vm1164_vm4, %v8426_v34  ;;  %v4619_v2 = vsel %vm1164_vm4, %v8426_v34, 0.0  ;;  %v4813_v34 = vld [vmem:[%s9651_s13 + $0x48] sm:$0xff] }
 0xd2a   : > { %4620 = vadd.xlane.f32.xlu0 %v4619_v2  ;;  %5115 = vmatprep.mubr.bf16.mxu0 %v8555_v4  ;;  %v7321_v2 = vcombine.low %v4804_v9, %v4812_v33 }
 0xd82   : > { %v4281_v41 = vpop.xlane.xlu1 %4280 }
 0xd86   : > { %v4115_v42 = vpop.xlane.xlu1 %4114  ;;  %v4451_v54 = vpop.xlane.xlu0 %4450 }
 0xd87   : > { %8427 = vrcp.f32 %v4115_v42  ;;  %v7324_v42 = vcombine.high %v4805_v30, %v4813_v34 }
 0xd88   : > { %8429 = vrcp.f32 %v4281_v41  ;;  %v7323_v41 = vcombine.low %v4805_v30, %v4813_v34  ;;  %v4810_v30 = vld [vmem:[%s9651_s13 + $0x30] sm:$0xff]  ;;  %v4811_v34 = vld [vmem:[%s9651_s13 + $0x38] sm:$0xff] }
 0xd89   : > { %8431 = vrcp.f32 %v4451_v54 }
 0xd94   : > { %v8428_v43 = vpop.eup %8427 }
 0xd95   : > { %v8430_v49 = vpop.eup %8429 }
 0xd96   : > { %v8432_v56 = vpop.eup %8431 }
 0xdb3   : > { %v4621_v55 = vpop.xlane.xlu0 %4620 }
 0xdb4   : > { %v4188_v45 = vpop.f32.mrf.mxu0  ;;  %8433 = vrcp.f32 %v4621_v55 }
 0xdb5   : > { %v4193_v46 = vmul.f32 %v8428_v43, %v4188_v45  ;;  %v4822_v43 = vld [vmem:[%s9651_s13 + $0x90] sm:$0xff] }
 0xdb6   : > { %v7987_v48 = vpop.f32.mrf.mxu0  ;;  %v4830_v45 = vld [vmem:[%s9651_s13 + $0xd0] sm:$0xff] }
 0xdb7   : > { %4194 = vst.msk [vmem:[#allocation2] sm:$0xff] %vm1164_vm4, %v4193_v46  ;;  %v4823_v46 = vld [vmem:[%s9651_s13 + $0x98] sm:$0xff]  ;;  %v7341_v48 = vcombine.low %v4822_v43, %v4830_v45 }
 0xdb8   : > { %v4354_v50 = vpop.f32.mrf.mxu0 }
 0xdb9   : > { %v4359_v51 = vmul.f32 %v8430_v49, %v4354_v50  ;;  %v7342_v49 = vcombine.high %v4822_v43, %v4830_v45  ;;  %v4831_v50 = vld [vmem:[%s9651_s13 + $0xd8] sm:$0xff] }
 0xdba   : > { %v7997_v12 = vpop.f32.mrf.mxu0 }
 0xdbb   : > { %4361 = vrot.lane.b32.xlu0 %v4359_v51, %s9647_s22  ;;  %v7343_v51 = vcombine.low %v4823_v46, %v4831_v50  ;;  %v7344_v12 = vcombine.high %v4823_v46, %v4831_v50  ;;  %v8268_v50 = vld [vmem:[%s9654_s8 + $0xf8] sm:$0xff]   ;;  %s9655_s22 = sld [smem:[#allocation24_spill]] }
 0xdc1   : > { %v8434_v35 = vpop.eup %8433 }
 0xddc   : > { %v4524_v57 = vpop.f32.mrf.mxu0 }
 0xddd   : > { %v4529_v60 = vmul.f32 %v8432_v56, %v4524_v57 }
 0xdde   : > { %v8007_v61 = vpop.f32.mrf.mxu0 }
 0xddf   : > { %4531 = vrot.lane.b32.xlu1 %v4529_v60, %s9648_s2  ;;  %v7319_v60 = vld [vmem:[%s9652_s17] ss:$0 sm:$0xff]  ;;  %s9656_s2 = sld [smem:[#allocation26_spill]] }
 0xde0   : > { %s9659_s17 = sld [smem:[#allocation28_spill]] }
 0xde9   : > { %v4694_v5 = vpop.f32.mrf.mxu0 }
 0xdea   : > { %v4699_v6 = vmul.f32 %v8434_v35, %v4694_v5  ;;  %v4806_v35 = vld [vmem:[%s9651_s13 + $0x10] sm:$0xff] }
 0xdeb   : > { %v8017_v7 = vpop.f32.mrf.mxu0  ;;  %v4814_v5 = vld [vmem:[%s9651_s13 + $0x50] sm:$0xff] }
 0xdec   : > { %4701 = vrot.lane.b32.xlu1 %v4699_v6, %s9650_s5  ;;  %v4807_v6 = vld [vmem:[%s9651_s13 + $0x18] sm:$0xff]  ;;  %s9658_s5 = sld [smem:[#allocation27_spill]] }
 0xded   : > { %v4815_v7 = vld [vmem:[%s9651_s13 + $0x58] sm:$0xff] }
 0xe2d   : > { %v4362_v10 = vpop.permute.xlu0 %4361 }
 0xe2e   : > { %4364 = vst.msk [vmem:[#allocation2] sm:$0xff] %vm1497_vm5, %v4362_v10 }
 0xe51   : > { %v4532_v11 = vpop.permute.xlu1 %4531 }
 0xe52   : > { %4534 = vst.msk [vmem:[#allocation2] sm:$0xff] %vm1668_vm6, %v4532_v11 }
 0xe5e   : > { %v4702_v13 = vpop.permute.xlu1 %4701 }
 0xe5f   : > { %4704 = vst.msk [vmem:[#allocation2] sm:$0xff] %vm1839_vm7, %v4702_v13  ;;  %v7326_v13 = vcombine.high %v4806_v35, %v4814_v5 }
 0xe66   : > { %v4705_v14 = vld [vmem:[#allocation2] sm:$0xff] }
 0xe67   : > { %v4706_v15 = vpack.c.bf16 %v4705_v14, %v4705_v14  ;;  %v7328_v14 = vcombine.high %v4807_v6, %v4815_v7 }
 0xe69   : > { %8023 = vmatmul.mubr.msk.bf16.vlgmr.msra.gmra.mxu1 %vm1110_vm3, %v4706_v15  ;;  %v4824_v15 = vld [vmem:[%s9651_s13 + $0xa0] sm:$0xff] }
 0xe6a   : > { %5156 = vmatprep.mubr.bf16.mxu1 %v8555_v4  ;;  %5137 = vmatpush1.bf16.msra.mxu1 %v7339_v32 }
 0xe6b   : > { %5138 = vmatprep.subr.bf16.mxu1 %v7324_v42 }
 0xe6e   : > { %5139 = vmatpush1.bf16.msra.mxu1 %v7323_v41 }
 0xe6f   : > { %5218 = vmatprep.subr.bf16.mxu1 %v7344_v12  ;;  %v8270_v12 = vld [vmem:[%s9654_s8 + $0xb8] sm:$0xff]  }
 0xf29   : > { %v4767_v17 = vpop.f32.mrf.mxu1 }
 0xf2a   : > { %v4768_v38 = vadd.f32 %v7315_v16, %v4767_v17  ;;  %v4832_v16 = vld [vmem:[%s9651_s13 + $0xe0] sm:$0xff]  ;;  %v4825_v17 = vld [vmem:[%s9651_s13 + $0xa8] sm:$0xff] }
 0xf2b   : > { %v8024_v18 = vpop.f32.mrf.mxu1 }
 0xf2c   : > { %v4773_v47 = vadd.f32 %v4768_v38, %v9189_v31  ;;  %v7338_v31 = vcombine.high %v4820_v26, %v4828_v27  ;;  %v4833_v38 = vld [vmem:[%s9651_s13 + $0xe8] sm:$0xff]  ;;  %v7325_v18 = vcombine.low %v4806_v35, %v4814_v5  ;;  %v8280_v35 = vld [vmem:[%s9654_s8 + $0xe0] sm:$0xff]  }
 0xf2d   : > { %v4770_v19 = vpop.f32.mrf.mxu1  ;;  %v8281_v5 = vld [vmem:[%s9654_s8 + $0x20] sm:$0xff]  }
 0xf2e   : > { %v4776_v20 = vsel %vm1110_vm3, %v4773_v47, 0.0  ;;  %5095 = vmatprep.subr.bf16.mxu0 %v7338_v31  ;;  %v7346_v19 = vcombine.high %v4824_v15, %v4832_v16  ;;  %v4834_v31 = vld [vmem:[%s9651_s13 + $0xf0] sm:$0xff] }
 0xf2f   : > { %4777 = vadd.xlane.f32.xlu0 %v4776_v20  ;;  %v8025_v21 = vpop.f32.mrf.mxu1  ;;  %5096 = vmatpush1.bf16.msra.mxu0 %v7337_v29  ;;  %v7348_v20 = vcombine.high %v4825_v17, %v4833_v38  ;;  %v4835_v29 = vld [vmem:[%s9651_s13 + $0xf8] sm:$0xff]  ;;  %v7350_v9 = vcombine.high %v4826_v23, %v4834_v31  ;;  %v7349_v41 = vcombine.low %v4826_v23, %v4834_v31 }
 0xf30   : > { %5097 = vmatprep.subr.bf16.mxu0 %v7322_v0  ;;  %v4808_v21 = vld [vmem:[%s9651_s13 + $0x20] sm:$0xff]  ;;  %v7352_v33 = vcombine.high %v4827_v28, %v4835_v29  ;;  %v4818_v0 = vld [vmem:[%s9651_s13 + $0x70] sm:$0xff]  ;;  %v7351_v42 = vcombine.low %v4827_v28, %v4835_v29 }
 0xf31   : > { %v7334_v43 = vcombine.high %v4810_v30, %v4818_v0  ;;  %v7333_v46 = vcombine.low %v4810_v30, %v4818_v0 }
 0xf33   : > { %5098 = vmatpush1.bf16.msra.mxu0 %v7321_v2  ;;  %v4819_v2 = vld [vmem:[%s9651_s13 + $0x78] sm:$0xff] }
 0xf34   : > { %5177 = vmatprep.subr.bf16.mxu0 %v7342_v49  ;;  %v7336_v45 = vcombine.high %v4811_v34, %v4819_v2  ;;  %v8267_v49 = vld [vmem:[%s9654_s8 + $0x78] sm:$0xff]  }
 0xfb8   : > { %v4778_v22 = vpop.xlane.xlu0 %4777 }
 0xfb9   : > { %v4779_v59 = vmul.f32 0.03125, %v4778_v22  ;;  %v4816_v22 = vld [vmem:[%s9651_s13 + $0x60] sm:$0xff] }
 0xfba   : > { %v7330_v26 = vcombine.high %v4808_v21, %v4816_v22  ;;  %v7329_v32 = vcombine.low %v4808_v21, %v4816_v22  ;;  %v8295_v21 = vld [vmem:[%s9654_s8 + $0x40] sm:$0xff]  }
 0xfbb   : > { %v4780_v24 = vsub.f32 %v4773_v47, %v4779_v59  ;;  %v7327_v47 = vcombine.low %v4807_v6, %v4815_v7  ;;  %v4809_v59 = vld [vmem:[%s9651_s13 + $0x28] sm:$0xff]  ;;  %v8282_v6 = vld [vmem:[%s9654_s8 + $0xa0] sm:$0xff]   ;;  %v8283_v7 = vld [vmem:[%s9654_s8 + $0x58] sm:$0xff]  }
 0xfbc   : > { %v8296_v22 = vld [vmem:[%s9654_s8 + $0xc0] sm:$0xff]  }
 0xfbd   : > { %v4781_v25 = vmul.f32 %v4780_v24, %v4780_v24 }
 0xfbf   : > { %v4782_v63 = vsel %vm1110_vm3, %v4781_v25, 0.0  ;;  %v7345_v25 = vcombine.low %v4824_v15, %v4832_v16  ;;  %v8287_v15 = vld [vmem:[%s9654_s8 + $0x50] sm:$0xff]  }
 0xfc0   : > { %4783 = vadd.xlane.f32.xlu1 %v4782_v63  ;;  %v7347_v63 = vcombine.low %v4825_v17, %v4833_v38  ;;  %v8288_v16 = vld [vmem:[%s9654_s8 + $0xd0] sm:$0xff]  }
 0xfc1   : > { %v8289_v17 = vld [vmem:[%s9654_s8 + $0x10] sm:$0xff]  }
 0xfc2   : > { %v8290_v38 = vld [vmem:[%s9654_s8 + $0x90] sm:$0xff]  }
0x1049   : > { %v4784_v54 = vpop.xlane.xlu1 %4783 }
0x104a   : > { %v4785_v55 = vmul.f32 0.03125, %v4784_v54  ;;  %v8271_v54 = vld [vmem:[%s9654_s8 + $0x70] sm:$0xff]  }
0x104c   : > { %v4786_v56 = vadd.f32 1e-05, %v4785_v55  ;;  %v8272_v55 = vld [vmem:[%s9654_s8 + $0xf0] sm:$0xff]  }
0x104e   : > { %8435 = vrsqrt.f32 %v4786_v56  ;;  %v8274_v56 = vld [vmem:[%s9654_s8 + $0xb0] sm:$0xff]  }
0x105b   : > { %v8436_v57 = vpop.eup %8435 }
0x105c   : > { %v4788_v61 = vmul.f32 %v8436_v57, %v4780_v24  ;;  %v4817_v24 = vld [vmem:[%s9651_s13 + $0x68] sm:$0xff]  ;;  %s8556_s13 = smov [#allocation3]  }
0x105d   : > { %v7332_v27 = vcombine.high %v4809_v59, %v4817_v24  ;;  %v7331_v8 = vcombine.low %v4809_v59, %v4817_v24  ;;  %v8275_v57 = vld [vmem:[%s9654_s8 + $0x68] sm:$0xff]   ;;  %v8297_v59 = vld [vmem:[%s9654_s8] sm:$0xff]   ;;  %s8448_s14 = sshll.u32 %s8556_s13, 4  ;;  %s8449_s14 = int_to_ptr.vmem [resolvable:$false] %s8448_s14 }
0x105e   : > { %v4795_v3 = vmul.f32 %v7319_v60, %v4788_v61  ;;  %v8276_v60 = vld [vmem:[%s9654_s8 + $0xe8] sm:$0xff]   ;;  %v8298_v24 = vld [vmem:[%s9654_s8 + $0x80] sm:$0xff]   ;;  %s8450_s16 = scalar_lea.vmem %s8449_s14, 256 }
0x105f   : > { %v8277_v61 = vld [vmem:[%s9654_s8 + $0x28] sm:$0xff]  }
0x1060   : > { %v9285_v10 = vadd.f32 %v7320_v62, %v4795_v3  ;;  %v8278_v62 = vld [vmem:[%s9654_s8 + $0xa8] sm:$0xff]   ;;  %v8279_v3 = vld [vmem:[%s9654_s8 + $0x60] sm:$0xff]  }
0x1062   : > { %v9289_v11 = vpack.c.bf16 %v9285_v10, %v9285_v10 }
0x1064   : > { %7353 = vmatmul.mubr.msk.bf16.vlgmr.msra.gmra.mxu0 %vm1110_vm3, %v9289_v11  ;;  %7354 = vmatmul.mubr.msk.bf16.vlgmr.msra.gmra.mxu1 %vm1110_vm3, %v9289_v11 }
0x1065   : > { %5178 = vmatpush1.bf16.msra.mxu0 %v7341_v48  ;;  %5219 = vmatpush1.bf16.msra.mxu1 %v7343_v51  ;;  %v7335_v48 = vcombine.low %v4811_v34, %v4819_v2  ;;  %v8269_v51 = vld [vmem:[%s9654_s8 + $0x38] sm:$0xff]  }
0x1066   : > { %5179 = vmatprep.subr.bf16.mxu0 %v7326_v13  ;;  %5220 = vmatprep.subr.bf16.mxu1 %v7328_v14  ;;  %v8285_v13 = vld [vmem:[%s9654_s8 + $0x18] sm:$0xff]  }
0x1067   : > { %5197 = vmatprep.mubr.bf16.mxu0 %v8555_v4  ;;  %5238 = vmatprep.mubr.bf16.mxu1 %v8555_v4  ;;  %v8286_v14 = vld [vmem:[%s9654_s8 + $0x98] sm:$0xff]  }
0x1069   : > { %5180 = vmatpush1.bf16.msra.mxu0 %v7325_v18  ;;  %5221 = vmatpush1.bf16.msra.mxu1 %v7327_v47  ;;  %v8291_v18 = vld [vmem:[%s9654_s8 + $0x48] sm:$0xff]  }
0x106a   : > { %5259 = vmatprep.subr.bf16.mxu0 %v7346_v19  ;;  %5300 = vmatprep.subr.bf16.mxu1 %v7348_v20  ;;  %v8292_v47 = vld [vmem:[%s9654_s8 + $0xc8] sm:$0xff]  }
0x106b   : > { %v8293_v19 = vld [vmem:[%s9654_s8 + $0x8] sm:$0xff]  }
0x106c   : > { %7355 = vmatmul.mubr.msk.bf16.vlgmr.msra.gmra.mxu0 %vm1110_vm3, %v9289_v11  ;;  %7356 = vmatmul.mubr.msk.bf16.vlgmr.msra.gmra.mxu1 %vm1110_vm3, %v9289_v11  ;;  %v8294_v20 = vld [vmem:[%s9654_s8 + $0x88] sm:$0xff]  }
0x106d   : > { %5260 = vmatpush1.bf16.msra.mxu0 %v7345_v25  ;;  %5301 = vmatpush1.bf16.msra.mxu1 %v7347_v63  ;;  %v8299_v25 = vld [vmem:[%s9654_s8 + $0x178] sm:$0xff]  }
0x106e   : > { %5261 = vmatprep.subr.bf16.mxu0 %v7330_v26  ;;  %5302 = vmatprep.subr.bf16.mxu1 %v7332_v27  ;;  %v8300_v63 = vld [vmem:[%s9654_s8 + $0x1f8] sm:$0xff]   ;;  %v9364_v26 = vld [vmem:[%s9655_s22] sm:$0xff] }
0x106f   : > { %5279 = vmatprep.mubr.bf16.mxu0 %v8555_v4  ;;  %5320 = vmatprep.mubr.bf16.mxu1 %v8555_v4  ;;  %v4843_v27 = vrot.slane %v9364_v26, %v8994_v36  ;;  %v4851_v23 = vrot.slane %v9364_v26, %v8997_v37  ;;  %v4847_v31 = vrot.slane %v9364_v26, %v9003_v39 }
0x1070   : > { %v4855_v28 = vrot.slane %v9364_v26, %v9006_v40 }
0x1071   : > { %5262 = vmatpush1.bf16.msra.mxu0 %v7329_v32  ;;  %5303 = vmatpush1.bf16.msra.mxu1 %v7331_v8 }
0x1072   : > { %5341 = vmatprep.subr.bf16.mxu0 %v7350_v9  ;;  %5382 = vmatprep.subr.bf16.mxu1 %v7352_v33 }
0x1074   : > { %7357 = vmatmul.mubr.msk.bf16.vlgmr.msra.gmra.mxu0 %vm1110_vm3, %v9289_v11  ;;  %7358 = vmatmul.mubr.msk.bf16.vlgmr.msra.gmra.mxu1 %vm1110_vm3, %v9289_v11 }
0x1075   : > { %5342 = vmatpush1.bf16.msra.mxu0 %v7349_v41  ;;  %5383 = vmatpush1.bf16.msra.mxu1 %v7351_v42 }
0x1076   : > { %5343 = vmatprep.subr.bf16.mxu0 %v7334_v43  ;;  %5384 = vmatprep.subr.bf16.mxu1 %v7336_v45 }
0x1077   : > { %5361 = vmatprep.mubr.bf16.mxu0 %v8555_v4  ;;  %5402 = vmatprep.mubr.bf16.mxu1 %v8555_v4  ;;  %v8273_v4 = vld [vmem:[%s9654_s8 + $0x30] sm:$0xff]  }
0x1079   : > { %5344 = vmatpush1.bf16.msra.mxu0 %v7333_v46  ;;  %5385 = vmatpush1.bf16.msra.mxu1 %v7335_v48 }
0x107a   : > { %7726 = vmatprep.subr.bf16.mxu0 %v8267_v49  ;;  %7748 = vmatprep.subr.bf16.mxu1 %v8268_v50 }
0x107c   : > { %7359 = vmatmul.mubr.msk.bf16.vlgmr.msra.gmra.mxu0 %vm1110_vm3, %v9289_v11  ;;  %7360 = vmatmul.mubr.msk.bf16.vlgmr.msra.gmra.mxu1 %vm1110_vm3, %v9289_v11  ;;  %v8284_v11 = vld [vmem:[%s9654_s8 + $0xd8] sm:$0xff]  }
0x107d   : > { %7727 = vmatpush3.bf16.msra.mxu0 %v8269_v51  ;;  %7749 = vmatpush3.bf16.msra.mxu1 %v8270_v12  ;;  %v4863_v12 = vrot.slane %v9364_v26, %v9017_v52 }
0x107e   : > { %7728 = vmatprep.subr.bf16.mxu0 %v8271_v54  ;;  %7750 = vmatprep.subr.bf16.mxu1 %v8272_v55  ;;  %v4871_v54 = vrot.slane %v9364_v26, %v9020_v53  ;;  %v8301_v55 = vld [vmem:[%s9654_s8 + $0x138] sm:$0xff]  }
0x1081   : > { %7729 = vmatpush3.bf16.msra.mxu0 %v8273_v4  ;;  %7751 = vmatpush3.bf16.msra.mxu1 %v8274_v56  ;;  %v8302_v4 = vld [vmem:[%s9654_s8 + $0x1b8] sm:$0xff]  }
0x1082   : > { %7730 = vmatprep.subr.bf16.mxu0 %v8275_v57  ;;  %7752 = vmatprep.subr.bf16.mxu1 %v8276_v60 }
0x1085   : > { %7731 = vmatpush3.bf16.msra.mxu0 %v8277_v61  ;;  %7753 = vmatpush3.bf16.msra.mxu1 %v8278_v62  ;;  %v8303_v62 = vld [vmem:[%s9654_s8 + $0x170] sm:$0xff]  }
0x1086   : > { %7732 = vmatprep.subr.bf16.mxu0 %v8279_v3  ;;  %7754 = vmatprep.subr.bf16.mxu1 %v8280_v35  ;;  %v8304_v3 = vld [vmem:[%s9654_s8 + $0x1f0] sm:$0xff]  }
0x1089   : > { %7733 = vmatpush3.bf16.msra.mxu0 %v8281_v5  ;;  %7755 = vmatpush3.bf16.msra.mxu1 %v8282_v6 }
0x108a   : > { %7734 = vmatprep.subr.bf16.mxu0 %v8283_v7  ;;  %7756 = vmatprep.subr.bf16.mxu1 %v8284_v11  ;;  %v8305_v11 = vld [vmem:[%s9654_s8 + $0x130] sm:$0xff]  }
0x108d   : > { %7735 = vmatpush3.bf16.msra.mxu0 %v8285_v13  ;;  %7757 = vmatpush3.bf16.msra.mxu1 %v8286_v14  ;;  %v8306_v13 = vld [vmem:[%s9654_s8 + $0x1b0] sm:$0xff]  }
0x108e   : > { %7736 = vmatprep.subr.bf16.mxu0 %v8287_v15  ;;  %7758 = vmatprep.subr.bf16.mxu1 %v8288_v16  ;;  %v8307_v16 = vld [vmem:[%s9654_s8 + $0x168] sm:$0xff]  }
0x1091   : > { %7737 = vmatpush3.bf16.msra.mxu0 %v8289_v17  ;;  %7759 = vmatpush3.bf16.msra.mxu1 %v8290_v38  ;;  %v8308_v17 = vld [vmem:[%s9654_s8 + $0x1e8] sm:$0xff]  }
0x1092   : > { %7738 = vmatprep.subr.bf16.mxu0 %v8291_v18  ;;  %7760 = vmatprep.subr.bf16.mxu1 %v8292_v47 }
0x1095   : > { %7739 = vmatpush3.bf16.msra.mxu0 %v8293_v19  ;;  %7761 = vmatpush3.bf16.msra.mxu1 %v8294_v20 }
0x1096   : > { %7740 = vmatprep.subr.bf16.mxu0 %v8295_v21  ;;  %7762 = vmatprep.subr.bf16.mxu1 %v8296_v22  ;;  %v8309_v22 = vld [vmem:[%s9654_s8 + $0x128] sm:$0xff]  }
0x1099   : > { %7741 = vmatpush3.bf16.msra.mxu0 %v8297_v59  ;;  %7763 = vmatpush3.bf16.msra.mxu1 %v8298_v24  ;;  %v8310_v59 = vld [vmem:[%s9654_s8 + $0x1a8] sm:$0xff]  }
0x109a   : > { %7770 = vmatprep.subr.bf16.mxu0 %v8299_v25  ;;  %7792 = vmatprep.subr.bf16.mxu1 %v8300_v63  ;;  %v8311_v63 = vld [vmem:[%s9654_s8 + $0x160] sm:$0xff]  }
0x1124   : > { %v5117_v29 = vpop.f32.mrf.mxu0  ;;  %v5158_v32 = vpop.f32.mrf.mxu1 }
0x1125   : > { %v5118_v8 = vadd.f32 %v5117_v29, %v4843_v27  ;;  %v5159_v9 = vadd.f32 %v5158_v32, %v4851_v23  ;;  %v8312_v27 = vld [vmem:[%s9654_s8 + $0x1e0] sm:$0xff]   ;;  %v9401_v32 = vld [vmem:[%s9655_s22 + $0x8] sm:$0xff] }
0x1126   : > { %v5119_v33 = vpop.f32.mrf.mxu0  ;;  %v5160_v30 = vpop.f32.mrf.mxu1  ;;  %v8314_v29 = vld [vmem:[%s9654_s8 + $0x1a0] sm:$0xff]  }
0x1127   : > { %v5120_v0 = vadd.f32 %v5119_v33, %v4847_v31  ;;  %v5161_v34 = vadd.f32 %v5160_v30, %v4855_v28  ;;  %v5411_v2 = vmax.f32 %v5118_v8, 0.0  ;;  %v5413_v41 = vmax.f32 %v5159_v9, 0.0  ;;  %v8313_v28 = vld [vmem:[%s9654_s8 + $0x120] sm:$0xff]   ;;  %v8315_v33 = vld [vmem:[%s9654_s8 + $0x158] sm:$0xff]  }
0x1128   : > { %v5121_v42 = vpop.f32.mrf.mxu0  ;;  %v5162_v43 = vpop.f32.mrf.mxu1  ;;  %v8316_v30 = vld [vmem:[%s9654_s8 + $0x1d8] sm:$0xff]  }
0x1129   : > { %v5412_v45 = vmax.f32 %v5120_v0, 0.0  ;;  %v5414_v46 = vmax.f32 %v5161_v34, 0.0  ;;  %v5427_v56 = vpack.c.bf16 %v5411_v2, %v5411_v2  ;;  %v5429_v57 = vpack.c.bf16 %v5413_v41, %v5413_v41  ;;  %v8317_v41 = vld [vmem:[%s9654_s8 + $0x118] sm:$0xff]  }
0x112a   : > { %v5122_v48 = vpop.f32.mrf.mxu0  ;;  %v5163_v49 = vpop.f32.mrf.mxu1  ;;  %v4899_v0 = vrot.slane %v9401_v32, %v9047_v44  ;;  %v8318_v42 = vld [vmem:[%s9654_s8 + $0x198] sm:$0xff]  }
0x112b   : > { %v5428_v50 = vpack.c.bf16 %v5412_v45, %v5412_v45  ;;  %v5430_v51 = vpack.c.bf16 %v5414_v46, %v5414_v46  ;;  %v8319_v46 = vld [vmem:[%s9654_s8 + $0x150] sm:$0xff]  }
0x112c   : > { %v9380_v60 = vpop.f32.mrf.mxu0  ;;  %v9382_v61 = vpop.f32.mrf.mxu1  ;;  %v8320_v48 = vld [vmem:[%s9654_s8 + $0x1d0] sm:$0xff]  }
0x112d   : > { %6506 = vmatprep.mubr.bf16.mxu0 %v5428_v50  ;;  %6546 = vmatprep.mubr.bf16.mxu1 %v5430_v51 }
0x112e   : > { %v5201_v35 = vpop.f32.mrf.mxu0  ;;  %v5242_v5 = vpop.f32.mrf.mxu1  ;;  %6507 = vmatmul.mubr.bf16.vlgmr.msra.gmra.mxu0 %v5427_v56  ;;  %6547 = vmatmul.mubr.bf16.vlgmr.msra.gmra.mxu1 %v5429_v57 }
0x112f   : > { %v5202_v6 = vadd.f32 %v5201_v35, %v4863_v12  ;;  %v5243_v7 = vadd.f32 %v5242_v5, %v4871_v54  ;;  %7771 = vmatpush3.bf16.msra.mxu0 %v8301_v55  ;;  %7793 = vmatpush3.bf16.msra.mxu1 %v8302_v4  ;;  %v8321_v12 = vld [vmem:[%s9654_s8 + $0x110] sm:$0xff]   ;;  %v4859_v55 = vrot.slane %v9364_v26, %v9061_v58 }
0x1130   : > { %v5203_v14 = vpop.f32.mrf.mxu0  ;;  %v5244_v15 = vpop.f32.mrf.mxu1  ;;  %7772 = vmatprep.subr.bf16.mxu0 %v8303_v62  ;;  %7794 = vmatprep.subr.bf16.mxu1 %v8304_v3  ;;  %v8322_v54 = vld [vmem:[%s9654_s8 + $0x190] sm:$0xff]   ;;  %v4867_v4 = vrot.slane %v9364_v26, %v9047_v44  ;;  %v8323_v62 = vld [vmem:[%s9654_s8 + $0x148] sm:$0xff]   ;;  %v4879_v35 = vrot.slane %v9401_v32, %v9003_v39  ;;  %v4887_v5 = vrot.slane %v9401_v32, %v9006_v40  ;;  %v8327_v39 = vld [vmem:[%s9654_s8 + $0x140] sm:$0xff]  }
0x1131   : > { %v5416_v38 = vmax.f32 %v5202_v6, 0.0  ;;  %v5418_v18 = vmax.f32 %v5243_v7, 0.0  ;;  %v8324_v3 = vld [vmem:[%s9654_s8 + $0x1c8] sm:$0xff]   ;;  %v8328_v14 = vld [vmem:[%s9654_s8 + $0x1c0] sm:$0xff]  }
0x1132   : > { %v5204_v47 = vpop.f32.mrf.mxu0  ;;  %v5245_v19 = vpop.f32.mrf.mxu1  ;;  %v8325_v44 = vld [vmem:[%s9654_s8 + $0x108] sm:$0xff]  }
0x1133   : > { %v5432_v20 = vpack.c.bf16 %v5416_v38, %v5416_v38  ;;  %v5434_v21 = vpack.c.bf16 %v5418_v18, %v5418_v18  ;;  %7773 = vmatpush3.bf16.msra.mxu0 %v8305_v11  ;;  %7795 = vmatpush3.bf16.msra.mxu1 %v8306_v13  ;;  %v8326_v26 = vld [vmem:[%s9654_s8 + $0x188] sm:$0xff]   ;;  %v5200_v11 = vadd.f32 %v9380_v60, %v4859_v55  ;;  %v8331_v60 = vld [vmem:[%s9654_s8 + $0x278] sm:$0xff]   ;;  %v8353_v55 = vld [vmem:[%s9654_s8 + $0x210] sm:$0xff]  }
0x1134   : > { %v9392_v24 = vpop.f32.mrf.mxu0  ;;  %v9394_v25 = vpop.f32.mrf.mxu1  ;;  %7774 = vmatprep.subr.bf16.mxu0 %v8307_v16  ;;  %7796 = vmatprep.subr.bf16.mxu1 %v8308_v17  ;;  %v5241_v13 = vadd.f32 %v9382_v61, %v4867_v4  ;;  %v8329_v16 = vld [vmem:[%s9654_s8 + $0x100] sm:$0xff]   ;;  %v8332_v61 = vld [vmem:[%s9654_s8 + $0x2f8] sm:$0xff]   ;;  %v4875_v4 = vrot.slane %v9401_v32, %v8994_v36  ;;  %v8357_v36 = vld [vmem:[%s9654_s8 + $0x208] sm:$0xff]  }
0x1135   : > { %6586 = vmatprep.mubr.bf16.mxu0 %v5432_v20  ;;  %6626 = vmatprep.mubr.bf16.mxu1 %v5434_v21  ;;  %v8330_v17 = vld [vmem:[%s9654_s8 + $0x180] sm:$0xff]   ;;  %v5415_v38 = vmax.f32 %v5200_v11, 0.0  ;;  %v8333_v20 = vld [vmem:[%s9654_s8 + $0x238] sm:$0xff]  }
0x1136   : > { %v5283_v23 = vpop.f32.mrf.mxu0  ;;  %v5324_v31 = vpop.f32.mrf.mxu1  ;;  %v5417_v18 = vmax.f32 %v5241_v13, 0.0  ;;  %v8361_v11 = vld [vmem:[%s9654_s8 + $0x200] sm:$0xff]  }
0x1137   : > { %7775 = vmatpush3.bf16.msra.mxu0 %v8309_v22  ;;  %7797 = vmatpush3.bf16.msra.mxu1 %v8310_v59  ;;  %v5284_v15 = vadd.f32 %v5283_v23, %v4879_v35  ;;  %v5325_v40 = vadd.f32 %v5324_v31, %v4887_v5  ;;  %v5431_v21 = vpack.c.bf16 %v5415_v38, %v5415_v38  ;;  %v8334_v59 = vld [vmem:[%s9654_s8 + $0x2b8] sm:$0xff]   ;;  %v8336_v23 = vld [vmem:[%s9654_s8 + $0x2f0] sm:$0xff]  }
0x1138   : > { %v5285_v8 = vpop.f32.mrf.mxu0  ;;  %v5326_v9 = vpop.f32.mrf.mxu1  ;;  %7776 = vmatprep.subr.bf16.mxu0 %v8311_v63  ;;  %7798 = vmatprep.subr.bf16.mxu1 %v8312_v27  ;;  %v5433_v22 = vpack.c.bf16 %v5417_v18, %v5417_v18  ;;  %v8335_v27 = vld [vmem:[%s9654_s8 + $0x270] sm:$0xff]   ;;  %v4895_v35 = vrot.slane %v9401_v32, %v9017_v52  ;;  %v4903_v5 = vrot.slane %v9401_v32, %v9020_v53 }
0x1139   : > { %v5420_v47 = vmax.f32 %v5284_v15, 0.0  ;;  %v5422_v19 = vmax.f32 %v5325_v40, 0.0  ;;  %v8339_v8 = vld [vmem:[%s9654_s8 + $0x268] sm:$0xff]   ;;  %v8367_v38 = vld [vmem:[%s9654_s8 + $0x370] sm:$0xff]  }
0x113a   : > { %v5286_v34 = vpop.f32.mrf.mxu0  ;;  %v5327_v2 = vpop.f32.mrf.mxu1  ;;  %v8340_v9 = vld [vmem:[%s9654_s8 + $0x2e8] sm:$0xff]  }
0x113b   : > { %7777 = vmatpush3.bf16.msra.mxu0 %v8313_v28  ;;  %7799 = vmatpush3.bf16.msra.mxu1 %v8314_v29  ;;  %v5436_v63 = vpack.c.bf16 %v5420_v47, %v5420_v47  ;;  %v5438_v31 = vpack.c.bf16 %v5422_v19, %v5422_v19  ;;  %v8337_v28 = vld [vmem:[%s9654_s8 + $0x230] sm:$0xff]   ;;  %v8344_v34 = vld [vmem:[%s9654_s8 + $0x2e0] sm:$0xff]  }
0x113c   : > { %v9409_v43 = vpop.f32.mrf.mxu0  ;;  %v5404_v45 = vpop.f32.mrf.mxu1  ;;  %7778 = vmatprep.subr.bf16.mxu0 %v8315_v33  ;;  %7800 = vmatprep.subr.bf16.mxu1 %v8316_v30  ;;  %v8338_v29 = vld [vmem:[%s9654_s8 + $0x2b0] sm:$0xff]   ;;  %v8341_v33 = vld [vmem:[%s9654_s8 + $0x228] sm:$0xff]   ;;  %v8345_v2 = vld [vmem:[%s9654_s8 + $0x220] sm:$0xff]  }
0x113d   : > { %v9413_v49 = vadd.f32 %v5404_v45, %v4899_v0  ;;  %v8342_v30 = vld [vmem:[%s9654_s8 + $0x2a8] sm:$0xff]   ;;  %v8343_v0 = vld [vmem:[%s9654_s8 + $0x260] sm:$0xff]   ;;  %v8348_v45 = vld [vmem:[%s9654_s8 + $0x2d8] sm:$0xff]  }
0x113e   : > { %v9415_v50 = vpop.f32.mrf.mxu0  ;;  %v9417_v51 = vpop.f32.mrf.mxu1  ;;  %v8369_v47 = vld [vmem:[%s9654_s8 + $0x330] sm:$0xff]  }
0x113f   : > { %7779 = vmatpush3.bf16.msra.mxu0 %v8317_v41  ;;  %7801 = vmatpush3.bf16.msra.mxu1 %v8318_v42  ;;  %v8346_v41 = vld [vmem:[%s9654_s8 + $0x2a0] sm:$0xff]   ;;  %v8347_v42 = vld [vmem:[%s9654_s8 + $0x258] sm:$0xff]   ;;  %v5366_v52 = vadd.f32 %v9415_v50, %v4895_v35  ;;  %v5407_v53 = vadd.f32 %v9417_v51, %v4903_v5  ;;  %v8370_v19 = vld [vmem:[%s9654_s8 + $0x3b0] sm:$0xff]  }
0x1140   : > { %v5367_v56 = vpop.f32.mrf.mxu0  ;;  %v5408_v57 = vpop.f32.mrf.mxu1  ;;  %7780 = vmatprep.subr.bf16.mxu0 %v8319_v46  ;;  %7802 = vmatprep.subr.bf16.mxu1 %v8320_v48  ;;  %v8349_v46 = vld [vmem:[%s9654_s8 + $0x218] sm:$0xff]  }
0x1141   : > { %v8350_v48 = vld [vmem:[%s9654_s8 + $0x298] sm:$0xff]   ;;  %v8354_v56 = vld [vmem:[%s9654_s8 + $0x290] sm:$0xff]   ;;  %v8355_v57 = vld [vmem:[%s9654_s8 + $0x248] sm:$0xff]   ;;  %v5424_v15 = vmax.f32 %v5366_v52, 0.0  ;;  %v5426_v40 = vmax.f32 %v5407_v53, 0.0 }
0x1142   : > { %v5368_v6 = vpop.f32.mrf.mxu0  ;;  %v5409_v7 = vpop.f32.mrf.mxu1  ;;  %v8365_v50 = vld [vmem:[%s9654_s8 + $0x338] sm:$0xff]  }
0x1143   : > { %7781 = vmatpush3.bf16.msra.mxu0 %v8321_v12  ;;  %7803 = vmatpush3.bf16.msra.mxu1 %v8322_v54  ;;  %v8351_v12 = vld [vmem:[%s9654_s8 + $0x250] sm:$0xff]   ;;  %v5282_v6 = vadd.f32 %v9392_v24, %v4875_v4  ;;  %v8358_v7 = vld [vmem:[%s9654_s8 + $0x288] sm:$0xff]   ;;  %v8362_v24 = vld [vmem:[%s9654_s8 + $0x280] sm:$0xff]   ;;  %v5440_v18 = vpack.c.bf16 %v5424_v15, %v5424_v15  ;;  %v5425_v4 = vmax.f32 %v9413_v49, 0.0 }
0x1144   : > { %7782 = vmatprep.subr.bf16.mxu0 %v8323_v62  ;;  %7804 = vmatprep.subr.bf16.mxu1 %v8324_v3  ;;  %v8352_v54 = vld [vmem:[%s9654_s8 + $0x2d0] sm:$0xff]   ;;  %v4883_v62 = vrot.slane %v9401_v32, %v8997_v37  ;;  %v8356_v3 = vld [vmem:[%s9654_s8 + $0x2c8] sm:$0xff]   ;;  %v8359_v37 = vld [vmem:[%s9654_s8 + $0x240] sm:$0xff]  }
0x1145   : > { %v5419_v13 = vmax.f32 %v5282_v6, 0.0  ;;  %v8366_v51 = vld [vmem:[%s9654_s8 + $0x3b8] sm:$0xff]   ;;  %v7361_v49 = vld [vmem:[%s9656_s2] ss:$0 sm:$0xff]  ;;  %s7101_s2 = sshll.u32 %s1014_s3, 3 }
0x1147   : > { %7783 = vmatpush3.bf16.msra.mxu0 %v8325_v44  ;;  %7805 = vmatpush3.bf16.msra.mxu1 %v8326_v26  ;;  %v5323_v44 = vadd.f32 %v9394_v25, %v4883_v62  ;;  %v8360_v26 = vld [vmem:[%s9654_s8 + $0x2c0] sm:$0xff]   ;;  %v8364_v25 = vld [vmem:[%s9654_s8 + $0x3f8] sm:$0xff]  }
0x1148   : > { %7784 = vmatprep.subr.bf16.mxu0 %v8327_v39  ;;  %7806 = vmatprep.subr.bf16.mxu1 %v8328_v14  ;;  %v8363_v39 = vld [vmem:[%s9654_s8 + $0x378] sm:$0xff]  }
0x1149   : > { %v5421_v14 = vmax.f32 %v5323_v44, 0.0 }
0x114b   : > { %7785 = vmatpush3.bf16.msra.mxu0 %v8329_v16  ;;  %7807 = vmatpush3.bf16.msra.mxu1 %v8330_v17  ;;  %v5435_v16 = vpack.c.bf16 %v5419_v13, %v5419_v13  ;;  %v5437_v17 = vpack.c.bf16 %v5421_v14, %v5421_v14 }
0x114c   : > { %7814 = vmatprep.subr.bf16.mxu0 %v8331_v60  ;;  %7836 = vmatprep.subr.bf16.mxu1 %v8332_v61  ;;  %v8368_v60 = vld [vmem:[%s9654_s8 + $0x3f0] sm:$0xff]   ;;  %v5442_v61 = vpack.c.bf16 %v5426_v40, %v5426_v40 }
0x114e   : > { %6587 = vmatmul.mubr.bf16.vlgmr.msra.gmra.mxu0 %v5431_v21  ;;  %6627 = vmatmul.mubr.bf16.vlgmr.msra.gmra.mxu1 %v5433_v22  ;;  %v8372_v21 = vld [vmem:[%s9654_s8 + $0x3e8] sm:$0xff]  }
0x114f   : > { %7815 = vmatpush3.bf16.msra.mxu0 %v8333_v20  ;;  %6666 = vmatprep.mubr.bf16.mxu0 %v5436_v63  ;;  %v8371_v20 = vld [vmem:[%s9654_s8 + $0x368] sm:$0xff]   ;;  %v8375_v63 = vld [vmem:[%s9654_s8 + $0x360] sm:$0xff]  }
0x1150   : > { %7837 = vmatpush3.bf16.msra.mxu1 %v8334_v59  ;;  %6706 = vmatprep.mubr.bf16.mxu1 %v5438_v31  ;;  %v8373_v22 = vld [vmem:[%s9654_s8 + $0x328] sm:$0xff]   ;;  %v8378_v31 = vld [vmem:[%s9654_s8 + $0x3a0] sm:$0xff]  }
0x1151   : > { %7816 = vmatprep.subr.bf16.mxu0 %v8335_v27  ;;  %7838 = vmatprep.subr.bf16.mxu1 %v8336_v23  ;;  %v8374_v59 = vld [vmem:[%s9654_s8 + $0x3a8] sm:$0xff]   ;;  %v8376_v27 = vld [vmem:[%s9654_s8 + $0x3e0] sm:$0xff]  }
0x1152   : > { %v8377_v23 = vld [vmem:[%s9654_s8 + $0x320] sm:$0xff]  }
0x1153   : > { %7817 = vmatpush3.bf16.msra.mxu0 %v8337_v28  ;;  %v8379_v28 = vld [vmem:[%s9654_s8 + $0x358] sm:$0xff]  }
0x1154   : > { %7839 = vmatpush3.bf16.msra.mxu1 %v8338_v29  ;;  %7818 = vmatprep.subr.bf16.mxu0 %v8339_v8  ;;  %v8380_v29 = vld [vmem:[%s9654_s8 + $0x3d8] sm:$0xff]  }
0x1155   : > { %7840 = vmatprep.subr.bf16.mxu1 %v8340_v9  ;;  %v8381_v8 = vld [vmem:[%s9654_s8 + $0x318] sm:$0xff]  }
0x1156   : > { %v8382_v9 = vld [vmem:[%s9654_s8 + $0x398] sm:$0xff]  }
0x1157   : > { %7819 = vmatpush3.bf16.msra.mxu0 %v8341_v33  ;;  %v8383_v33 = vld [vmem:[%s9654_s8 + $0x350] sm:$0xff]  }
0x1158   : > { %7841 = vmatpush3.bf16.msra.mxu1 %v8342_v30  ;;  %7820 = vmatprep.subr.bf16.mxu0 %v8343_v0  ;;  %v8384_v30 = vld [vmem:[%s9654_s8 + $0x3d0] sm:$0xff]  }
0x1159   : > { %7842 = vmatprep.subr.bf16.mxu1 %v8344_v34  ;;  %v8385_v0 = vld [vmem:[%s9654_s8 + $0x310] sm:$0xff]   ;;  %v4891_v34 = vrot.slane %v9401_v32, %v9061_v58  ;;  %v8393_v58 = vld [vmem:[%s9654_s8 + $0x300] sm:$0xff]  }
0x115b   : > { %7821 = vmatpush3.bf16.msra.mxu0 %v8345_v2  ;;  %v8386_v2 = vld [vmem:[%s9654_s8 + $0x390] sm:$0xff]  }
0x115c   : > { %7843 = vmatpush3.bf16.msra.mxu1 %v8346_v41  ;;  %7822 = vmatprep.subr.bf16.mxu0 %v8347_v42  ;;  %v8387_v41 = vld [vmem:[%s9654_s8 + $0x348] sm:$0xff]  }
0x115d   : > { %7844 = vmatprep.subr.bf16.mxu1 %v8348_v45  ;;  %v8388_v42 = vld [vmem:[%s9654_s8 + $0x3c8] sm:$0xff]  }
0x115e   : > { %v8389_v45 = vld [vmem:[%s9654_s8 + $0x308] sm:$0xff]  }
0x115f   : > { %7823 = vmatpush3.bf16.msra.mxu0 %v8349_v46  ;;  %v5364_v46 = vadd.f32 %v9409_v43, %v4891_v34  ;;  %v5441_v43 = vpack.c.bf16 %v5425_v4, %v5425_v4 }
0x1160   : > { %7845 = vmatpush3.bf16.msra.mxu1 %v8350_v48  ;;  %7824 = vmatprep.subr.bf16.mxu0 %v8351_v12  ;;  %v8390_v48 = vld [vmem:[%s9654_s8 + $0x388] sm:$0xff]   ;;  %v8391_v12 = vld [vmem:[%s9654_s8 + $0x340] sm:$0xff]  }
0x1161   : > { %7846 = vmatprep.subr.bf16.mxu1 %v8352_v54  ;;  %v8392_v54 = vld [vmem:[%s9654_s8 + $0x3c0] sm:$0xff]   ;;  %v5423_v32 = vmax.f32 %v5364_v46, 0.0 }
0x1163   : > { %7825 = vmatpush3.bf16.msra.mxu0 %v8353_v55  ;;  %v8394_v55 = vld [vmem:[%s9654_s8 + $0x380] sm:$0xff]  }
0x1164   : > { %7847 = vmatpush3.bf16.msra.mxu1 %v8354_v56  ;;  %7826 = vmatprep.subr.bf16.mxu0 %v8355_v57  ;;  %v5439_v56 = vpack.c.bf16 %v5423_v32, %v5423_v32  ;;  %v8396_v32 = vld [vmem:[%s9657_s23] sm:$0xff]  }
0x1165   : > { %7848 = vmatprep.subr.bf16.mxu1 %v8356_v3 }
0x1167   : > { %7827 = vmatpush3.bf16.msra.mxu0 %v8357_v36 }
0x1168   : > { %7849 = vmatpush3.bf16.msra.mxu1 %v8358_v7  ;;  %7828 = vmatprep.subr.bf16.mxu0 %v8359_v37 }
0x1169   : > { %7850 = vmatprep.subr.bf16.mxu1 %v8360_v26 }
0x116b   : > { %7829 = vmatpush3.bf16.msra.mxu0 %v8361_v11 }
0x116c   : > { %7851 = vmatpush3.bf16.msra.mxu1 %v8362_v24  ;;  %7858 = vmatprep.subr.bf16.mxu0 %v8363_v39 }
0x116d   : > { %7880 = vmatprep.subr.bf16.mxu1 %v8364_v25 }
0x116e   : > { %6667 = vmatmul.mubr.bf16.vlgmr.msra.gmra.mxu0 %v5435_v16 }
0x116f   : > { %6707 = vmatmul.mubr.bf16.vlgmr.msra.gmra.mxu1 %v5437_v17  ;;  %7859 = vmatpush3.bf16.msra.mxu0 %v8365_v50 }
0x1170   : > { %6746 = vmatprep.mubr.bf16.mxu0 %v5440_v18  ;;  %7881 = vmatpush3.bf16.msra.mxu1 %v8366_v51 }
0x1171   : > { %6786 = vmatprep.mubr.bf16.mxu1 %v5442_v61  ;;  %7860 = vmatprep.subr.bf16.mxu0 %v8367_v38 }
0x1172   : > { %7882 = vmatprep.subr.bf16.mxu1 %v8368_v60 }
0x1173   : > { %7861 = vmatpush3.bf16.msra.mxu0 %v8369_v47 }
0x1174   : > { %7883 = vmatpush3.bf16.msra.mxu1 %v8370_v19  ;;  %7862 = vmatprep.subr.bf16.mxu0 %v8371_v20 }
0x1175   : > { %7884 = vmatprep.subr.bf16.mxu1 %v8372_v21 }
0x1177   : > { %7863 = vmatpush3.bf16.msra.mxu0 %v8373_v22 }
0x1178   : > { %7885 = vmatpush3.bf16.msra.mxu1 %v8374_v59  ;;  %7864 = vmatprep.subr.bf16.mxu0 %v8375_v63 }
0x1179   : > { %7886 = vmatprep.subr.bf16.mxu1 %v8376_v27 }
0x117b   : > { %7865 = vmatpush3.bf16.msra.mxu0 %v8377_v23 }
0x117c   : > { %7887 = vmatpush3.bf16.msra.mxu1 %v8378_v31  ;;  %7866 = vmatprep.subr.bf16.mxu0 %v8379_v28 }
0x117d   : > { %7888 = vmatprep.subr.bf16.mxu1 %v8380_v29 }
0x117f   : > { %7867 = vmatpush3.bf16.msra.mxu0 %v8381_v8 }
0x1180   : > { %7889 = vmatpush3.bf16.msra.mxu1 %v8382_v9  ;;  %7868 = vmatprep.subr.bf16.mxu0 %v8383_v33 }
0x1181   : > { %7890 = vmatprep.subr.bf16.mxu1 %v8384_v30 }
0x1183   : > { %7869 = vmatpush3.bf16.msra.mxu0 %v8385_v0 }
0x1184   : > { %7891 = vmatpush3.bf16.msra.mxu1 %v8386_v2  ;;  %7870 = vmatprep.subr.bf16.mxu0 %v8387_v41 }
0x1185   : > { %7892 = vmatprep.subr.bf16.mxu1 %v8388_v42 }
0x1187   : > { %7871 = vmatpush3.bf16.msra.mxu0 %v8389_v45 }
0x1188   : > { %7893 = vmatpush3.bf16.msra.mxu1 %v8390_v48  ;;  %7872 = vmatprep.subr.bf16.mxu0 %v8391_v12 }
0x1189   : > { %7894 = vmatprep.subr.bf16.mxu1 %v8392_v54 }
0x118b   : > { %7873 = vmatpush3.bf16.msra.mxu0 %v8393_v58  ;;  %v8395_v58 = vld [vmem:[%s9657_s23 + $0x8] sm:$0xff]  }
0x118c   : > { %7895 = vmatpush3.bf16.msra.mxu1 %v8394_v55  ;;  %8026 = vmatprep.subr.bf16.mxu0 %v8539_v1 }
0x118d   : > { %8034 = vmatprep.subr.bf16.mxu1 %v8539_v1 }
0x118e   : > { %6747 = vmatmul.mubr.bf16.vlgmr.msra.gmra.mxu0 %v5439_v56 }
0x118f   : > { %6787 = vmatmul.mubr.bf16.vlgmr.msra.gmra.mxu1 %v5441_v43  ;;  %8030 = vmatprep.mubr.msk.bf16.mxu0 %vm8540_vm1, %v8539_v1  ;;  %v7490_v43 = vld [vmem:[%s9658_s5] ss:$0 sm:$0xff]  ;;  %s7501_s5 = sshll.u32 %s8753_s0, 7 }
0x1190   : > { %8038 = vmatprep.mubr.msk.bf16.mxu1 %vm8540_vm1, %v8539_v1  ;;  %8027 = vmatpush3.bf16.msra.mxu0 %v8395_v58  ;;  %s6994_s8 = scalar_lea.hbm %s8730_s4, %s7501_s5 }
0x1191   : > { %8028 = vmatprep.subr.bf16.mxu0 %v8539_v1 }
0x1194   : > { %8029 = vmatpush3.bf16.msra.mxu0 %v8396_v32 }
0x11ee   : > { %v7742_v57 = vpop.f32.mrf.mxu0  ;;  %v7764_v62 = vpop.f32.mrf.mxu1 }
0x11f0   : > { %v7743_v3 = vpop.f32.mrf.mxu0  ;;  %v7765_v35 = vpop.f32.mrf.mxu1 }
0x11f1   : > { %v7744_v5 = vadd.f32 %v7743_v3, %v7742_v57  ;;  %v7766_v36 = vadd.f32 %v7765_v35, %v7764_v62  ;;  %v7491_v62 = vld [vmem:[%s9659_s17] ss:$0 sm:$0xff]  ;;  %s1016_s17 = scalar_lea.vmem [#allocation3], %s7101_s2 }
0x11f2   : > { %v7745_v6 = vpop.f32.mrf.mxu0  ;;  %v7767_v7 = vpop.f32.mrf.mxu1  ;;  %s6996_s6 = sshll.u32 %s1016_s17, 4  ;;  %s6997_s6 = int_to_ptr.vmem [resolvable:$true] %s6996_s6 }
0x11f3   : > { %v6509_v37 = vadd.f32 %v7744_v5, %v7361_v49  ;;  %v8397_v5 = vld [vmem:[%s8720_s20 + $0x8] sm:$0xff]   ;;  %v7492_v6 = vld [vmem:[%s9660_s12] ss:$0 sm:$0xff]  ;;  %s8444_s12 = scalar_lea.vmem %s6997_s6, 128  ;;  %p8451_p0 = scmp.lt.s32.totalorder %s6997_s6, %s8449_s14 }
0x11f4   : > { %v7746_v44 = vpop.f32.mrf.mxu0  ;;  %v7768_v26 = vpop.f32.mrf.mxu1  ;;  %8035 = vmatpush3.bf16.msra.mxu1 %v8397_v5  ;;  %p8445_p11 = scmp.ne.s32.totalorder %s6997_s6, %s8444_s12  ;;  %p8452_p1 = scmp.lt.s32.totalorder %s8450_s16, %s8444_s12 }
0x11f5   : > { %v6549_v52 = vadd.f32 %v7766_v36, %v6509_v37  ;;  %8036 = vmatprep.subr.bf16.mxu1 %v8539_v1  ;;  %v8398_v36 = vld [vmem:[%s8720_s20] sm:$0xff]  }
0x11f6   : > { %p8446_p12 = pnand %p8445_p11, %p8770_p5  ;;  %p8453_p2 = por %p8452_p1, %p8451_p0 }
0x11f8   : > { %8037 = vmatpush3.bf16.msra.mxu1 %v8398_v36  ;;  %p8447_p13 = pneg %p8446_p12 }
0x11fa   : > { %p8454_p3 = pnand %p8453_p2, %p8447_p13 }
0x120e   : > { %v7786_v53 = vpop.f32.mrf.mxu0  ;;  %v7808_v11 = vpop.f32.mrf.mxu1 }
0x1210   : > { %v7787_v13 = vpop.f32.mrf.mxu0  ;;  %v7809_v24 = vpop.f32.mrf.mxu1 }
0x1211   : > { %v7788_v61 = vadd.f32 %v7787_v13, %v7786_v53  ;;  %v7810_v19 = vadd.f32 %v7809_v24, %v7808_v11  ;;  %v7496_v13 = vld [vmem:[%s8725_s27] ss:$0 sm:$0xff] }
0x1212   : > { %v7789_v39 = vpop.f32.mrf.mxu0  ;;  %v7811_v14 = vpop.f32.mrf.mxu1 }
0x1213   : > { %v6589_v47 = vadd.f32 %v7788_v61, %v6549_v52 }
0x1214   : > { %v7790_v25 = vpop.f32.mrf.mxu0  ;;  %v7812_v15 = vpop.f32.mrf.mxu1 }
0x1215   : > { %v6629_v21 = vadd.f32 %v7810_v19, %v6589_v47 }
0x122e   : > { %v7830_v40 = vpop.f32.mrf.mxu0 }
0x122f   : > { %v7852_v50 = vpop.f32.mrf.mxu1 }
0x1230   : > { %v7831_v16 = vpop.f32.mrf.mxu0 }
0x1231   : > { %v7853_v51 = vpop.f32.mrf.mxu1  ;;  %v7832_v20 = vadd.f32 %v7831_v16, %v7830_v40 }
0x1232   : > { %v7833_v17 = vpop.f32.mrf.mxu0  ;;  %v7854_v63 = vadd.f32 %v7853_v51, %v7852_v50 }
0x1233   : > { %v7855_v38 = vpop.f32.mrf.mxu1  ;;  %v6669_v22 = vadd.f32 %v7832_v20, %v6629_v21 }
0x1234   : > { %v7834_v18 = vpop.f32.mrf.mxu0 }
0x1235   : > { %v7856_v60 = vpop.f32.mrf.mxu1  ;;  %v6709_v31 = vadd.f32 %v7854_v63, %v6669_v22 }
0x124e   : > { %v7874_v59 = vpop.f32.mrf.mxu0 }
0x124f   : > { %v7896_v27 = vpop.f32.mrf.mxu1 }
0x1250   : > { %v7875_v23 = vpop.f32.mrf.mxu0 }
0x1251   : > { %v7876_v28 = vadd.f32 %v7875_v23, %v7874_v59  ;;  %v7897_v29 = vpop.f32.mrf.mxu1 }
0x1252   : > { %v7877_v8 = vpop.f32.mrf.mxu0  ;;  %v7898_v33 = vadd.f32 %v7897_v29, %v7896_v27 }
0x1253   : > { %v6749_v9 = vadd.f32 %v7876_v28, %v6709_v31  ;;  %v7899_v30 = vpop.f32.mrf.mxu1 }
0x1254   : > { %v7878_v0 = vpop.f32.mrf.mxu0 }
0x1255   : > { %v6789_v34 = vadd.f32 %v7898_v33, %v6749_v9  ;;  %v7900_v2 = vpop.f32.mrf.mxu1 }
0x1257   : > { %v6794_v41 = vadd.f32 %v6789_v34, %v9285_v10 }
0x1259   : > { %v6797_v42 = vsel %vm1110_vm3, %v6794_v41, 0.0 }
0x125a   : > { %6798 = vadd.xlane.f32.xlu0 %v6797_v42 }
0x12e3   : > { %v6799_v45 = vpop.xlane.xlu0 %6798 }
0x12e4   : > { %v6800_v46 = vmul.f32 0.03125, %v6799_v45 }
0x12e6   : > { %v6801_v48 = vsub.f32 %v6794_v41, %v6800_v46 }
0x12e8   : > { %v6802_v12 = vmul.f32 %v6801_v48, %v6801_v48 }
0x12ea   : > { %v6803_v54 = vsel %vm1110_vm3, %v6802_v12, 0.0 }
0x12eb   : > { %6804 = vadd.xlane.f32.xlu0 %v6803_v54 }
0x1374   : > { %v6805_v10 = vpop.xlane.xlu0 %6804 }
0x1375   : > { %v6806_v55 = vmul.f32 0.03125, %v6805_v10 }
0x1377   : > { %v6807_v4 = vadd.f32 1e-05, %v6806_v55 }
0x1379   : > { %8437 = vrsqrt.f32 %v6807_v4 }
0x1386   : > { %v8438_v56 = vpop.eup %8437 }
0x1387   : > { %v6809_v57 = vmul.f32 %v8438_v56, %v6801_v48 }
0x1389   : > { %v6816_v49 = vmul.f32 %v7490_v43, %v6809_v57 }
0x138b   : > { %v6823_v3 = vadd.f32 %v7491_v62, %v6816_v49 }
0x138d   : > { %v6824_v35 = vpack.c.bf16 %v6823_v3, %v6823_v3 }
0x138f   : > { %8031 = vmatmul.mubr.msk.bf16.vlgmr.msra.gmra.mxu0 %vm1110_vm3, %v6824_v35 }
0x144f   : > { %v6885_v7 = vpop.f32.mrf.mxu0 }
0x1450   : > { %v6886_v37 = vadd.f32 %v7492_v6, %v6885_v7 }
0x1451   : > { %v8032_v44 = vpop.f32.mrf.mxu0 }
0x1452   : > { %v6891_v26 = vmax.f32 %v6886_v37, 0.0 }
0x1453   : > { %v6888_v52 = vpop.f32.mrf.mxu0 }
0x1454   : > { %v6892_v53 = vpack.c.bf16 %v6891_v26, %v6891_v26 }
0x1455   : > { %v8033_v11 = vpop.f32.mrf.mxu0 }
0x1456   : > { %8039 = vmatmul.mubr.msk.bf16.vlgmr.msra.gmra.mxu1 %vm1110_vm3, %v6892_v53 }
0x1516   : > { %v6953_v24 = vpop.f32.mrf.mxu1 }
0x1517   : > { %v6954_v39 = vadd.f32 %v7496_v13, %v6953_v24 }
0x1518   : > { %v8040_v14 = vpop.f32.mrf.mxu1 }
0x1519   : > { %v6959_v25 = vmax.f32 %v6954_v39, 0.0 }
0x151a   : > { %v6956_v15 = vpop.f32.mrf.mxu1 }
0x151b   : > { %v6961_v1 = vsel %vm6960_vm8, %v6959_v25, -inf }
0x151c   : > { %v6962_v40 = vrot.slane %v6961_v1, 4  ;;  %v8041_v50 = vpop.f32.mrf.mxu1 }
0x151e   : > { %v6963_v16 = vmax.f32 %v6961_v1, %v6962_v40 }
0x1520   : > { %v6964_v51 = vrot.slane %v6963_v16, 2 }
0x1522   : > { %v6965_v17 = vmax.f32 %v6963_v16, %v6964_v51 }
0x1524   : > { %v6966_v38 = vrot.slane %v6965_v17, 1 }
0x1526   : > { %v6967_v18 = vmax.f32 %v6965_v17, %v6966_v38 }
0x1528   : > { %v6968_v60 = vsub.f32 %v6959_v25, %v6967_v18 }
0x152a   : > { %v6969_v61 = vmul.f32 1.442695, %v6968_v60 }
0x152c   : > { %8439 = vpow2.f32 %v6969_v61 }
0x1539   : > { %v8440_v47 = vpop.eup %8439 }
0x153a   : > { %v6971_v19 = vsel %vm6960_vm8, %v8440_v47, 0.0 }
0x153b   : > { %v6972_v20 = vrot.slane %v6971_v19, 4 }
0x153d   : > { %v6973_v21 = vadd.f32 %v6972_v20, %v6971_v19 }
0x153f   : > { %v6974_v22 = vrot.slane %v6973_v21, 2 }
0x1541   : > { %v6975_v59 = vadd.f32 %v6974_v22, %v6973_v21 }
0x1543   : > { %v6976_v63 = vrot.slane %v6975_v59, 1 }
0x1545   : > { %v6977_v27 = vadd.f32 %v6976_v63, %v6975_v59 }
0x1547   : > { %8441 = vlog2.f32 %v6977_v27 }
0x1554   : > { %v8442_v23 = vpop.eup %8441 }
0x1555   : > { %v6979_v31 = vmul.f32 0.6931472, %v8442_v23 }
0x1557   : > { %v6980_v28 = vsub.f32 %v6968_v60, %v6979_v31 }
0x1559   : > { %6981 = vst.msk [vmem:[%s1016_s17] sm:$0xff] %vm6960_vm8, %v6980_v28 }
0x155a   : > { %8457 = shalt.err (!%p8454_p3)
}
0x155b   : > { %s8458_s0 = scalar_lea.hbm %s6994_s8, 128  ;;  %s8462_s3 = scalar_lea.hbm %s8730_s4, 256 }
0x155c   : > { %p8459_p4 = scmp.ne.s32.totalorder %s6994_s8, %s8458_s0  ;;  %p8463_p9 = scmp.lt.s32.totalorder %s6994_s8, %s8730_s4 }
0x155d   : > { %p8464_p10 = scmp.lt.s32.totalorder %s8462_s3, %s8458_s0 }
0x155e   : > { %p8460_p7 = pnand %p8459_p4, %p8770_p5 }
0x155f   : > { %p8465_p11 = por %p8464_p10, %p8463_p9 }
0x1560   : > { %p8461_p8 = pneg %p8460_p7 }
0x1562   : > { %p8466_p12 = pnand %p8465_p11, %p8461_p8 }
0x1564   : > { %8469 = shalt.err (!%p8466_p12)
}
0x1565   : > { %8042 = dma.vmem_to_hbm [thread:$0]  (%p8770_p5), %s6997_s6, 128, %s6994_s8, %s6983_s9  }
0x1566 PF: > { %p8048_p13 = scmp.ge.s32.totalorder %s8504_s15, 2  ;;  %s7008_s14 = sand.u32 1, %s8492_s7  }
0x1567   : > { %s7009_s12 = scalar_lea.sflag [#allocation4], %s7008_s14 }
0x1568   : > { %p8045_p0 = pnand %p8048_p13, %p8774_p6 }
0x156a   : > { %p8046_p1 = pneg %p8045_p0 }
0x156c   : > { %8487 = dma.done.wait (%p8046_p1), %s7009_s12, 128  }
0x156d   : > { %8489 = vsyncadd (%p8046_p1), %s7009_s12, 4294967168  ;;  %p77_p2 = scmp.ge.s32.totalorder %s8757_s18, 4   ;;  %s9661_s7 = smov %s8496_s10 }
0x156e   : > { %s9662_s10 = smov %s8500_s11  ;;  %s9663_s11 = smov %s8768_s26 }
0x156f   : > { %s9664_s15 = smov %s8757_s18  ;;  %79 = sbr.rel (!%p77_p2) target bundleno = 72 (0x48), region = 223 }
0x1574   :  { %7014 = vsyncpa [#allocation4], 1 }
0x1575   :  { %7016 = vsyncpa [#allocation4 + $0x1], 1 }

</bundles_post_ra>
